<compile_context>
chip_gen: v6e
topology: v6e:2x2x1
jax: 0.10.0
libtpu: 0.0.40
codegen_flags: <defaults>
</compile_context>

<pallas_src>
from functools import partial

import jax
import jax.numpy as jnp
from jax.experimental import pallas as pl
from jax.experimental.pallas import tpu as pltpu


# ----------------------------------------------------------------------------
# Helpers
# ----------------------------------------------------------------------------
def _round_up(x, m):
    return (x + m - 1) // m * m


def _pick_batch_tile(nb):
    # nb is a multiple of 8; pick a power-of-two tile that divides it.
    for cand in (64, 32, 16, 8):
        if nb % cand == 0:
            return cand
    return nb


def _pick_channel_tile(cp):
    # cp is a multiple of 128; pick the largest of 512/256/128 dividing it.
    for cand in (512, 256, 128):
        if cp % cand == 0:
            return cand
    return 128


def _fit_x_block(tb, tc, s, budget=6 * 1024 * 1024):
    # Bound the (tb, tc, S) f32 input block (double-buffered by Pallas).
    while tb * tc * s * 4 > budget and tc > 128:
        tc //= 2          # still divides cp (power-of-two chain)
    while tb * tc * s * 4 > budget and tb > 8:
        tb //= 2          # still divides nb
    return tb, tc


# ----------------------------------------------------------------------------
# Fused Pallas kernels
#   grid = (batch tiles [parallel], C tiles [arbitrary / reduction])
#   x block:  (tb, tc, S) f32   -> pooled (tb, tc) via lane reduction
#   acc:      (tb, D1p)  f32 scratch, accumulated across C tiles
#   epilogue on the last C tile: bias (+ ReLU + second matmul + bias)
# ----------------------------------------------------------------------------
def _head_simple_kernel(x_ref, w_ref, b_ref, o_ref, acc_ref):
    k = pl.program_id(1)

    @pl.when(k == 0)
    def _():
        acc_ref[...] = jnp.zeros_like(acc_ref)

    pooled = jnp.mean(x_ref[...], axis=-1).astype(jnp.bfloat16)     # (tb, tc)
    acc_ref[...] += jnp.dot(pooled, w_ref[...],
                            preferred_element_type=jnp.float32)

    @pl.when(k == pl.num_programs(1) - 1)
    def _():
        o_ref[...] = (acc_ref[...] + b_ref[...]).astype(o_ref.dtype)


def _head_mlp_kernel(x_ref, w1_ref, b1_ref, w2_ref, b2_ref, o_ref, acc_ref):
    k = pl.program_id(1)

    @pl.when(k == 0)
    def _():
        acc_ref[...] = jnp.zeros_like(acc_ref)

    pooled = jnp.mean(x_ref[...], axis=-1).astype(jnp.bfloat16)     # (tb, tc)
    acc_ref[...] += jnp.dot(pooled, w1_ref[...],
                            preferred_element_type=jnp.float32)

    @pl.when(k == pl.num_programs(1) - 1)
    def _():
        h = jnp.maximum(acc_ref[...] + b1_ref[...], 0.0).astype(jnp.bfloat16)
        o_ref[...] = (jnp.dot(h, w2_ref[...],
                              preferred_element_type=jnp.float32)
                      + b2_ref[...]).astype(o_ref.dtype)


# ----------------------------------------------------------------------------
# Parameters: raw init (matches the PyTorch module) + one-time layout prep.
# ----------------------------------------------------------------------------
def init_custom_head_params(key, in_features, num_classes,
                            add_intermediate_layer=False,
                            intermediate_dim=None, init_gain=0.02):
    k1, k2 = jax.random.split(key)
    if add_intermediate_layer:
        assert intermediate_dim is not None
        return {
            "fc1_w": init_gain * jax.random.normal(
                k1, (in_features, intermediate_dim), jnp.float32),
            "fc1_b": jnp.zeros((intermediate_dim,), jnp.float32),
            "fc2_w": init_gain * jax.random.normal(
                k2, (intermediate_dim, num_classes), jnp.float32),
            "fc2_b": jnp.zeros((num_classes,), jnp.float32),
        }
    return {
        "fc_w": init_gain * jax.random.normal(
            k1, (in_features, num_classes), jnp.float32),
        "fc_b": jnp.zeros((num_classes,), jnp.float32),
    }


def prepare_custom_head_params(params):
    """One-time prep: pad to MXU-friendly shapes, cast weights to bf16.

    Done once (outside the forward path) so no per-forward HBM pad/cast pass.
    """
    if "fc1_w" in params:
        c, d1 = params["fc1_w"].shape
        _, d2 = params["fc2_w"].shape
        cp, d1p, d2p = _round_up(c, 128), _round_up(d1, 128), _round_up(d2, 128)
        return {
            "mlp": True,
            "dims": (c, d1, d2),
            "w1": jnp.pad(params["fc1_w"],
                          ((0, cp - c), (0, d1p - d1))).astype(jnp.bfloat16),
            "b1": jnp.pad(params["fc1_b"],
                          ((0, d1p - d1),)).reshape(1, d1p).astype(jnp.float32),
            "w2": jnp.pad(params["fc2_w"],
                          ((0, d1p - d1), (0, d2p - d2))).astype(jnp.bfloat16),
            "b2": jnp.pad(params["fc2_b"],
                          ((0, d2p - d2),)).reshape(1, d2p).astype(jnp.float32),
        }
    c, d = params["fc_w"].shape
    cp, dp = _round_up(c, 128), _round_up(d, 128)
    return {
        "mlp": False,
        "dims": (c, d),
        "w": jnp.pad(params["fc_w"],
                     ((0, cp - c), (0, dp - d))).astype(jnp.bfloat16),
        "b": jnp.pad(params["fc_b"],
                     ((0, dp - d),)).reshape(1, dp).astype(jnp.float32),
    }


# ----------------------------------------------------------------------------
# Forward (matches the PyTorch module's forward)
# ----------------------------------------------------------------------------
def custom_head_forward(prepped, x_nchw, pre_logits=None):
    if callable(pre_logits):
        x_nchw = pre_logits(x_nchw)      # plain-JAX hook, see TODO above

    n, c, h, w = x_nchw.shape
    s = h * w
    x = x_nchw.reshape(n, c, s).astype(jnp.float32)   # free reshape, no relayout

    cp = _round_up(c, 128)
    nb = _round_up(n, 8)
    if cp != c or nb != n:                # only when unaligned (rare)
        x = jnp.pad(x, ((0, nb - n), (0, cp - c), (0, 0)))

    tb = _pick_batch_tile(nb)
    tc = _pick_channel_tile(cp)
    tb, tc = _fit_x_block(tb, tc, s)
    grid = (nb // tb, cp // tc)

    compiler_params = pltpu.CompilerParams(
        dimension_semantics=("parallel", "arbitrary"),
        vmem_limit_bytes=48 * 1024 * 1024)

    if prepped["mlp"]:
        _, d1, d2 = prepped["dims"]
        d1p = prepped["w1"].shape[1]
        d2p = prepped["w2"].shape[1]
        cost = pl.CostEstimate(
            flops=2 * n * c * d1 + 2 * n * d1 * d2 + n * c * s,
            transcendentals=0,
            bytes_accessed=nb * cp * s * 4 + cp * d1p * 2 + d1p * d2p * 2
                           + nb * d2p * 4)
        out = pl.pallas_call(
            _head_mlp_kernel,
            out_shape=jax.ShapeDtypeStruct((nb, d2p), jnp.float32),
            grid_spec=pltpu.PrefetchScalarGridSpec(
                num_scalar_prefetch=0,
                grid=grid,
                in_specs=[
                    pl.BlockSpec((tb, tc, s), lambda i, k: (i, k, 0)),
                    pl.BlockSpec((tc, d1p), lambda i, k: (k, 0)),
                    pl.BlockSpec((1, d1p), lambda i, k: (0, 0)),
                    pl.BlockSpec((d1p, d2p), lambda i, k: (0, 0)),
                    pl.BlockSpec((1, d2p), lambda i, k: (0, 0)),
                ],
                out_specs=pl.BlockSpec((tb, d2p), lambda i, k: (i, 0)),
                scratch_shapes=[pltpu.VMEM((tb, d1p), jnp.float32)],
            ),
            compiler_params=compiler_params,
            cost_estimate=cost,
        )(x, prepped["w1"], prepped["b1"], prepped["w2"], prepped["b2"])
        return out[:n, :d2]

    _, d = prepped["dims"]
    dp = prepped["w"].shape[1]
    cost = pl.CostEstimate(
        flops=2 * n * c * d + n * c * s,
        transcendentals=0,
        bytes_accessed=nb * cp * s * 4 + cp * dp * 2 + nb * dp * 4)
    out = pl.pallas_call(
        _head_simple_kernel,
        out_shape=jax.ShapeDtypeStruct((nb, dp), jnp.float32),
        grid_spec=pltpu.PrefetchScalarGridSpec(
            num_scalar_prefetch=0,
            grid=grid,
            in_specs=[
                pl.BlockSpec((tb, tc, s), lambda i, k: (i, k, 0)),
                pl.BlockSpec((tc, dp), lambda i, k: (k, 0)),
                pl.BlockSpec((1, dp), lambda i, k: (0, 0)),
            ],
            out_specs=pl.BlockSpec((tb, dp), lambda i, k: (i, 0)),
            scratch_shapes=[pltpu.VMEM((tb, dp), jnp.float32)],
        ),
        compiler_params=compiler_params,
        cost_estimate=cost,
    )(x, prepped["w"], prepped["b"])
    return out[:n, :d]


# ----------------------------------------------------------------------------
if __name__ == "__main__":
    key = jax.random.PRNGKey(0)
    batch, in_features, spatial, num_classes = 2, 256, 8, 8
    x = jax.random.normal(jax.random.fold_in(key, 0),
                          (batch, in_features, spatial, spatial), jnp.float32)
    ref_pool = jnp.mean(x, axis=(2, 3))

    # Default head: single Linear layer.
    p_simple = init_custom_head_params(jax.random.fold_in(key, 1),
                                       in_features, num_classes)
    prepped_simple = prepare_custom_head_params(p_simple)
    out_simple = jax.block_until_ready(custom_head_forward(prepped_simple, x))
    ref_simple = ref_pool @ p_simple["fc_w"] + p_simple["fc_b"]
    assert out_simple.shape == (batch, num_classes)
    assert out_simple.dtype == jnp.float32
    assert jnp.allclose(out_simple, ref_simple, rtol=5e-2, atol=1e-2)

    # Head with intermediate layer: Linear -> ReLU -> Linear.
    p_mid = init_custom_head_params(jax.random.fold_in(key, 2),
                                    in_features, num_classes,
                                    add_intermediate_layer=True,
                                    intermediate_dim=128)
    prepped_mid = prepare_custom_head_params(p_mid)
    out_mid = jax.block_until_ready(custom_head_forward(prepped_mid, x))
    h_ref = jnp.maximum(ref_pool @ p_mid["fc1_w"] + p_mid["fc1_b"], 0.0)
    ref_mid = h_ref @ p_mid["fc2_w"] + p_mid["fc2_b"]
    assert out_mid.shape == (batch, num_classes)
    assert jnp.allclose(out_mid, ref_mid, rtol=5e-2, atol=1e-2)

    print("KERNEL_OK")
</pallas_src>

<mosaic_0001>
module attributes {stable_mosaic.version = 11 : i64} {
  func.func @_head_simple_kernel(%arg0: i32, %arg1: i32, %arg2: memref<8x256x64xf32, #tpu.memory_space<vmem>>, %arg3: memref<256x128xbf16, #tpu.memory_space<vmem>>, %arg4: memref<1x128xf32, #tpu.memory_space<vmem>>, %arg5: memref<8x128xf32, #tpu.memory_space<vmem>>, %arg6: memref<8x128xf32, #tpu.memory_space<vmem>>) attributes {dimension_semantics = [#tpu.dimension_semantics<parallel>, #tpu.dimension_semantics<arbitrary>], iteration_bounds = array<i64: 1, 1>, scalar_prefetch = 0 : i64, scratch_operands = 1 : i64, tpu.core_type = #tpu.core_type<tc>, window_params = [{transform_indices = @transform_0, window_bounds = array<i64: 8, 256, 64>}, {transform_indices = @transform_1, window_bounds = array<i64: 256, 128>}, {pipeline_mode = #tpu.pipeline_mode<synchronous>, transform_indices = @transform_2, window_bounds = array<i64: 1, 128>}, {transform_indices = @transform_3, window_bounds = array<i64: 8, 128>}]} {
    %c0_i32 = arith.constant 0 : i32
    %0 = arith.cmpi eq, %arg1, %c0_i32 : i32
    %1 = arith.extui %0 : i1 to i32
    %c0_i32_0 = arith.constant 0 : i32
    %2 = arith.cmpi ne, %1, %c0_i32_0 : i32
    scf.if %2 {
      %cst_13 = arith.constant 0.000000e+00 : f32
      %16 = vector.broadcast %cst_13 : f32 to vector<8x128xf32>
      %c0_14 = arith.constant 0 : index
      %c0_15 = arith.constant 0 : index
      %17 = vector.load %arg6[%c0_14, %c0_15] : memref<8x128xf32, #tpu.memory_space<vmem>>, vector<8x128xf32>
      tpu.vector_store %arg6[%c0_14, %c0_15], %16 {strides = array<i32>} : memref<8x128xf32, #tpu.memory_space<vmem>>, vector<8x128xf32>,
    } else {
    }
    %c0 = arith.constant 0 : index
    %c0_1 = arith.constant 0 : index
    %c0_2 = arith.constant 0 : index
    %3 = vector.load %arg2[%c0, %c0_1, %c0_2] : memref<8x256x64xf32, #tpu.memory_space<vmem>>, vector<8x256x64xf32>
    %cst = arith.constant dense<0.000000e+00> : vector<8x256xf32>
    %4 = vector.multi_reduction <add>, %3, %cst [2] : vector<8x256x64xf32> to vector<8x256xf32>
    %cst_3 = arith.constant 6.400000e+01 : f32
    %5 = vector.broadcast %cst_3 : f32 to vector<8x256xf32>
    %6 = arith.divf %4, %5 : vector<8x256xf32>
    %7 = arith.truncf %6 : vector<8x256xf32> to vector<8x256xbf16>
    %c0_4 = arith.constant 0 : index
    %c0_5 = arith.constant 0 : index
    %8 = vector.load %arg6[%c0_4, %c0_5] : memref<8x128xf32, #tpu.memory_space<vmem>>, vector<8x128xf32>
    %c0_6 = arith.constant 0 : index
    %c0_7 = arith.constant 0 : index
    %9 = vector.load %arg3[%c0_6, %c0_7] : memref<256x128xbf16, #tpu.memory_space<vmem>>, vector<256x128xbf16>
    %cst_8 = arith.constant dense<0.000000e+00> : vector<8x128xf32>
    %10 = tpu.matmul %7, %9, %cst_8 {dimension_numbers = #tpu.dot_dimension_numbers<[1], [0], [0], [1], [0, 0, 1, 1], [], []>} : vector<8x256xbf16>, vector<256x128xbf16>, vector<8x128xf32> -> vector<8x128xf32>
    %11 = arith.addf %8, %10 : vector<8x128xf32>
    %c0_9 = arith.constant 0 : index
    %c0_10 = arith.constant 0 : index
    %12 = vector.load %arg6[%c0_9, %c0_10] : memref<8x128xf32, #tpu.memory_space<vmem>>, vector<8x128xf32>
    tpu.vector_store %arg6[%c0_9, %c0_10], %11 {strides = array<i32>} : memref<8x128xf32, #tpu.memory_space<vmem>>, vector<8x128xf32>,
    %c0_i32_11 = arith.constant 0 : i32
    %13 = arith.cmpi eq, %arg1, %c0_i32_11 : i32
    %14 = arith.extui %13 : i1 to i32
    %c0_i32_12 = arith.constant 0 : i32
    %15 = arith.cmpi ne, %14, %c0_i32_12 : i32
    scf.if %15 {
      %c0_13 = arith.constant 0 : index
      %c0_14 = arith.constant 0 : index
      %16 = vector.load %arg6[%c0_13, %c0_14] : memref<8x128xf32, #tpu.memory_space<vmem>>, vector<8x128xf32>
      %c0_15 = arith.constant 0 : index
      %c0_16 = arith.constant 0 : index
      %17 = vector.load %arg4[%c0_15, %c0_16] : memref<1x128xf32, #tpu.memory_space<vmem>>, vector<1x128xf32>
      %18 = vector.broadcast %17 : vector<1x128xf32> to vector<8x128xf32>
      %19 = arith.addf %16, %18 : vector<8x128xf32>
      %c0_17 = arith.constant 0 : index
      %c0_18 = arith.constant 0 : index
      %20 = vector.load %arg5[%c0_17, %c0_18] : memref<8x128xf32, #tpu.memory_space<vmem>>, vector<8x128xf32>
      tpu.vector_store %arg5[%c0_17, %c0_18], %19 {strides = array<i32>} : memref<8x128xf32, #tpu.memory_space<vmem>>, vector<8x128xf32>,
    } else {
    }
    return
  }
  func.func @transform_0(%arg0: i32, %arg1: i32) -> (i32, i32, i32) {
    %c0_i32 = arith.constant 0 : i32
    %c0_i32_0 = arith.constant 0 : i32
    return %arg0, %arg1, %c0_i32 : i32, i32, i32
  }
  func.func @transform_1(%arg0: i32, %arg1: i32) -> (i32, i32) {
    %c0_i32 = arith.constant 0 : i32
    %c0_i32_0 = arith.constant 0 : i32
    return %arg1, %c0_i32 : i32, i32
  }
  func.func @transform_2(%arg0: i32, %arg1: i32) -> (i32, i32) {
    %c0_i32 = arith.constant 0 : i32
    %c0_i32_0 = arith.constant 0 : i32
    %c0_i32_1 = arith.constant 0 : i32
    return %c0_i32, %c0_i32_0 : i32, i32
  }
  func.func @transform_3(%arg0: i32, %arg1: i32) -> (i32, i32) {
    %c0_i32 = arith.constant 0 : i32
    %c0_i32_0 = arith.constant 0 : i32
    return %arg0, %c0_i32 : i32, i32
  }
}

</mosaic_0001>

<bundles_post_ra>
// kernel: tpu_custom_call.1
= control target key start
LH: loop header
LB: loop body
LE: loop exit
PB: predicated region body
PF: predicated region fallthrough
CT: control target
= control target key end

     0   :  { %vm277_vm0 = vcmask 523264   ;;  %s5299_s0 = inlined_call_operand.vmem [shape: f32[8,256,64], index: 0, kind: input, shape index: {}]   ;;  %s5300_s1 = inlined_call_operand.vmem [shape: bf16[256,128], index: 1, kind: input, shape index: {}]   ;;  %s5301_s2 = inlined_call_operand.vmem [shape: f32[1,128], index: 2, kind: input, shape index: {}]   ;;  %s5302_s3 = inlined_call_operand.hbm [shape: f32[8,128], index: 3, kind: output, shape index: {}]  }
   0x1   :  { %v23_v0 = vld [vmem:[%s5299_s0 + $0x10] sm:$0xff]  ;;  %v21_v1 = vld [vmem:[%s5299_s0] sm:$0xff]  ;;  %v24_v2 = vld [vmem:[%s5299_s0 + $0x18] sm:$0xff] }
   0x2   :  { %v284_v3 = vsel %vm277_vm0, %v23_v0, 0.0  ;;  %v278_v4 = vsel %vm277_vm0, %v21_v1, 0.0  ;;  %v22_v5 = vld [vmem:[%s5299_s0 + $0x8] sm:$0xff]  ;;  %v287_v6 = vsel %vm277_vm0, %v24_v2, 0.0  ;;  %v25_v9 = vld [vmem:[%s5299_s0 + $0x20] sm:$0xff]  ;;  %v28_v12 = vld [vmem:[%s5299_s0 + $0x38] sm:$0xff] }
   0x3   :  { %285 = vadd.xlane.f32.xlu1 %v284_v3  ;;  %279 = vadd.xlane.f32.xlu0 %v278_v4  ;;  %v281_v7 = vsel %vm277_vm0, %v22_v5, 0.0  ;;  %v26_v8 = vld [vmem:[%s5299_s0 + $0x28] sm:$0xff]  ;;  %v290_v11 = vsel %vm277_vm0, %v25_v9, 0.0  ;;  %v27_v13 = vld [vmem:[%s5299_s0 + $0x30] sm:$0xff]  ;;  %v299_v14 = vsel %vm277_vm0, %v28_v12, 0.0  ;;  %v29_v17 = vld [vmem:[%s5299_s0 + $0x40] sm:$0xff] }
   0x4   :  { %v293_v10 = vsel %vm277_vm0, %v26_v8, 0.0  ;;  %v296_v15 = vsel %vm277_vm0, %v27_v13, 0.0  ;;  %v30_v16 = vld [vmem:[%s5299_s0 + $0x48] sm:$0xff]  ;;  %v302_v19 = vsel %vm277_vm0, %v29_v17, 0.0  ;;  %v32_v20 = vld [vmem:[%s5299_s0 + $0x58] sm:$0xff]  ;;  %v31_v21 = vld [vmem:[%s5299_s0 + $0x50] sm:$0xff] }
   0x5   :  { %v305_v18 = vsel %vm277_vm0, %v30_v16, 0.0  ;;  %v311_v22 = vsel %vm277_vm0, %v32_v20, 0.0  ;;  %v308_v23 = vsel %vm277_vm0, %v31_v21, 0.0  ;;  %v34_v24 = vld [vmem:[%s5299_s0 + $0x68] sm:$0xff]  ;;  %v33_v25 = vld [vmem:[%s5299_s0 + $0x60] sm:$0xff]  ;;  %v36_v28 = vld [vmem:[%s5299_s0 + $0x78] sm:$0xff] }
   0x6   :  { %v317_v26 = vsel %vm277_vm0, %v34_v24, 0.0  ;;  %v314_v27 = vsel %vm277_vm0, %v33_v25, 0.0  ;;  %v35_v29 = vld [vmem:[%s5299_s0 + $0x70] sm:$0xff]  ;;  %v323_v30 = vsel %vm277_vm0, %v36_v28, 0.0  ;;  %v38_v32 = vld [vmem:[%s5299_s0 + $0x88] sm:$0xff]  ;;  %v37_v33 = vld [vmem:[%s5299_s0 + $0x80] sm:$0xff] }
   0x7   :  { %288 = vadd.xlane.f32.xlu1 %v287_v6  ;;  %282 = vadd.xlane.f32.xlu0 %v281_v7  ;;  %v320_v31 = vsel %vm277_vm0, %v35_v29, 0.0  ;;  %v329_v34 = vsel %vm277_vm0, %v38_v32, 0.0  ;;  %v326_v35 = vsel %vm277_vm0, %v37_v33, 0.0  ;;  %v40_v36 = vld [vmem:[%s5299_s0 + $0x98] sm:$0xff]  ;;  %v39_v37 = vld [vmem:[%s5299_s0 + $0x90] sm:$0xff]  ;;  %v42_v39 = vld [vmem:[%s5299_s0 + $0xa8] sm:$0xff] }
   0x8   :  { %v335_v38 = vsel %vm277_vm0, %v40_v36, 0.0  ;;  %v332_v40 = vsel %vm277_vm0, %v39_v37, 0.0  ;;  %v41_v41 = vld [vmem:[%s5299_s0 + $0xa0] sm:$0xff]  ;;  %v341_v42 = vsel %vm277_vm0, %v42_v39, 0.0  ;;  %v44_v43 = vld [vmem:[%s5299_s0 + $0xb8] sm:$0xff]  ;;  %v43_v45 = vld [vmem:[%s5299_s0 + $0xb0] sm:$0xff] }
   0x9   :  { %v338_v44 = vsel %vm277_vm0, %v41_v41, 0.0  ;;  %v347_v46 = vsel %vm277_vm0, %v44_v43, 0.0  ;;  %v46_v47 = vld [vmem:[%s5299_s0 + $0xc8] sm:$0xff]  ;;  %v344_v48 = vsel %vm277_vm0, %v43_v45, 0.0  ;;  %v45_v49 = vld [vmem:[%s5299_s0 + $0xc0] sm:$0xff] }
   0xa   :  { %v353_v50 = vsel %vm277_vm0, %v46_v47, 0.0  ;;  %v350_v51 = vsel %vm277_vm0, %v45_v49, 0.0 }
   0xb   :  { %294 = vadd.xlane.f32.xlu1 %v293_v10  ;;  %291 = vadd.xlane.f32.xlu0 %v290_v11 }
   0xf   :  { %300 = vadd.xlane.f32.xlu1 %v299_v14  ;;  %297 = vadd.xlane.f32.xlu0 %v296_v15 }
  0x13   :  { %306 = vadd.xlane.f32.xlu1 %v305_v18  ;;  %303 = vadd.xlane.f32.xlu0 %v302_v19 }
  0x17   :  { %312 = vadd.xlane.f32.xlu1 %v311_v22  ;;  %309 = vadd.xlane.f32.xlu0 %v308_v23 }
  0x1b   :  { %318 = vadd.xlane.f32.xlu1 %v317_v26  ;;  %315 = vadd.xlane.f32.xlu0 %v314_v27 }
  0x1f   :  { %324 = vadd.xlane.f32.xlu1 %v323_v30  ;;  %321 = vadd.xlane.f32.xlu0 %v320_v31 }
  0x23   :  { %330 = vadd.xlane.f32.xlu1 %v329_v34  ;;  %327 = vadd.xlane.f32.xlu0 %v326_v35 }
  0x27   :  { %336 = vadd.xlane.f32.xlu1 %v335_v38  ;;  %333 = vadd.xlane.f32.xlu0 %v332_v40 }
  0x2b   :  { %342 = vadd.xlane.f32.xlu1 %v341_v42  ;;  %339 = vadd.xlane.f32.xlu0 %v338_v44 }
  0x2f   :  { %348 = vadd.xlane.f32.xlu1 %v347_v46  ;;  %345 = vadd.xlane.f32.xlu0 %v344_v48 }
  0x30   :  { %8 = vsyncpa [#allocation4], 0  ;;  %v48_v52 = vld [vmem:[%s5299_s0 + $0xd8] sm:$0xff]  ;;  %v47_v53 = vld [vmem:[%s5299_s0 + $0xd0] sm:$0xff]  ;;  %vm1859_vm1 = vcmask 130112   ;;  %vm1866_vm2 = vcmask 195712  }
  0x31   :  { %v359_v54 = vsel %vm277_vm0, %v48_v52, 0.0  ;;  %v356_v55 = vsel %vm277_vm0, %v47_v53, 0.0  ;;  %v50_v56 = vld [vmem:[%s5299_s0 + $0xe8] sm:$0xff]  ;;  %v49_v57 = vld [vmem:[%s5299_s0 + $0xe0] sm:$0xff]  ;;  %v52_v60 = vld [vmem:[%s5299_s0 + $0xf8] sm:$0xff]  ;;  %vm1873_vm3 = vcmask 261312  }
  0x32   :  { %v365_v58 = vsel %vm277_vm0, %v50_v56, 0.0  ;;  %v362_v59 = vsel %vm277_vm0, %v49_v57, 0.0  ;;  %v51_v61 = vld [vmem:[%s5299_s0 + $0xf0] sm:$0xff]  ;;  %v371_v62 = vsel %vm277_vm0, %v52_v60, 0.0  ;;  %v54_v0 = vld [vmem:[%s5299_s0 + $0x108] sm:$0xff]  ;;  %v53_v1 = vld [vmem:[%s5299_s0 + $0x100] sm:$0xff] }
  0x33   :  { %354 = vadd.xlane.f32.xlu1 %v353_v50  ;;  %351 = vadd.xlane.f32.xlu0 %v350_v51  ;;  %v368_v63 = vsel %vm277_vm0, %v51_v61, 0.0  ;;  %v377_v2 = vsel %vm277_vm0, %v54_v0, 0.0  ;;  %v374_v3 = vsel %vm277_vm0, %v53_v1, 0.0  ;;  %v56_v4 = vld [vmem:[%s5299_s0 + $0x118] sm:$0xff]  ;;  %v55_v5 = vld [vmem:[%s5299_s0 + $0x110] sm:$0xff]  ;;  %v58_v8 = vld [vmem:[%s5299_s0 + $0x128] sm:$0xff] }
  0x34   :  { %v383_v6 = vsel %vm277_vm0, %v56_v4, 0.0  ;;  %v380_v7 = vsel %vm277_vm0, %v55_v5, 0.0  ;;  %v57_v9 = vld [vmem:[%s5299_s0 + $0x120] sm:$0xff]  ;;  %v389_v10 = vsel %vm277_vm0, %v58_v8, 0.0  ;;  %v60_v12 = vld [vmem:[%s5299_s0 + $0x138] sm:$0xff]  ;;  %v59_v13 = vld [vmem:[%s5299_s0 + $0x130] sm:$0xff] }
  0x35   :  { %v386_v11 = vsel %vm277_vm0, %v57_v9, 0.0  ;;  %v395_v14 = vsel %vm277_vm0, %v60_v12, 0.0  ;;  %v392_v15 = vsel %vm277_vm0, %v59_v13, 0.0  ;;  %v62_v16 = vld [vmem:[%s5299_s0 + $0x148] sm:$0xff]  ;;  %v61_v17 = vld [vmem:[%s5299_s0 + $0x140] sm:$0xff]  ;;  %v64_v20 = vld [vmem:[%s5299_s0 + $0x158] sm:$0xff] }
  0x36   :  { %v401_v18 = vsel %vm277_vm0, %v62_v16, 0.0  ;;  %v398_v19 = vsel %vm277_vm0, %v61_v17, 0.0  ;;  %v63_v21 = vld [vmem:[%s5299_s0 + $0x150] sm:$0xff]  ;;  %v407_v22 = vsel %vm277_vm0, %v64_v20, 0.0  ;;  %v66_v24 = vld [vmem:[%s5299_s0 + $0x168] sm:$0xff]  ;;  %v65_v25 = vld [vmem:[%s5299_s0 + $0x160] sm:$0xff] }
  0x37   :  { %360 = vadd.xlane.f32.xlu1 %v359_v54  ;;  %357 = vadd.xlane.f32.xlu0 %v356_v55  ;;  %v404_v23 = vsel %vm277_vm0, %v63_v21, 0.0  ;;  %v413_v26 = vsel %vm277_vm0, %v66_v24, 0.0  ;;  %v410_v27 = vsel %vm277_vm0, %v65_v25, 0.0  ;;  %v68_v28 = vld [vmem:[%s5299_s0 + $0x178] sm:$0xff]  ;;  %v67_v29 = vld [vmem:[%s5299_s0 + $0x170] sm:$0xff]  ;;  %v70_v32 = vld [vmem:[%s5299_s0 + $0x188] sm:$0xff] }
  0x38   :  { %v419_v30 = vsel %vm277_vm0, %v68_v28, 0.0  ;;  %v416_v31 = vsel %vm277_vm0, %v67_v29, 0.0  ;;  %v69_v33 = vld [vmem:[%s5299_s0 + $0x180] sm:$0xff]  ;;  %v425_v34 = vsel %vm277_vm0, %v70_v32, 0.0  ;;  %v72_v36 = vld [vmem:[%s5299_s0 + $0x198] sm:$0xff]  ;;  %v71_v37 = vld [vmem:[%s5299_s0 + $0x190] sm:$0xff] }
  0x39   :  { %v422_v35 = vsel %vm277_vm0, %v69_v33, 0.0  ;;  %v431_v38 = vsel %vm277_vm0, %v72_v36, 0.0  ;;  %v428_v39 = vsel %vm277_vm0, %v71_v37, 0.0  ;;  %v74_v40 = vld [vmem:[%s5299_s0 + $0x1a8] sm:$0xff]  ;;  %v73_v41 = vld [vmem:[%s5299_s0 + $0x1a0] sm:$0xff]  ;;  %v76_v44 = vld [vmem:[%s5299_s0 + $0x1b8] sm:$0xff] }
  0x3a   :  { %v437_v42 = vsel %vm277_vm0, %v74_v40, 0.0  ;;  %v434_v43 = vsel %vm277_vm0, %v73_v41, 0.0  ;;  %v75_v45 = vld [vmem:[%s5299_s0 + $0x1b0] sm:$0xff]  ;;  %v443_v46 = vsel %vm277_vm0, %v76_v44, 0.0  ;;  %v78_v48 = vld [vmem:[%s5299_s0 + $0x1c8] sm:$0xff]  ;;  %v77_v49 = vld [vmem:[%s5299_s0 + $0x1c0] sm:$0xff] }
  0x3b   :  { %366 = vadd.xlane.f32.xlu1 %v365_v58  ;;  %363 = vadd.xlane.f32.xlu0 %v362_v59  ;;  %v440_v47 = vsel %vm277_vm0, %v75_v45, 0.0  ;;  %v449_v50 = vsel %vm277_vm0, %v78_v48, 0.0  ;;  %v446_v51 = vsel %vm277_vm0, %v77_v49, 0.0  ;;  %v80_v52 = vld [vmem:[%s5299_s0 + $0x1d8] sm:$0xff]  ;;  %v79_v53 = vld [vmem:[%s5299_s0 + $0x1d0] sm:$0xff]  ;;  %v82_v56 = vld [vmem:[%s5299_s0 + $0x1e8] sm:$0xff] }
  0x3c   :  { %v455_v54 = vsel %vm277_vm0, %v80_v52, 0.0  ;;  %v452_v55 = vsel %vm277_vm0, %v79_v53, 0.0  ;;  %v81_v57 = vld [vmem:[%s5299_s0 + $0x1e0] sm:$0xff]  ;;  %v461_v58 = vsel %vm277_vm0, %v82_v56, 0.0  ;;  %v84_v60 = vld [vmem:[%s5299_s0 + $0x1f8] sm:$0xff]  ;;  %v83_v61 = vld [vmem:[%s5299_s0 + $0x1f0] sm:$0xff] }
  0x3d   :  { %v458_v59 = vsel %vm277_vm0, %v81_v57, 0.0  ;;  %v86_v0 = vld [vmem:[%s5299_s0 + $0x208] sm:$0xff]  ;;  %v85_v1 = vld [vmem:[%s5299_s0 + $0x200] sm:$0xff]  ;;  %v88_v4 = vld [vmem:[%s5299_s0 + $0x218] sm:$0xff]  ;;  %vm1880_vm4 = vcmask 326912   ;;  %vm1887_vm5 = vcmask 392512  }
  0x3e   :  { %v87_v5 = vld [vmem:[%s5299_s0 + $0x210] sm:$0xff]  ;;  %v90_v8 = vld [vmem:[%s5299_s0 + $0x228] sm:$0xff]  ;;  %v89_v9 = vld [vmem:[%s5299_s0 + $0x220] sm:$0xff]  ;;  %vm1894_vm6 = vcmask 458112   ;;  %vm1901_vm7 = vcmask 523712   ;;  %vm1908_vm8 = vcmask 589312  }
  0x3f   :  { %372 = vadd.xlane.f32.xlu1 %v371_v62  ;;  %369 = vadd.xlane.f32.xlu0 %v368_v63  ;;  %v467_v62 = vsel %vm277_vm0, %v84_v60, 0.0  ;;  %v464_v63 = vsel %vm277_vm0, %v83_v61, 0.0  ;;  %v482_v12 = vsel %vm277_vm0, %v89_v9, 0.0  ;;  %v92_v13 = vld [vmem:[%s5299_s0 + $0x238] sm:$0xff]  ;;  %v94_v21 = vld [vmem:[%s5299_s0 + $0x248] sm:$0xff]  ;;  %v97_v57 = vld [vmem:[%s5299_s0 + $0x260] sm:$0xff] }
  0x40   :  { %v96_v33 = vld [vmem:[%s5299_s0 + $0x258] sm:$0xff]  ;;  %vm5304_vm9 = vcmask 654912   ;;  %vm1922_vm10 = vcmask 720512   ;;  %vm5303_vm11 = vcmask 786112   ;;  %vm1936_vm12 = vcmask 851712   ;;  %s3412_s16 = smov [#allocation3]  }
  0x41   :  { %v503_v45 = vsel %vm277_vm0, %v96_v33, 0.0  ;;  %vm1943_vm13 = vcmask 917312   ;;  %vm1950_vm14 = vcmask 982912   ;;  %vm1957_vm15 = vcmask 1048512   ;;  %s3326_s17 = sshll.u32 %s3412_s16, 4  ;;  %s3327_s17 = int_to_ptr.vmem [resolvable:$true] %s3326_s17 }
  0x42   :  { %s3390_s18 = scalar_lea.vmem %s3327_s17, 128  ;;  %p3395_p1 = scmp.lt.s32.totalorder %s3327_s17, %s3327_s17 }
  0x43   :  { %378 = vadd.xlane.f32.xlu1 %v377_v2  ;;  %375 = vadd.xlane.f32.xlu0 %v374_v3  ;;  %v473_v2 = vsel %vm277_vm0, %v86_v0, 0.0  ;;  %v470_v3 = vsel %vm277_vm0, %v85_v1, 0.0  ;;  %p3391_p0 = scmp.ne.s32.totalorder %s3327_s17, %s3390_s18  ;;  %p3396_p2 = scmp.lt.s32.totalorder %s3390_s18, %s3390_s18 }
  0x45   :  { %p3397_p3 = por %p3396_p2, %p3395_p1 }
  0x47   :  { %384 = vadd.xlane.f32.xlu1 %v383_v6  ;;  %381 = vadd.xlane.f32.xlu0 %v380_v7  ;;  %v479_v6 = vsel %vm277_vm0, %v88_v4, 0.0  ;;  %v476_v7 = vsel %vm277_vm0, %v87_v5, 0.0  ;;  %p3398_p4 = pnand %p3397_p3, %p3391_p0 }
  0x4b   :  { %390 = vadd.xlane.f32.xlu1 %v389_v10  ;;  %387 = vadd.xlane.f32.xlu0 %v386_v11  ;;  %v1848_v10 = vlaneseq  ;;  %v485_v11 = vsel %vm277_vm0, %v90_v8, 0.0 }
  0x4d   :  { %v3723_v20 = vshrl.u32 %v1848_v10, 7 }
  0x4f   :  { %396 = vadd.xlane.f32.xlu1 %v395_v14  ;;  %393 = vadd.xlane.f32.xlu0 %v392_v15  ;;  %v91_v14 = vld [vmem:[%s5299_s0 + $0x230] sm:$0xff]  ;;  %v3719_v15 = vand.u32 127, %v1848_v10 }
  0x51   :  { %v1868_v24 = vadd.s32 4294967272, %v3719_v15  ;;  %v1854_v25 = vadd.s32 4294967288, %v3719_v15  ;;  %v3737_v28 = vsub.s32 %v3719_v15, %v3723_v20  ;;  %v1882_v32 = vadd.s32 4294967256, %v3719_v15 }
  0x52   :  { %v1896_v52 = vadd.s32 4294967240, %v3719_v15  ;;  %v1903_v0 = vadd.s32 4294967232, %v3719_v15 }
  0x53   :  { %402 = vadd.xlane.f32.xlu1 %v401_v18  ;;  %399 = vadd.xlane.f32.xlu0 %v398_v19  ;;  %v491_v18 = vsel %vm277_vm0, %v92_v13, 0.0  ;;  %v488_v19 = vsel %vm277_vm0, %v91_v14, 0.0  ;;  %v3752_v40 = vsub.s32 %v1868_v24, %v3723_v20  ;;  %v3755_v41 = vsub.s32 %v1854_v25, %v3723_v20 }
  0x54   :  { %v3765_v48 = vsub.s32 %v1882_v32, %v3723_v20  ;;  %v3782_v4 = vsub.s32 %v1896_v52, %v3723_v20 }
  0x57   :  { %408 = vadd.xlane.f32.xlu1 %v407_v22  ;;  %405 = vadd.xlane.f32.xlu0 %v404_v23  ;;  %v93_v22 = vld [vmem:[%s5299_s0 + $0x240] sm:$0xff]  ;;  %v1861_v23 = vadd.s32 4294967280, %v3719_v15 }
  0x5b   :  { %414 = vadd.xlane.f32.xlu1 %v413_v26  ;;  %411 = vadd.xlane.f32.xlu0 %v410_v27  ;;  %v1875_v26 = vadd.s32 4294967264, %v3719_v15 }
  0x5d   :  { %v3758_v44 = vsub.s32 %v1875_v26, %v3723_v20 }
  0x5f   :  { %420 = vadd.xlane.f32.xlu1 %v419_v30  ;;  %417 = vadd.xlane.f32.xlu0 %v416_v31  ;;  %v497_v30 = vsel %vm277_vm0, %v94_v21, 0.0  ;;  %v494_v31 = vsel %vm277_vm0, %v93_v22, 0.0  ;;  %v3797_v21 = vsub.s32 %v1903_v0, %v3723_v20  ;;  %v1931_v0 = vadd.s32 4294967200, %v3719_v15 }
  0x63   :  { %426 = vadd.xlane.f32.xlu1 %v425_v34  ;;  %423 = vadd.xlane.f32.xlu0 %v422_v35 }
  0x67   :  { %432 = vadd.xlane.f32.xlu1 %v431_v38  ;;  %429 = vadd.xlane.f32.xlu0 %v428_v39  ;;  %v95_v38 = vld [vmem:[%s5299_s0 + $0x250] sm:$0xff]  ;;  %v3749_v39 = vsub.s32 %v1861_v23, %v3723_v20 }
  0x6b   :  { %438 = vadd.xlane.f32.xlu1 %v437_v42  ;;  %435 = vadd.xlane.f32.xlu0 %v434_v43 }
  0x6f   :  { %444 = vadd.xlane.f32.xlu1 %v443_v46  ;;  %441 = vadd.xlane.f32.xlu0 %v440_v47  ;;  %v98_v46 = vld [vmem:[%s5299_s0 + $0x268] sm:$0xff] }
  0x70   :  { %v509_v60 = vsel %vm277_vm0, %v98_v46, 0.0 }
  0x73   :  { %450 = vadd.xlane.f32.xlu1 %v449_v50  ;;  %447 = vadd.xlane.f32.xlu0 %v446_v51  ;;  %v500_v50 = vsel %vm277_vm0, %v95_v38, 0.0  ;;  %v1889_v51 = vadd.s32 4294967248, %v3719_v15  ;;  %v1924_v38 = vadd.s32 4294967208, %v3719_v15 }
  0x77   :  { %456 = vadd.xlane.f32.xlu1 %v455_v54  ;;  %453 = vadd.xlane.f32.xlu0 %v452_v55 }
  0x7b   :  { %462 = vadd.xlane.f32.xlu1 %v461_v58  ;;  %459 = vadd.xlane.f32.xlu0 %v458_v59 }
  0x7f   :  { %468 = vadd.xlane.f32.xlu1 %v467_v62  ;;  %465 = vadd.xlane.f32.xlu0 %v464_v63 }
  0x83   :  { %474 = vadd.xlane.f32.xlu1 %v473_v2  ;;  %471 = vadd.xlane.f32.xlu0 %v470_v3  ;;  %v3779_v3 = vsub.s32 %v1889_v51, %v3723_v20 }
  0x87   :  { %480 = vadd.xlane.f32.xlu1 %v479_v6  ;;  %477 = vadd.xlane.f32.xlu0 %v476_v7  ;;  %v506_v6 = vsel %vm277_vm0, %v97_v57, 0.0  ;;  %v100_v7 = vld [vmem:[%s5299_s0 + $0x278] sm:$0xff] }
  0x88   :  { %v515_v22 = vsel %vm277_vm0, %v100_v7, 0.0  ;;  %v104_v57 = vld [vmem:[%s5299_s0 + $0x298] sm:$0xff] }
  0x89   :  { %v527_v7 = vsel %vm277_vm0, %v104_v57, 0.0 }
  0x8b   :  { %486 = vadd.xlane.f32.xlu1 %v485_v11  ;;  %483 = vadd.xlane.f32.xlu0 %v482_v12  ;;  %v99_v12 = vld [vmem:[%s5299_s0 + $0x270] sm:$0xff] }
  0x8c   :  { %v286_v16 = vpop.xlane.xlu1 %285  ;;  %v280_v17 = vpop.xlane.xlu0 %279 }
  0x8d   :  { %v1049_v34 = vmul.f32 0.015625, %v286_v16  ;;  %v1047_v35 = vmul.f32 0.015625, %v280_v17  ;;  %v1910_v17 = vadd.s32 4294967224, %v3719_v15 }
  0x8f   :  { %492 = vadd.xlane.f32.xlu1 %v491_v18  ;;  %489 = vadd.xlane.f32.xlu0 %v488_v19 }
  0x90   :  { %v289_v27 = vpop.xlane.xlu1 %288  ;;  %v283_v29 = vpop.xlane.xlu0 %282 }
  0x91   :  { %v1050_v36 = vmul.f32 0.015625, %v289_v27  ;;  %v1048_v37 = vmul.f32 0.015625, %v283_v29  ;;  %v512_v27 = vsel %vm277_vm0, %v99_v12, 0.0  ;;  %v1917_v29 = vadd.s32 4294967216, %v3719_v15 }
  0x92   :  { %v1945_v12 = vadd.s32 4294967184, %v3719_v15 }
  0x93   :  { %v1304_v42 = vpack.c.bf16 %v1050_v36, %v1049_v34  ;;  %v1303_v43 = vpack.c.bf16 %v1048_v37, %v1047_v35  ;;  %498 = vadd.xlane.f32.xlu1 %v497_v30  ;;  %495 = vadd.xlane.f32.xlu0 %v494_v31  ;;  %v102_v34 = vld [vmem:[%s5299_s0 + $0x288] sm:$0xff]  ;;  %v101_v35 = vld [vmem:[%s5299_s0 + $0x280] sm:$0xff]  ;;  %v3812_v37 = vsub.s32 %v1910_v17, %v3723_v20 }
  0x94   :  { %v295_v47 = vpop.xlane.xlu1 %294  ;;  %v292_v49 = vpop.xlane.xlu0 %291  ;;  %v521_v51 = vsel %vm277_vm0, %v102_v34, 0.0  ;;  %v518_v52 = vsel %vm277_vm0, %v101_v35, 0.0  ;;  %v108_v35 = vld [vmem:[%s5299_s0 + $0x2b8] sm:$0xff] }
  0x95   :  { %v1594_v53 = vunpack.c.l.b16 %v1304_v42  ;;  %v1595_v54 = vunpack.c.h.b16 %v1304_v42  ;;  %v1592_v55 = vunpack.c.l.b16 %v1303_v43  ;;  %v1593_v56 = vunpack.c.h.b16 %v1303_v43 }
  0x96   :  { %v1052_v58 = vmul.f32 0.015625, %v295_v47  ;;  %v1051_v59 = vmul.f32 0.015625, %v292_v49  ;;  %v3819_v49 = vsub.s32 %v1917_v29, %v3723_v20 }
  0x97   :  { %v1865_v61 = vrot.slane %v1594_v53, %v3749_v39  ;;  %v1853_v62 = vrot.slane %v1592_v55, %v3737_v28  ;;  %v1858_v63 = vrot.slane %v1593_v56, %v3755_v41  ;;  %504 = vadd.xlane.f32.xlu1 %v503_v45  ;;  %501 = vadd.xlane.f32.xlu0 %v500_v50 }
  0x98   :  { %v1305_v1 = vpack.c.bf16 %v1052_v58, %v1051_v59  ;;  %v301_v2 = vpop.xlane.xlu1 %300  ;;  %v298_v5 = vpop.xlane.xlu0 %297  ;;  %v1872_v8 = vrot.slane %v1595_v54, %v3752_v40  ;;  %v103_v58 = vld [vmem:[%s5299_s0 + $0x290] sm:$0xff] }
  0x99   :  { %v1860_v9 = vsel %vm1859_vm1, %v1858_v63, %v1853_v62  ;;  %v1054_v10 = vmul.f32 0.015625, %v301_v2  ;;  %v1053_v11 = vmul.f32 0.015625, %v298_v5 }
  0x9a   :  { %v1867_v13 = vsel %vm1866_vm2, %v1865_v61, %v1860_v9  ;;  %v1596_v14 = vunpack.c.l.b16 %v1305_v1  ;;  %v1597_v16 = vunpack.c.h.b16 %v1305_v1  ;;  %v1938_v1 = vadd.s32 4294967192, %v3719_v15 }
  0x9b   :  { %v1874_v18 = vsel %vm1873_vm3, %v1872_v8, %v1867_v13  ;;  %v1306_v19 = vpack.c.bf16 %v1054_v10, %v1053_v11  ;;  %510 = vadd.xlane.f32.xlu1 %v509_v60  ;;  %507 = vadd.xlane.f32.xlu0 %v506_v6  ;;  %v3832_v60 = vsub.s32 %v1924_v38, %v3723_v20  ;;  %v524_v8 = vsel %vm277_vm0, %v103_v58, 0.0  ;;  %v106_v13 = vld [vmem:[%s5299_s0 + $0x2a8] sm:$0xff] }
  0x9c   :  { %v1879_v23 = vrot.slane %v1596_v14, %v3758_v44  ;;  %v1886_v24 = vrot.slane %v1597_v16, %v3765_v48  ;;  %v307_v25 = vpop.xlane.xlu1 %306  ;;  %v304_v26 = vpop.xlane.xlu0 %303  ;;  %v105_v14 = vld [vmem:[%s5299_s0 + $0x2a0] sm:$0xff]  ;;  %v110_v58 = vld [vmem:[%s5299_s0 + $0x2c8] sm:$0xff] }
  0x9d   :  { %v1598_v30 = vunpack.c.l.b16 %v1306_v19  ;;  %v1599_v31 = vunpack.c.h.b16 %v1306_v19  ;;  %v1056_v32 = vmul.f32 0.015625, %v307_v25  ;;  %v1055_v33 = vmul.f32 0.015625, %v304_v26 }
  0x9e   :  { %v1881_v36 = vsel %vm1880_vm4, %v1879_v23, %v1874_v18  ;;  %v1952_v19 = vadd.s32 4294967176, %v3719_v15  ;;  %v3854_v23 = vsub.s32 %v1938_v1, %v3723_v20  ;;  %v530_v15 = vsel %vm277_vm0, %v105_v14, 0.0 }
  0x9f   :  { %v1888_v42 = vsel %vm1887_vm5, %v1886_v24, %v1881_v36  ;;  %v1893_v43 = vrot.slane %v1598_v30, %v3779_v3  ;;  %v1900_v45 = vrot.slane %v1599_v31, %v3782_v4  ;;  %v1307_v46 = vpack.c.bf16 %v1056_v32, %v1055_v33  ;;  %516 = vadd.xlane.f32.xlu1 %v515_v22  ;;  %v107_v36 = vld [vmem:[%s5299_s0 + $0x2b0] sm:$0xff] }
  0xa0   :  { %513 = vadd.xlane.f32.xlu0 %v512_v27  ;;  %v313_v47 = vpop.xlane.xlu1 %312  ;;  %v310_v50 = vpop.xlane.xlu0 %309  ;;  %v3851_v22 = vsub.s32 %v1931_v0, %v3723_v20  ;;  %v533_v30 = vsel %vm277_vm0, %v106_v13, 0.0 }
  0xa1   :  { %v1895_v53 = vsel %vm1894_vm6, %v1893_v43, %v1888_v42  ;;  %v1600_v54 = vunpack.c.l.b16 %v1307_v46  ;;  %v1601_v55 = vunpack.c.h.b16 %v1307_v46  ;;  %v1058_v56 = vmul.f32 0.015625, %v313_v47 }
  0xa2   :  { %v1902_v59 = vsel %vm1901_vm7, %v1900_v45, %v1895_v53  ;;  %v1057_v61 = vmul.f32 0.015625, %v310_v50  ;;  %v3868_v42 = vsub.s32 %v1945_v12, %v3723_v20  ;;  %v3871_v43 = vsub.s32 %v1952_v19, %v3723_v20  ;;  %v111_v12 = vld [vmem:[%s5299_s0 + $0x2d0] sm:$0xff] }
  0xa3   :  { %v1907_v62 = vrot.slane %v1600_v54, %v3797_v21  ;;  %v1914_v63 = vrot.slane %v1601_v55, %v3812_v37  ;;  %522 = vadd.xlane.f32.xlu1 %v521_v51  ;;  %v539_v53 = vsel %vm277_vm0, %v108_v35, 0.0  ;;  %v536_v54 = vsel %vm277_vm0, %v107_v36, 0.0 }
  0xa4   :  { %v1308_v2 = vpack.c.bf16 %v1058_v56, %v1057_v61  ;;  %519 = vadd.xlane.f32.xlu0 %v518_v52  ;;  %v319_v5 = vpop.xlane.xlu1 %318  ;;  %v316_v6 = vpop.xlane.xlu0 %315 }
  0xa5   :  { %v1909_v9 = vsel %vm1908_vm8, %v1907_v62, %v1902_v59  ;;  %v1060_v10 = vmul.f32 0.015625, %v319_v5  ;;  %v1059_v11 = vmul.f32 0.015625, %v316_v6  ;;  %v109_v62 = vld [vmem:[%s5299_s0 + $0x2c0] sm:$0xff]  ;;  %v545_v6 = vsel %vm277_vm0, %v110_v58, 0.0 }
  0xa6   :  { %v1916_v16 = vsel %vm5304_vm9, %v1914_v63, %v1909_v9  ;;  %v1602_v17 = vunpack.c.l.b16 %v1308_v2  ;;  %v1603_v18 = vunpack.c.h.b16 %v1308_v2 }
  0xa7   :  { %v1309_v24 = vpack.c.bf16 %v1060_v10, %v1059_v11  ;;  %528 = vadd.xlane.f32.xlu1 %v527_v7  ;;  %v542_v10 = vsel %vm277_vm0, %v109_v62, 0.0  ;;  %v112_v11 = vld [vmem:[%s5299_s0 + $0x2d8] sm:$0xff] }
  0xa8   :  { %v1921_v25 = vrot.slane %v1602_v17, %v3819_v49  ;;  %v1928_v26 = vrot.slane %v1603_v18, %v3832_v60  ;;  %525 = vadd.xlane.f32.xlu0 %v524_v8  ;;  %v325_v27 = vpop.xlane.xlu1 %324  ;;  %v322_v29 = vpop.xlane.xlu0 %321 }
  0xa9   :  { %v1604_v31 = vunpack.c.l.b16 %v1309_v24  ;;  %v1605_v32 = vunpack.c.h.b16 %v1309_v24  ;;  %v1062_v33 = vmul.f32 0.015625, %v325_v27  ;;  %v1061_v34 = vmul.f32 0.015625, %v322_v29 }
  0xaa   :  { %v1923_v38 = vsel %vm1922_vm10, %v1921_v25, %v1916_v16  ;;  %v548_v27 = vsel %vm277_vm0, %v111_v12, 0.0 }
  0xab   :  { %v1930_v45 = vsel %vm5303_vm11, %v1928_v26, %v1923_v38  ;;  %v1935_v46 = vrot.slane %v1604_v31, %v3851_v22  ;;  %v1942_v47 = vrot.slane %v1605_v32, %v3854_v23  ;;  %v1310_v50 = vpack.c.bf16 %v1062_v33, %v1061_v34  ;;  %534 = vadd.xlane.f32.xlu1 %v533_v30  ;;  %v114_v32 = vld [vmem:[%s5299_s0 + $0x2e8] sm:$0xff]  ;;  %v113_v33 = vld [vmem:[%s5299_s0 + $0x2e0] sm:$0xff] }
  0xac   :  { %531 = vadd.xlane.f32.xlu0 %v530_v15  ;;  %v331_v51 = vpop.xlane.xlu1 %330  ;;  %v328_v52 = vpop.xlane.xlu0 %327  ;;  %v551_v26 = vsel %vm277_vm0, %v112_v11, 0.0 }
  0xad   :  { %v1937_v55 = vsel %vm1936_vm12, %v1935_v46, %v1930_v45  ;;  %v1606_v56 = vunpack.c.l.b16 %v1310_v50  ;;  %v1607_v20 = vunpack.c.h.b16 %v1310_v50  ;;  %v1064_v57 = vmul.f32 0.015625, %v331_v51 }
  0xae   :  { %v1944_v59 = vsel %vm1943_vm13, %v1942_v47, %v1937_v55  ;;  %v1063_v61 = vmul.f32 0.015625, %v328_v52  ;;  %v557_v47 = vsel %vm277_vm0, %v114_v32, 0.0  ;;  %v554_v50 = vsel %vm277_vm0, %v113_v33, 0.0  ;;  %v116_v55 = vld [vmem:[%s5299_s0 + $0x2f8] sm:$0xff] }
  0xaf   :  { %v1949_v63 = vrot.slane %v1606_v56, %v3868_v42  ;;  %v1956_v0 = vrot.slane %v1607_v20, %v3871_v43  ;;  %540 = vadd.xlane.f32.xlu1 %v539_v53 }
  0xb0   :  { %v1311_v1 = vpack.c.bf16 %v1064_v57, %v1063_v61  ;;  %537 = vadd.xlane.f32.xlu0 %v536_v54  ;;  %v337_v2 = vpop.xlane.xlu1 %336  ;;  %v334_v5 = vpop.xlane.xlu0 %333  ;;  %v115_v57 = vld [vmem:[%s5299_s0 + $0x2f0] sm:$0xff] }
  0xb1   :  { %v1951_v7 = vsel %vm1950_vm14, %v1949_v63, %v1944_v59  ;;  %v1066_v8 = vmul.f32 0.015625, %v337_v2  ;;  %v1065_v9 = vmul.f32 0.015625, %v334_v5 }
  0xb2   :  { %v3898_v13 = vsel %vm1957_vm15, %v1956_v0, %v1951_v7  ;;  %v1608_v14 = vunpack.c.l.b16 %v1311_v1  ;;  %v1609_v16 = vunpack.c.h.b16 %v1311_v1  ;;  %v563_v0 = vsel %vm277_vm0, %v116_v55, 0.0  ;;  %v118_v7 = vld [vmem:[%s5299_s0 + $0x308] sm:$0xff] }
  0xb3   :  { %v1312_v17 = vpack.c.bf16 %v1066_v8, %v1065_v9  ;;  %546 = vadd.xlane.f32.xlu1 %v545_v6  ;;  %v560_v6 = vsel %vm277_vm0, %v115_v57, 0.0  ;;  %v117_v8 = vld [vmem:[%s5299_s0 + $0x300] sm:$0xff] }
  0xb4   :  { %v1962_v18 = vrot.slane %v1608_v14, %v3737_v28  ;;  %v1966_v19 = vrot.slane %v1609_v16, %v3755_v41  ;;  %543 = vadd.xlane.f32.xlu0 %v542_v10  ;;  %v343_v24 = vpop.xlane.xlu1 %342  ;;  %v340_v25 = vpop.xlane.xlu0 %339 }
  0xb5   :  { %v1610_v29 = vunpack.c.l.b16 %v1312_v17  ;;  %v1611_v30 = vunpack.c.h.b16 %v1312_v17  ;;  %v1068_v15 = vmul.f32 0.015625, %v343_v24  ;;  %v1067_v31 = vmul.f32 0.015625, %v340_v25 }
  0xb6   :  { %v1967_v38 = vsel %vm1859_vm1, %v1966_v19, %v1962_v18  ;;  %v569_v19 = vsel %vm277_vm0, %v118_v7, 0.0  ;;  %v566_v24 = vsel %vm277_vm0, %v117_v8, 0.0 }
  0xb7   :  { %v1971_v34 = vrot.slane %v1610_v29, %v3749_v39  ;;  %v1976_v35 = vrot.slane %v1611_v30, %v3752_v40  ;;  %v1313_v36 = vpack.c.bf16 %v1068_v15, %v1067_v31  ;;  %552 = vadd.xlane.f32.xlu1 %v551_v26  ;;  %v120_v30 = vld [vmem:[%s5299_s0 + $0x318] sm:$0xff]  ;;  %v119_v15 = vld [vmem:[%s5299_s0 + $0x310] sm:$0xff] }
  0xb8   :  { %549 = vadd.xlane.f32.xlu0 %v548_v27  ;;  %v349_v45 = vpop.xlane.xlu1 %348  ;;  %v346_v46 = vpop.xlane.xlu0 %345 }
  0xb9   :  { %v1972_v51 = vsel %vm1866_vm2, %v1971_v34, %v1967_v38  ;;  %v1612_v52 = vunpack.c.l.b16 %v1313_v36  ;;  %v1613_v53 = vunpack.c.h.b16 %v1313_v36  ;;  %v1070_v54 = vmul.f32 0.015625, %v349_v45 }
  0xba   :  { %v1977_v56 = vsel %vm1873_vm3, %v1976_v35, %v1972_v51  ;;  %v1069_v20 = vmul.f32 0.015625, %v346_v46  ;;  %v575_v45 = vsel %vm277_vm0, %v120_v30, 0.0  ;;  %v572_v46 = vsel %vm277_vm0, %v119_v15, 0.0 }
  0xbb   :  { %v1981_v58 = vrot.slane %v1612_v52, %v3758_v44  ;;  %v1986_v59 = vrot.slane %v1613_v53, %v3765_v48  ;;  %558 = vadd.xlane.f32.xlu1 %v557_v47  ;;  %v122_v53 = vld [vmem:[%s5299_s0 + $0x328] sm:$0xff] }
  0xbc   :  { %v1314_v61 = vpack.c.bf16 %v1070_v54, %v1069_v20  ;;  %555 = vadd.xlane.f32.xlu0 %v554_v50  ;;  %v355_v62 = vpop.xlane.xlu1 %354  ;;  %v352_v63 = vpop.xlane.xlu0 %351 }
  0xbd   :  { %v1982_v1 = vsel %vm1880_vm4, %v1981_v58, %v1977_v56  ;;  %v1072_v2 = vmul.f32 0.015625, %v355_v62  ;;  %v1071_v5 = vmul.f32 0.015625, %v352_v63  ;;  %v121_v56 = vld [vmem:[%s5299_s0 + $0x320] sm:$0xff]  ;;  %v581_v62 = vsel %vm277_vm0, %v122_v53, 0.0 }
  0xbe   :  { %v1987_v9 = vsel %vm1887_vm5, %v1986_v59, %v1982_v1  ;;  %v1614_v10 = vunpack.c.l.b16 %v1314_v61  ;;  %v1615_v11 = vunpack.c.h.b16 %v1314_v61 }
  0xbf   :  { %v1315_v12 = vpack.c.bf16 %v1072_v2, %v1071_v5  ;;  %564 = vadd.xlane.f32.xlu1 %v563_v0  ;;  %v578_v2 = vsel %vm277_vm0, %v121_v56, 0.0  ;;  %v124_v5 = vld [vmem:[%s5299_s0 + $0x338] sm:$0xff] }
  0xc0   :  { %v1991_v14 = vrot.slane %v1614_v10, %v3779_v3  ;;  %v1996_v16 = vrot.slane %v1615_v11, %v3782_v4  ;;  %561 = vadd.xlane.f32.xlu0 %v560_v6  ;;  %v361_v17 = vpop.xlane.xlu1 %360  ;;  %v358_v18 = vpop.xlane.xlu0 %357  ;;  %v123_v6 = vld [vmem:[%s5299_s0 + $0x330] sm:$0xff] }
  0xc1   :  { %v1616_v25 = vunpack.c.l.b16 %v1315_v12  ;;  %v1617_v26 = vunpack.c.h.b16 %v1315_v12  ;;  %v1074_v27 = vmul.f32 0.015625, %v361_v17  ;;  %v1073_v29 = vmul.f32 0.015625, %v358_v18 }
  0xc2   :  { %v1992_v31 = vsel %vm1894_vm6, %v1991_v14, %v1987_v9  ;;  %v587_v17 = vsel %vm277_vm0, %v124_v5, 0.0  ;;  %v584_v18 = vsel %vm277_vm0, %v123_v6, 0.0 }
  0xc3   :  { %v1997_v32 = vsel %vm1901_vm7, %v1996_v16, %v1992_v31  ;;  %v2001_v33 = vrot.slane %v1616_v25, %v3797_v21  ;;  %v2006_v34 = vrot.slane %v1617_v26, %v3812_v37  ;;  %v1316_v35 = vpack.c.bf16 %v1074_v27, %v1073_v29  ;;  %570 = vadd.xlane.f32.xlu1 %v569_v19  ;;  %v126_v27 = vld [vmem:[%s5299_s0 + $0x348] sm:$0xff]  ;;  %v125_v29 = vld [vmem:[%s5299_s0 + $0x340] sm:$0xff] }
  0xc4   :  { %567 = vadd.xlane.f32.xlu0 %v566_v24  ;;  %v367_v36 = vpop.xlane.xlu1 %366  ;;  %v364_v38 = vpop.xlane.xlu0 %363 }
  0xc5   :  { %v2002_v47 = vsel %vm1908_vm8, %v2001_v33, %v1997_v32  ;;  %v1618_v50 = vunpack.c.l.b16 %v1316_v35  ;;  %v1619_v51 = vunpack.c.h.b16 %v1316_v35  ;;  %v1076_v52 = vmul.f32 0.015625, %v367_v36 }
  0xc6   :  { %v2007_v54 = vsel %vm5304_vm9, %v2006_v34, %v2002_v47  ;;  %v1075_v55 = vmul.f32 0.015625, %v364_v38  ;;  %v593_v36 = vsel %vm277_vm0, %v126_v27, 0.0  ;;  %v590_v38 = vsel %vm277_vm0, %v125_v29, 0.0 }
  0xc7   :  { %v2011_v20 = vrot.slane %v1618_v50, %v3819_v49  ;;  %v2016_v57 = vrot.slane %v1619_v51, %v3832_v60  ;;  %576 = vadd.xlane.f32.xlu1 %v575_v45  ;;  %v134_v51 = vld [vmem:[%s5299_s0 + $0x388] sm:$0xff] }
  0xc8   :  { %v1317_v58 = vpack.c.bf16 %v1076_v52, %v1075_v55  ;;  %573 = vadd.xlane.f32.xlu0 %v572_v46  ;;  %v373_v59 = vpop.xlane.xlu1 %372  ;;  %v370_v61 = vpop.xlane.xlu0 %369 }
  0xc9   :  { %v2012_v63 = vsel %vm1922_vm10, %v2011_v20, %v2007_v54  ;;  %v1078_v0 = vmul.f32 0.015625, %v373_v59  ;;  %v1077_v1 = vmul.f32 0.015625, %v370_v61  ;;  %v133_v54 = vld [vmem:[%s5299_s0 + $0x380] sm:$0xff]  ;;  %v617_v59 = vsel %vm277_vm0, %v134_v51, 0.0  ;;  %v136_v61 = vld [vmem:[%s5299_s0 + $0x398] sm:$0xff] }
  0xca   :  { %v2017_v7 = vsel %vm5303_vm11, %v2016_v57, %v2012_v63  ;;  %v1620_v8 = vunpack.c.l.b16 %v1317_v58  ;;  %v1621_v9 = vunpack.c.h.b16 %v1317_v58  ;;  %v149_v51 = vld [vmem:[%s5299_s0 + $0x400] sm:$0xff] }
  0xcb   :  { %v1318_v10 = vpack.c.bf16 %v1078_v0, %v1077_v1  ;;  %582 = vadd.xlane.f32.xlu1 %v581_v62  ;;  %v614_v0 = vsel %vm277_vm0, %v133_v54, 0.0  ;;  %v135_v1 = vld [vmem:[%s5299_s0 + $0x390] sm:$0xff] }
  0xcc   :  { %v2021_v11 = vrot.slane %v1620_v8, %v3851_v22  ;;  %v2026_v12 = vrot.slane %v1621_v9, %v3854_v23  ;;  %579 = vadd.xlane.f32.xlu0 %v578_v2  ;;  %v379_v14 = vpop.xlane.xlu1 %378  ;;  %v376_v16 = vpop.xlane.xlu0 %375 }
  0xcd   :  { %v1622_v19 = vunpack.c.l.b16 %v1318_v10  ;;  %v1623_v24 = vunpack.c.h.b16 %v1318_v10  ;;  %v1080_v25 = vmul.f32 0.015625, %v379_v14  ;;  %v1079_v26 = vmul.f32 0.015625, %v376_v16 }
  0xce   :  { %v2022_v30 = vsel %vm1936_vm12, %v2021_v11, %v2017_v7  ;;  %v623_v7 = vsel %vm277_vm0, %v136_v61, 0.0  ;;  %v620_v14 = vsel %vm277_vm0, %v135_v1, 0.0 }
  0xcf   :  { %v2027_v15 = vsel %vm1943_vm13, %v2026_v12, %v2022_v30  ;;  %v2031_v31 = vrot.slane %v1622_v19, %v3868_v42  ;;  %v2036_v32 = vrot.slane %v1623_v24, %v3871_v43  ;;  %v1319_v33 = vpack.c.bf16 %v1080_v25, %v1079_v26  ;;  %588 = vadd.xlane.f32.xlu1 %v587_v17  ;;  %v166_v24 = vld [vmem:[%s5299_s0 + $0x488] sm:$0xff]  ;;  %v165_v25 = vld [vmem:[%s5299_s0 + $0x480] sm:$0xff] }
  0xd0   :  { %585 = vadd.xlane.f32.xlu0 %v584_v18  ;;  %v385_v34 = vpop.xlane.xlu1 %384  ;;  %v382_v35 = vpop.xlane.xlu0 %381 }
  0xd1   :  { %v2032_v45 = vsel %vm1950_vm14, %v2031_v31, %v2027_v15  ;;  %v1624_v46 = vunpack.c.l.b16 %v1319_v33  ;;  %v1625_v47 = vunpack.c.h.b16 %v1319_v33  ;;  %v1082_v50 = vmul.f32 0.015625, %v385_v34 }
  0xd2   :  { %v3992_v52 = vsel %vm1957_vm15, %v2036_v32, %v2032_v45  ;;  %v1081_v53 = vmul.f32 0.015625, %v382_v35  ;;  %v713_v33 = vsel %vm277_vm0, %v166_v24, 0.0  ;;  %v710_v34 = vsel %vm277_vm0, %v165_v25, 0.0  ;;  %v197_v24 = vld [vmem:[%s5299_s0 + $0x580] sm:$0xff] }
  0xd3   :  { %594 = vadd.xlane.f32.xlu1 %v593_v36  ;;  %v2041_v55 = vrot.slane %v1624_v46, %v3737_v28  ;;  %v2045_v56 = vrot.slane %v1625_v47, %v3755_v41  ;;  %v150_v46 = vld [vmem:[%s5299_s0 + $0x408] sm:$0xff] }
  0xd4   :  { %v1320_v20 = vpack.c.bf16 %v1082_v50, %v1081_v53  ;;  %591 = vadd.xlane.f32.xlu0 %v590_v38  ;;  %v391_v57 = vpop.xlane.xlu1 %390  ;;  %v388_v58 = vpop.xlane.xlu0 %387 }
  0xd5   :  { %v1084_v62 = vmul.f32 0.015625, %v391_v57  ;;  %v1083_v63 = vmul.f32 0.015625, %v388_v58  ;;  %v2046_v8 = vsel %vm1859_vm1, %v2045_v56, %v2041_v55  ;;  %v665_v57 = vsel %vm277_vm0, %v150_v46, 0.0 }
  0xd6   :  { %v1626_v2 = vunpack.c.l.b16 %v1320_v20  ;;  %v1627_v5 = vunpack.c.h.b16 %v1320_v20 }
  0xd7   :  { %v1321_v6 = vpack.c.bf16 %v1084_v62, %v1083_v63  ;;  %618 = vadd.xlane.f32.xlu1 %v617_v59  ;;  %v662_v62 = vsel %vm277_vm0, %v149_v51, 0.0  ;;  %v168_v63 = vld [vmem:[%s5299_s0 + $0x498] sm:$0xff] }
  0xd8   :  { %v2050_v9 = vrot.slane %v1626_v2, %v3749_v39  ;;  %v2055_v10 = vrot.slane %v1627_v5, %v3752_v40  ;;  %615 = vadd.xlane.f32.xlu0 %v614_v0  ;;  %v397_v11 = vpop.xlane.xlu1 %396  ;;  %v394_v12 = vpop.xlane.xlu0 %393  ;;  %v167_v0 = vld [vmem:[%s5299_s0 + $0x490] sm:$0xff] }
  0xd9   :  { %v1628_v16 = vunpack.c.l.b16 %v1321_v6  ;;  %v1629_v17 = vunpack.c.h.b16 %v1321_v6  ;;  %v1086_v18 = vmul.f32 0.015625, %v397_v11  ;;  %v1085_v19 = vmul.f32 0.015625, %v394_v12 }
  0xda   :  { %v2051_v26 = vsel %vm1866_vm2, %v2050_v9, %v2046_v8  ;;  %v719_v11 = vsel %vm277_vm0, %v168_v63, 0.0  ;;  %v716_v12 = vsel %vm277_vm0, %v167_v0, 0.0  ;;  %v151_v63 = vld [vmem:[%s5299_s0 + $0x410] sm:$0xff] }
  0xdb   :  { %v2056_v27 = vsel %vm1873_vm3, %v2055_v10, %v2051_v26  ;;  %v2060_v29 = vrot.slane %v1628_v16, %v3758_v44  ;;  %v2065_v30 = vrot.slane %v1629_v17, %v3765_v48  ;;  %v1322_v15 = vpack.c.bf16 %v1086_v18, %v1085_v19  ;;  %624 = vadd.xlane.f32.xlu1 %v623_v7  ;;  %v198_v19 = vld [vmem:[%s5299_s0 + $0x588] sm:$0xff] }
  0xdc   :  { %621 = vadd.xlane.f32.xlu0 %v620_v14  ;;  %v403_v31 = vpop.xlane.xlu1 %402  ;;  %v400_v32 = vpop.xlane.xlu0 %399 }
  0xdd   :  { %v2061_v35 = vsel %vm1880_vm4, %v2060_v29, %v2056_v27  ;;  %v1630_v36 = vunpack.c.l.b16 %v1322_v15  ;;  %v1631_v38 = vunpack.c.h.b16 %v1322_v15  ;;  %v1088_v45 = vmul.f32 0.015625, %v403_v31 }
  0xde   :  { %v2066_v47 = vsel %vm1887_vm5, %v2065_v30, %v2061_v35  ;;  %v1087_v50 = vmul.f32 0.015625, %v400_v32  ;;  %v809_v32 = vsel %vm277_vm0, %v198_v19, 0.0 }
  0xdf   :  { %v2070_v53 = vrot.slane %v1630_v36, %v3779_v3  ;;  %v2075_v54 = vrot.slane %v1631_v38, %v3782_v4  ;;  %714 = vadd.xlane.f32.xlu1 %v713_v33  ;;  %v806_v33 = vsel %vm277_vm0, %v197_v24, 0.0  ;;  %v181_v24 = vld [vmem:[%s5299_s0 + $0x500] sm:$0xff] }
  0xe0   :  { %v1323_v55 = vpack.c.bf16 %v1088_v45, %v1087_v50  ;;  %711 = vadd.xlane.f32.xlu0 %v710_v34  ;;  %v409_v56 = vpop.xlane.xlu1 %408  ;;  %v406_v20 = vpop.xlane.xlu0 %405  ;;  %v138_v45 = vld [vmem:[%s5299_s0 + $0x3a8] sm:$0xff]  ;;  %v137_v50 = vld [vmem:[%s5299_s0 + $0x3a0] sm:$0xff] }
  0xe1   :  { %v2071_v58 = vsel %vm1894_vm6, %v2070_v53, %v2066_v47  ;;  %v1090_v59 = vmul.f32 0.015625, %v409_v56  ;;  %v1089_v61 = vmul.f32 0.015625, %v406_v20  ;;  %v629_v20 = vsel %vm277_vm0, %v138_v45, 0.0  ;;  %v199_v45 = vld [vmem:[%s5299_s0 + $0x590] sm:$0xff] }
  0xe2   :  { %v2076_v1 = vsel %vm1901_vm7, %v2075_v54, %v2071_v58  ;;  %v1632_v2 = vunpack.c.l.b16 %v1323_v55  ;;  %v1633_v5 = vunpack.c.h.b16 %v1323_v55 }
  0xe3   :  { %v1324_v6 = vpack.c.bf16 %v1090_v59, %v1089_v61  ;;  %666 = vadd.xlane.f32.xlu1 %v665_v57  ;;  %v626_v61 = vsel %vm277_vm0, %v137_v50, 0.0 }
  0xe4   :  { %v2080_v7 = vrot.slane %v1632_v2, %v3797_v21  ;;  %v2085_v8 = vrot.slane %v1633_v5, %v3812_v37  ;;  %663 = vadd.xlane.f32.xlu0 %v662_v62  ;;  %v415_v9 = vpop.xlane.xlu1 %414  ;;  %v412_v10 = vpop.xlane.xlu0 %411  ;;  %v152_v62 = vld [vmem:[%s5299_s0 + $0x418] sm:$0xff] }
  0xe5   :  { %v1634_v14 = vunpack.c.l.b16 %v1324_v6  ;;  %v1635_v16 = vunpack.c.h.b16 %v1324_v6  ;;  %v1092_v17 = vmul.f32 0.015625, %v415_v9  ;;  %v1091_v18 = vmul.f32 0.015625, %v412_v10 }
  0xe6   :  { %v2081_v25 = vsel %vm1908_vm8, %v2080_v7, %v2076_v1  ;;  %v671_v10 = vsel %vm277_vm0, %v152_v62, 0.0 }
  0xe7   :  { %v2086_v26 = vsel %vm5304_vm9, %v2085_v8, %v2081_v25  ;;  %v2090_v27 = vrot.slane %v1634_v14, %v3819_v49  ;;  %v2095_v29 = vrot.slane %v1635_v16, %v3832_v60  ;;  %v1325_v30 = vpack.c.bf16 %v1092_v17, %v1091_v18  ;;  %720 = vadd.xlane.f32.xlu1 %v719_v11  ;;  %v182_v18 = vld [vmem:[%s5299_s0 + $0x508] sm:$0xff] }
  0xe8   :  { %717 = vadd.xlane.f32.xlu0 %v716_v12  ;;  %v421_v15 = vpop.xlane.xlu1 %420  ;;  %v418_v31 = vpop.xlane.xlu0 %417  ;;  %v668_v11 = vsel %vm277_vm0, %v151_v63, 0.0 }
  0xe9   :  { %v2091_v34 = vsel %vm1922_vm10, %v2090_v27, %v2086_v26  ;;  %v1636_v35 = vunpack.c.l.b16 %v1325_v30  ;;  %v1637_v36 = vunpack.c.h.b16 %v1325_v30  ;;  %v1094_v38 = vmul.f32 0.015625, %v421_v15 }
  0xea   :  { %v2096_v46 = vsel %vm5303_vm11, %v2095_v29, %v2091_v34  ;;  %v1093_v47 = vmul.f32 0.015625, %v418_v31  ;;  %vm3144_vm11 = vcmask 1041409  }
  0xeb   :  { %v2100_v51 = vrot.slane %v1636_v35, %v3851_v22  ;;  %v2105_v53 = vrot.slane %v1637_v36, %v3854_v23  ;;  %810 = vadd.xlane.f32.xlu1 %v809_v32  ;;  %v761_v32 = vsel %vm277_vm0, %v182_v18, 0.0  ;;  %v758_v36 = vsel %vm277_vm0, %v181_v24, 0.0 }
  0xec   :  { %v1326_v54 = vpack.c.bf16 %v1094_v38, %v1093_v47  ;;  %807 = vadd.xlane.f32.xlu0 %v806_v33  ;;  %v427_v55 = vpop.xlane.xlu1 %426  ;;  %v424_v56 = vpop.xlane.xlu0 %423  ;;  %v200_v38 = vld [vmem:[%s5299_s0 + $0x598] sm:$0xff] }
  0xed   :  { %v2101_v57 = vsel %vm1936_vm12, %v2100_v51, %v2096_v46  ;;  %v1096_v58 = vmul.f32 0.015625, %v427_v55  ;;  %v1095_v59 = vmul.f32 0.015625, %v424_v56  ;;  %v815_v55 = vsel %vm277_vm0, %v200_v38, 0.0 }
  0xee   :  { %v2106_v0 = vsel %vm1943_vm13, %v2105_v53, %v2101_v57  ;;  %v1638_v1 = vunpack.c.l.b16 %v1326_v54  ;;  %v1639_v2 = vunpack.c.h.b16 %v1326_v54 }
  0xef   :  { %v1327_v5 = vpack.c.bf16 %v1096_v58, %v1095_v59  ;;  %630 = vadd.xlane.f32.xlu1 %v629_v20  ;;  %v812_v58 = vsel %vm277_vm0, %v199_v45, 0.0  ;;  %v230_v59 = vld [vmem:[%s5299_s0 + $0x688] sm:$0xff]  ;;  %v183_v45 = vld [vmem:[%s5299_s0 + $0x510] sm:$0xff] }
  0xf0   :  { %v2110_v6 = vrot.slane %v1638_v1, %v3868_v42  ;;  %v2115_v7 = vrot.slane %v1639_v2, %v3871_v43  ;;  %627 = vadd.xlane.f32.xlu0 %v626_v61  ;;  %v433_v8 = vpop.xlane.xlu1 %432  ;;  %v430_v9 = vpop.xlane.xlu0 %429  ;;  %v229_v61 = vld [vmem:[%s5299_s0 + $0x680] sm:$0xff] }
  0xf1   :  { %v1640_v12 = vunpack.c.l.b16 %v1327_v5  ;;  %v1641_v14 = vunpack.c.h.b16 %v1327_v5  ;;  %v1098_v16 = vmul.f32 0.015625, %v433_v8  ;;  %v1097_v17 = vmul.f32 0.015625, %v430_v9 }
  0xf2   :  { %v2111_v19 = vsel %vm1950_vm14, %v2110_v6, %v2106_v0  ;;  %v905_v8 = vsel %vm277_vm0, %v230_v59, 0.0  ;;  %v902_v9 = vsel %vm277_vm0, %v229_v61, 0.0  ;;  %v213_v59 = vld [vmem:[%s5299_s0 + $0x600] sm:$0xff] }
  0xf3   :  { %v2116_v25 = vsel %vm1957_vm15, %v2115_v7, %v2111_v19  ;;  %v1328_v26 = vpack.c.bf16 %v1098_v16, %v1097_v17  ;;  %672 = vadd.xlane.f32.xlu1 %v671_v10  ;;  %v2120_v29 = vrot.slane %v1640_v12, %v3737_v28  ;;  %v2124_v30 = vrot.slane %v1641_v14, %v3755_v41  ;;  %v170_v16 = vld [vmem:[%s5299_s0 + $0x4a8] sm:$0xff]  ;;  %v169_v17 = vld [vmem:[%s5299_s0 + $0x4a0] sm:$0xff] }
  0xf4   :  { %v4094_v27 = vsel %vm3144_vm11, %v2116_v25, %v3898_v13  ;;  %669 = vadd.xlane.f32.xlu0 %v668_v11  ;;  %v439_v15 = vpop.xlane.xlu1 %438  ;;  %v436_v31 = vpop.xlane.xlu0 %435 }
  0xf5   :  { %v1642_v33 = vunpack.c.l.b16 %v1328_v26  ;;  %v1643_v34 = vunpack.c.h.b16 %v1328_v26  ;;  %v1100_v35 = vmul.f32 0.015625, %v439_v15  ;;  %v1099_v13 = vmul.f32 0.015625, %v436_v31 }
  0xf6   :  { %v2125_v50 = vsel %vm1859_vm1, %v2124_v30, %v2120_v29  ;;  %v725_v15 = vsel %vm277_vm0, %v170_v16, 0.0  ;;  %v722_v31 = vsel %vm277_vm0, %v169_v17, 0.0  ;;  %v231_v16 = vld [vmem:[%s5299_s0 + $0x690] sm:$0xff] }
  0xf7   :  { %v2129_v46 = vrot.slane %v1642_v33, %v3749_v39  ;;  %v2134_v47 = vrot.slane %v1643_v34, %v3752_v40  ;;  %762 = vadd.xlane.f32.xlu1 %v761_v32  ;;  %v1329_v51 = vpack.c.bf16 %v1100_v35, %v1099_v13 }
  0xf8   :  { %759 = vadd.xlane.f32.xlu0 %v758_v36  ;;  %v445_v53 = vpop.xlane.xlu1 %444  ;;  %v442_v54 = vpop.xlane.xlu0 %441  ;;  %v184_v36 = vld [vmem:[%s5299_s0 + $0x518] sm:$0xff] }
  0xf9   :  { %v2130_v56 = vsel %vm1866_vm2, %v2129_v46, %v2125_v50  ;;  %v1102_v20 = vmul.f32 0.015625, %v445_v53  ;;  %v1101_v57 = vmul.f32 0.015625, %v442_v54  ;;  %v1644_v63 = vunpack.c.l.b16 %v1329_v51 }
  0xfa   :  { %v2135_v62 = vsel %vm1873_vm3, %v2134_v47, %v2130_v56  ;;  %v1645_v0 = vunpack.c.h.b16 %v1329_v51  ;;  %v767_v54 = vsel %vm277_vm0, %v184_v36, 0.0 }
  0xfb   :  { %v1330_v1 = vpack.c.bf16 %v1102_v20, %v1101_v57  ;;  %816 = vadd.xlane.f32.xlu1 %v815_v55  ;;  %v2139_v2 = vrot.slane %v1644_v63, %v3758_v44  ;;  %v764_v57 = vsel %vm277_vm0, %v183_v45, 0.0 }
  0xfc   :  { %v2144_v5 = vrot.slane %v1645_v0, %v3765_v48  ;;  %813 = vadd.xlane.f32.xlu0 %v812_v58  ;;  %v451_v6 = vpop.xlane.xlu1 %450  ;;  %v448_v7 = vpop.xlane.xlu0 %447  ;;  %v214_v58 = vld [vmem:[%s5299_s0 + $0x608] sm:$0xff] }
  0xfd   :  { %v1646_v10 = vunpack.c.l.b16 %v1330_v1  ;;  %v1647_v11 = vunpack.c.h.b16 %v1330_v1  ;;  %v1104_v12 = vmul.f32 0.015625, %v451_v6  ;;  %v1103_v14 = vmul.f32 0.015625, %v448_v7 }
  0xfe   :  { %v2140_v18 = vsel %vm1880_vm4, %v2139_v2, %v2135_v62  ;;  %v857_v7 = vsel %vm277_vm0, %v214_v58, 0.0  ;;  %v139_v58 = vld [vmem:[%s5299_s0 + $0x3b0] sm:$0xff] }
  0xff   :  { %v2145_v19 = vsel %vm1887_vm5, %v2144_v5, %v2140_v18  ;;  %v2149_v24 = vrot.slane %v1646_v10, %v3779_v3  ;;  %v2154_v25 = vrot.slane %v1647_v11, %v3782_v4  ;;  %v1331_v26 = vpack.c.bf16 %v1104_v12, %v1103_v14  ;;  %906 = vadd.xlane.f32.xlu1 %v905_v8  ;;  %v232_v14 = vld [vmem:[%s5299_s0 + $0x698] sm:$0xff] }
 0x100   :  { %903 = vadd.xlane.f32.xlu0 %v902_v9  ;;  %v457_v29 = vpop.xlane.xlu1 %456  ;;  %v454_v30 = vpop.xlane.xlu0 %453  ;;  %v854_v8 = vsel %vm277_vm0, %v213_v59, 0.0 }
 0x101   :  { %v2150_v32 = vsel %vm1894_vm6, %v2149_v24, %v2145_v19  ;;  %v1648_v33 = vunpack.c.l.b16 %v1331_v26  ;;  %v1649_v34 = vunpack.c.h.b16 %v1331_v26  ;;  %v1106_v35 = vmul.f32 0.015625, %v457_v29 }
 0x102   :  { %v2155_v38 = vsel %vm1901_vm7, %v2154_v25, %v2150_v32  ;;  %v1105_v13 = vmul.f32 0.015625, %v454_v30  ;;  %v911_v30 = vsel %vm277_vm0, %v232_v14, 0.0  ;;  %v153_v14 = vld [vmem:[%s5299_s0 + $0x420] sm:$0xff] }
 0x103   :  { %v2159_v46 = vrot.slane %v1648_v33, %v3797_v21  ;;  %v2164_v47 = vrot.slane %v1649_v34, %v3812_v37  ;;  %726 = vadd.xlane.f32.xlu1 %v725_v15  ;;  %v908_v15 = vsel %vm277_vm0, %v231_v16, 0.0 }
 0x104   :  { %v1332_v50 = vpack.c.bf16 %v1106_v35, %v1105_v13  ;;  %723 = vadd.xlane.f32.xlu0 %v722_v31  ;;  %v463_v51 = vpop.xlane.xlu1 %462  ;;  %v460_v53 = vpop.xlane.xlu0 %459  ;;  %v262_v35 = vld [vmem:[%s5299_s0 + $0x788] sm:$0xff]  ;;  %v261_v13 = vld [vmem:[%s5299_s0 + $0x780] sm:$0xff] }
 0x105   :  { %v2160_v55 = vsel %vm1908_vm8, %v2159_v46, %v2155_v38  ;;  %v1108_v56 = vmul.f32 0.015625, %v463_v51  ;;  %v1107_v20 = vmul.f32 0.015625, %v460_v53  ;;  %v1001_v53 = vsel %vm277_vm0, %v262_v35, 0.0 }
 0x106   :  { %v2165_v61 = vsel %vm5304_vm9, %v2164_v47, %v2160_v55  ;;  %v1650_v62 = vunpack.c.l.b16 %v1332_v50  ;;  %v1651_v63 = vunpack.c.h.b16 %v1332_v50  ;;  %vm5305_vm9 = vcmask 786112  }
 0x107   :  { %v1333_v0 = vpack.c.bf16 %v1108_v56, %v1107_v20  ;;  %768 = vadd.xlane.f32.xlu1 %v767_v54  ;;  %v998_v20 = vsel %vm277_vm0, %v261_v13, 0.0 }
 0x108   :  { %v2169_v1 = vrot.slane %v1650_v62, %v3819_v49  ;;  %v2174_v2 = vrot.slane %v1651_v63, %v3832_v60  ;;  %765 = vadd.xlane.f32.xlu0 %v764_v57  ;;  %v469_v5 = vpop.xlane.xlu1 %468  ;;  %v466_v6 = vpop.xlane.xlu0 %465  ;;  %v140_v57 = vld [vmem:[%s5299_s0 + $0x3b8] sm:$0xff] }
 0x109   :  { %v1652_v9 = vunpack.c.l.b16 %v1333_v0  ;;  %v1653_v10 = vunpack.c.h.b16 %v1333_v0  ;;  %v1110_v11 = vmul.f32 0.015625, %v469_v5  ;;  %v1109_v12 = vmul.f32 0.015625, %v466_v6 }
 0x10a   :  { %v2170_v17 = vsel %vm1922_vm10, %v2169_v1, %v2165_v61 }
 0x10b   :  { %v2175_v18 = vsel %vm5305_vm9, %v2174_v2, %v2170_v17  ;;  %v2179_v19 = vrot.slane %v1652_v9, %v3851_v22  ;;  %v2184_v24 = vrot.slane %v1653_v10, %v3854_v23  ;;  %v1334_v25 = vpack.c.bf16 %v1110_v11, %v1109_v12  ;;  %858 = vadd.xlane.f32.xlu1 %v857_v7 }
 0x10c   :  { %855 = vadd.xlane.f32.xlu0 %v854_v8  ;;  %v475_v26 = vpop.xlane.xlu1 %474  ;;  %v472_v29 = vpop.xlane.xlu0 %471  ;;  %v635_v7 = vsel %vm277_vm0, %v140_v57, 0.0  ;;  %v632_v8 = vsel %vm277_vm0, %v139_v58, 0.0  ;;  %vm5306_vm9 = vcmask 654912  }
 0x10d   :  { %v2180_v31 = vsel %vm1936_vm12, %v2179_v19, %v2175_v18  ;;  %v1654_v32 = vunpack.c.l.b16 %v1334_v25  ;;  %v1655_v33 = vunpack.c.h.b16 %v1334_v25  ;;  %v1112_v34 = vmul.f32 0.015625, %v475_v26 }
 0x10e   :  { %v2185_v36 = vsel %vm1943_vm13, %v2184_v24, %v2180_v31  ;;  %v1111_v38 = vmul.f32 0.015625, %v472_v29  ;;  %v674_v29 = vsel %vm277_vm0, %v153_v14, 0.0 }
 0x10f   :  { %v2189_v45 = vrot.slane %v1654_v32, %v3868_v42  ;;  %v2194_v46 = vrot.slane %v1655_v33, %v3871_v43  ;;  %912 = vadd.xlane.f32.xlu1 %v911_v30  ;;  %v202_v33 = vld [vmem:[%s5299_s0 + $0x5a8] sm:$0xff] }
 0x110   :  { %v1335_v47 = vpack.c.bf16 %v1112_v34, %v1111_v38  ;;  %909 = vadd.xlane.f32.xlu0 %v908_v15  ;;  %v481_v50 = vpop.xlane.xlu1 %480  ;;  %v478_v51 = vpop.xlane.xlu0 %477 }
 0x111   :  { %v2190_v54 = vsel %vm1950_vm14, %v2189_v45, %v2185_v36  ;;  %v1114_v55 = vmul.f32 0.015625, %v481_v50  ;;  %v1113_v56 = vmul.f32 0.015625, %v478_v51  ;;  %v201_v36 = vld [vmem:[%s5299_s0 + $0x5a0] sm:$0xff]  ;;  %v821_v50 = vsel %vm277_vm0, %v202_v33, 0.0 }
 0x112   :  { %v2195_v59 = vsel %vm1957_vm15, %v2194_v46, %v2190_v54  ;;  %v1656_v61 = vunpack.c.l.b16 %v1335_v47  ;;  %v1657_v62 = vunpack.c.h.b16 %v1335_v47 }
 0x113   :  { %v1336_v63 = vpack.c.bf16 %v1114_v55, %v1113_v56  ;;  %1002 = vadd.xlane.f32.xlu1 %v1001_v53  ;;  %v4193_v0 = vsel %vm3144_vm11, %v2195_v59, %v3992_v52  ;;  %v154_v52 = vld [vmem:[%s5299_s0 + $0x428] sm:$0xff]  ;;  %v818_v55 = vsel %vm277_vm0, %v201_v36, 0.0  ;;  %v216_v56 = vld [vmem:[%s5299_s0 + $0x618] sm:$0xff]  ;;  %v215_v59 = vld [vmem:[%s5299_s0 + $0x610] sm:$0xff]  ;;  %vm5307_vm11 = vcmask 786112  }
 0x114   :  { %v2199_v1 = vrot.slane %v1656_v61, %v3737_v28  ;;  %v2203_v2 = vrot.slane %v1657_v62, %v3755_v41  ;;  %999 = vadd.xlane.f32.xlu0 %v998_v20  ;;  %v487_v5 = vpop.xlane.xlu1 %486  ;;  %v484_v6 = vpop.xlane.xlu0 %483  ;;  %v677_v26 = vsel %vm277_vm0, %v154_v52, 0.0  ;;  %v245_v52 = vld [vmem:[%s5299_s0 + $0x700] sm:$0xff] }
 0x115   :  { %v1658_v9 = vunpack.c.l.b16 %v1336_v63  ;;  %v1659_v10 = vunpack.c.h.b16 %v1336_v63  ;;  %v1116_v11 = vmul.f32 0.015625, %v487_v5  ;;  %v1115_v12 = vmul.f32 0.015625, %v484_v6 }
 0x116   :  { %v2204_v19 = vsel %vm1859_vm1, %v2203_v2, %v2199_v1  ;;  %v863_v2 = vsel %vm277_vm0, %v216_v56, 0.0 }
 0x117   :  { %v2208_v16 = vrot.slane %v1658_v9, %v3749_v39  ;;  %v2213_v17 = vrot.slane %v1659_v10, %v3752_v40  ;;  %v1337_v18 = vpack.c.bf16 %v1116_v11, %v1115_v12  ;;  %636 = vadd.xlane.f32.xlu1 %v635_v7  ;;  %v860_v9 = vsel %vm277_vm0, %v215_v59, 0.0  ;;  %v246_v10 = vld [vmem:[%s5299_s0 + $0x708] sm:$0xff] }
 0x118   :  { %633 = vadd.xlane.f32.xlu0 %v632_v8  ;;  %v493_v24 = vpop.xlane.xlu1 %492  ;;  %v490_v25 = vpop.xlane.xlu0 %489 }
 0x119   :  { %v2209_v30 = vsel %vm1866_vm2, %v2208_v16, %v2204_v19  ;;  %v1660_v15 = vunpack.c.l.b16 %v1337_v18  ;;  %v1661_v31 = vunpack.c.h.b16 %v1337_v18  ;;  %v1118_v32 = vmul.f32 0.015625, %v493_v24 }
 0x11a   :  { %v2214_v34 = vsel %vm1873_vm3, %v2213_v17, %v2209_v30  ;;  %v1117_v35 = vmul.f32 0.015625, %v490_v25  ;;  %v953_v24 = vsel %vm277_vm0, %v246_v10, 0.0  ;;  %v950_v30 = vsel %vm277_vm0, %v245_v52, 0.0 }
 0x11b   :  { %v2218_v38 = vrot.slane %v1660_v15, %v3758_v44  ;;  %v2223_v13 = vrot.slane %v1661_v31, %v3765_v48  ;;  %678 = vadd.xlane.f32.xlu1 %v677_v26  ;;  %v264_v15 = vld [vmem:[%s5299_s0 + $0x798] sm:$0xff] }
 0x11c   :  { %v1338_v45 = vpack.c.bf16 %v1118_v32, %v1117_v35  ;;  %675 = vadd.xlane.f32.xlu0 %v674_v29  ;;  %v499_v46 = vpop.xlane.xlu1 %498  ;;  %v496_v47 = vpop.xlane.xlu0 %495  ;;  %v263_v35 = vld [vmem:[%s5299_s0 + $0x790] sm:$0xff] }
 0x11d   :  { %v2219_v51 = vsel %vm1880_vm4, %v2218_v38, %v2214_v34  ;;  %v1120_v53 = vmul.f32 0.015625, %v499_v46  ;;  %v1119_v54 = vmul.f32 0.015625, %v496_v47  ;;  %v1007_v46 = vsel %vm277_vm0, %v264_v15, 0.0 }
 0x11e   :  { %v2224_v20 = vsel %vm1887_vm5, %v2223_v13, %v2219_v51  ;;  %v1662_v57 = vunpack.c.l.b16 %v1338_v45  ;;  %v1663_v58 = vunpack.c.h.b16 %v1338_v45  ;;  %v1004_v51 = vsel %vm277_vm0, %v263_v35, 0.0 }
 0x11f   :  { %v1339_v61 = vpack.c.bf16 %v1120_v53, %v1119_v54  ;;  %822 = vadd.xlane.f32.xlu1 %v821_v50  ;;  %v172_v53 = vld [vmem:[%s5299_s0 + $0x4b8] sm:$0xff] }
 0x120   :  { %v2228_v62 = vrot.slane %v1662_v57, %v3779_v3  ;;  %v2233_v63 = vrot.slane %v1663_v58, %v3782_v4  ;;  %819 = vadd.xlane.f32.xlu0 %v818_v55  ;;  %v505_v1 = vpop.xlane.xlu1 %504  ;;  %v502_v8 = vpop.xlane.xlu0 %501  ;;  %v171_v57 = vld [vmem:[%s5299_s0 + $0x4b0] sm:$0xff] }
 0x121   :  { %v1664_v5 = vunpack.c.l.b16 %v1339_v61  ;;  %v1665_v6 = vunpack.c.h.b16 %v1339_v61  ;;  %v1122_v7 = vmul.f32 0.015625, %v505_v1  ;;  %v1121_v12 = vmul.f32 0.015625, %v502_v8 }
 0x122   :  { %v2229_v11 = vsel %vm1894_vm6, %v2228_v62, %v2224_v20  ;;  %v731_v1 = vsel %vm277_vm0, %v172_v53, 0.0  ;;  %v248_v53 = vld [vmem:[%s5299_s0 + $0x718] sm:$0xff] }
 0x123   :  { %v2234_v14 = vsel %vm1901_vm7, %v2233_v63, %v2229_v11  ;;  %v2238_v16 = vrot.slane %v1664_v5, %v3797_v21  ;;  %v2243_v17 = vrot.slane %v1665_v6, %v3812_v37  ;;  %864 = vadd.xlane.f32.xlu1 %v863_v2  ;;  %v1340_v18 = vpack.c.bf16 %v1122_v7, %v1121_v12  ;;  %v186_v7 = vld [vmem:[%s5299_s0 + $0x528] sm:$0xff]  ;;  %v185_v12 = vld [vmem:[%s5299_s0 + $0x520] sm:$0xff] }
 0x124   :  { %861 = vadd.xlane.f32.xlu0 %v860_v9  ;;  %v511_v19 = vpop.xlane.xlu1 %510  ;;  %v508_v29 = vpop.xlane.xlu0 %507  ;;  %v728_v6 = vsel %vm277_vm0, %v171_v57, 0.0 }
 0x125   :  { %v2239_v25 = vsel %vm1908_vm8, %v2238_v16, %v2234_v14  ;;  %v1124_v26 = vmul.f32 0.015625, %v511_v19  ;;  %v1666_v32 = vunpack.c.l.b16 %v1340_v18  ;;  %v1667_v33 = vunpack.c.h.b16 %v1340_v18 }
 0x126   :  { %v2244_v31 = vsel %vm5306_vm9, %v2243_v17, %v2239_v25  ;;  %v1123_v34 = vmul.f32 0.015625, %v508_v29  ;;  %v773_v19 = vsel %vm277_vm0, %v186_v7, 0.0  ;;  %v234_v29 = vld [vmem:[%s5299_s0 + $0x6a8] sm:$0xff]  ;;  %vm3146_vm9 = vcmask 1042434  }
 0x127   :  { %954 = vadd.xlane.f32.xlu1 %v953_v24  ;;  %v2248_v36 = vrot.slane %v1666_v32, %v3819_v49  ;;  %v2253_v38 = vrot.slane %v1667_v33, %v3832_v60  ;;  %v233_v33 = vld [vmem:[%s5299_s0 + $0x6a0] sm:$0xff] }
 0x128   :  { %v1341_v13 = vpack.c.bf16 %v1124_v26, %v1123_v34  ;;  %951 = vadd.xlane.f32.xlu0 %v950_v30  ;;  %v517_v45 = vpop.xlane.xlu1 %516  ;;  %v770_v26 = vsel %vm277_vm0, %v185_v12, 0.0 }
 0x129   :  { %v1126_v47 = vmul.f32 0.015625, %v517_v45  ;;  %v514_v50 = vpop.xlane.xlu0 %513  ;;  %v2249_v54 = vsel %vm1922_vm10, %v2248_v36, %v2244_v31 }
 0x12a   :  { %v1668_v55 = vunpack.c.l.b16 %v1341_v13  ;;  %v1669_v56 = vunpack.c.h.b16 %v1341_v13  ;;  %v1125_v20 = vmul.f32 0.015625, %v514_v50  ;;  %v2254_v58 = vsel %vm5307_vm11, %v2253_v38, %v2249_v54 }
 0x12b   :  { %1008 = vadd.xlane.f32.xlu1 %v1007_v46  ;;  %v917_v38 = vsel %vm277_vm0, %v234_v29, 0.0  ;;  %vm5308_vm11 = vcmask 654912  }
 0x12c   :  { %v2258_v59 = vrot.slane %v1668_v55, %v3851_v22  ;;  %v2263_v61 = vrot.slane %v1669_v56, %v3854_v23  ;;  %v1342_v62 = vpack.c.bf16 %v1126_v47, %v1125_v20  ;;  %1005 = vadd.xlane.f32.xlu0 %v1004_v51  ;;  %v523_v63 = vpop.xlane.xlu1 %522  ;;  %v914_v51 = vsel %vm277_vm0, %v233_v33, 0.0 }
 0x12d   :  { %v1128_v2 = vmul.f32 0.015625, %v523_v63  ;;  %v520_v5 = vpop.xlane.xlu0 %519 }
 0x12e   :  { %v2259_v8 = vsel %vm1936_vm12, %v2258_v59, %v2254_v58  ;;  %v1670_v9 = vunpack.c.l.b16 %v1342_v62  ;;  %v1671_v10 = vunpack.c.h.b16 %v1342_v62  ;;  %v1127_v11 = vmul.f32 0.015625, %v520_v5  ;;  %v142_v5 = vld [vmem:[%s5299_s0 + $0x3c8] sm:$0xff] }
 0x12f   :  { %v2264_v52 = vsel %vm1943_vm13, %v2263_v61, %v2259_v8  ;;  %732 = vadd.xlane.f32.xlu1 %v731_v1  ;;  %v959_v61 = vsel %vm277_vm0, %v248_v53, 0.0 }
 0x130   :  { %v2268_v14 = vrot.slane %v1670_v9, %v3868_v42  ;;  %v2273_v16 = vrot.slane %v1671_v10, %v3871_v43  ;;  %v1343_v17 = vpack.c.bf16 %v1128_v2, %v1127_v11  ;;  %729 = vadd.xlane.f32.xlu0 %v728_v6  ;;  %v529_v18 = vpop.xlane.xlu1 %528  ;;  %v141_v10 = vld [vmem:[%s5299_s0 + $0x3c0] sm:$0xff] }
 0x131   :  { %v1130_v24 = vmul.f32 0.015625, %v529_v18  ;;  %v526_v25 = vpop.xlane.xlu0 %525 }
 0x132   :  { %v2269_v30 = vsel %vm1950_vm14, %v2268_v14, %v2264_v52  ;;  %v1672_v15 = vunpack.c.l.b16 %v1343_v17  ;;  %v1673_v31 = vunpack.c.h.b16 %v1343_v17  ;;  %v1129_v32 = vmul.f32 0.015625, %v526_v25  ;;  %v156_v25 = vld [vmem:[%s5299_s0 + $0x438] sm:$0xff] }
 0x133   :  { %v2274_v34 = vsel %vm1957_vm15, %v2273_v16, %v2269_v30  ;;  %774 = vadd.xlane.f32.xlu1 %v773_v19  ;;  %v641_v17 = vsel %vm277_vm0, %v142_v5, 0.0 }
 0x134   :  { %v1344_v35 = vpack.c.bf16 %v1130_v24, %v1129_v32  ;;  %771 = vadd.xlane.f32.xlu0 %v770_v26  ;;  %v535_v36 = vpop.xlane.xlu1 %534  ;;  %v4293_v13 = vsel %vm3146_vm9, %v2274_v34, %v4094_v27  ;;  %v2278_v45 = vrot.slane %v1672_v15, %v3737_v28  ;;  %v2282_v46 = vrot.slane %v1673_v31, %v3755_v41  ;;  %v247_v27 = vld [vmem:[%s5299_s0 + $0x710] sm:$0xff] }
 0x135   :  { %v1132_v47 = vmul.f32 0.015625, %v535_v36  ;;  %v532_v50 = vpop.xlane.xlu0 %531  ;;  %v956_v2 = vsel %vm277_vm0, %v247_v27, 0.0  ;;  %v638_v24 = vsel %vm277_vm0, %v141_v10, 0.0  ;;  %v155_v31 = vld [vmem:[%s5299_s0 + $0x430] sm:$0xff] }
 0x136   :  { %v1674_v54 = vunpack.c.l.b16 %v1344_v35  ;;  %v1675_v55 = vunpack.c.h.b16 %v1344_v35  ;;  %v1131_v56 = vmul.f32 0.015625, %v532_v50  ;;  %v2283_v62 = vsel %vm1859_vm1, %v2282_v46, %v2278_v45  ;;  %v204_v50 = vld [vmem:[%s5299_s0 + $0x5b8] sm:$0xff] }
 0x137   :  { %918 = vadd.xlane.f32.xlu1 %v917_v38  ;;  %v683_v38 = vsel %vm277_vm0, %v156_v25, 0.0 }
 0x138   :  { %v2287_v20 = vrot.slane %v1674_v54, %v3749_v39  ;;  %v2292_v57 = vrot.slane %v1675_v55, %v3752_v40  ;;  %v1345_v58 = vpack.c.bf16 %v1132_v47, %v1131_v56  ;;  %915 = vadd.xlane.f32.xlu0 %v914_v51  ;;  %v541_v59 = vpop.xlane.xlu1 %540  ;;  %v680_v47 = vsel %vm277_vm0, %v155_v31, 0.0  ;;  %v203_v56 = vld [vmem:[%s5299_s0 + $0x5b0] sm:$0xff] }
 0x139   :  { %v1134_v63 = vmul.f32 0.015625, %v541_v59  ;;  %v538_v1 = vpop.xlane.xlu0 %537 }
 0x13a   :  { %v2288_v6 = vsel %vm1866_vm2, %v2287_v20, %v2283_v62  ;;  %v1676_v7 = vunpack.c.l.b16 %v1345_v58  ;;  %v1677_v8 = vunpack.c.h.b16 %v1345_v58  ;;  %v1133_v9 = vmul.f32 0.015625, %v538_v1 }
 0x13b   :  { %v2293_v11 = vsel %vm1873_vm3, %v2292_v57, %v2288_v6  ;;  %960 = vadd.xlane.f32.xlu1 %v959_v61  ;;  %v827_v61 = vsel %vm277_vm0, %v204_v50, 0.0  ;;  %v824_v1 = vsel %vm277_vm0, %v203_v56, 0.0 }
 0x13c   :  { %v2297_v12 = vrot.slane %v1676_v7, %v3758_v44  ;;  %v2302_v52 = vrot.slane %v1677_v8, %v3765_v48  ;;  %v1346_v14 = vpack.c.bf16 %v1134_v63, %v1133_v9  ;;  %957 = vadd.xlane.f32.xlu0 %v956_v2  ;;  %v547_v16 = vpop.xlane.xlu1 %546  ;;  %v218_v2 = vld [vmem:[%s5299_s0 + $0x628] sm:$0xff]  ;;  %v217_v9 = vld [vmem:[%s5299_s0 + $0x620] sm:$0xff] }
 0x13d   :  { %v1136_v18 = vmul.f32 0.015625, %v547_v16  ;;  %v544_v19 = vpop.xlane.xlu0 %543  ;;  %v869_v16 = vsel %vm277_vm0, %v218_v2, 0.0 }
 0x13e   :  { %v2298_v26 = vsel %vm1880_vm4, %v2297_v12, %v2293_v11  ;;  %v1678_v29 = vunpack.c.l.b16 %v1346_v14  ;;  %v1679_v30 = vunpack.c.h.b16 %v1346_v14  ;;  %v1135_v15 = vmul.f32 0.015625, %v544_v19 }
 0x13f   :  { %v2303_v32 = vsel %vm1887_vm5, %v2302_v52, %v2298_v26  ;;  %642 = vadd.xlane.f32.xlu1 %v641_v17  ;;  %v866_v19 = vsel %vm277_vm0, %v217_v9, 0.0 }
 0x140   :  { %v2307_v33 = vrot.slane %v1678_v29, %v3779_v3  ;;  %v2312_v34 = vrot.slane %v1679_v30, %v3782_v4  ;;  %v1347_v35 = vpack.c.bf16 %v1136_v18, %v1135_v15  ;;  %639 = vadd.xlane.f32.xlu0 %v638_v24  ;;  %v553_v36 = vpop.xlane.xlu1 %552  ;;  %v266_v24 = vld [vmem:[%s5299_s0 + $0x7a8] sm:$0xff]  ;;  %v265_v15 = vld [vmem:[%s5299_s0 + $0x7a0] sm:$0xff] }
 0x141   :  { %v1138_v45 = vmul.f32 0.015625, %v553_v36  ;;  %v550_v46 = vpop.xlane.xlu0 %549  ;;  %v1013_v36 = vsel %vm277_vm0, %v266_v24, 0.0  ;;  %v236_v24 = vld [vmem:[%s5299_s0 + $0x6b8] sm:$0xff] }
 0x142   :  { %v2308_v51 = vsel %vm1894_vm6, %v2307_v33, %v2303_v32  ;;  %v1680_v53 = vunpack.c.l.b16 %v1347_v35  ;;  %v1681_v54 = vunpack.c.h.b16 %v1347_v35  ;;  %v1137_v55 = vmul.f32 0.015625, %v550_v46 }
 0x143   :  { %v2313_v27 = vsel %vm1901_vm7, %v2312_v34, %v2308_v51  ;;  %684 = vadd.xlane.f32.xlu1 %v683_v38  ;;  %v1010_v46 = vsel %vm277_vm0, %v265_v15, 0.0 }
 0x144   :  { %v2317_v20 = vrot.slane %v1680_v53, %v3797_v21  ;;  %v2322_v57 = vrot.slane %v1681_v54, %v3812_v37  ;;  %v1348_v58 = vpack.c.bf16 %v1138_v45, %v1137_v55  ;;  %681 = vadd.xlane.f32.xlu0 %v680_v47  ;;  %v559_v59 = vpop.xlane.xlu1 %558  ;;  %v174_v47 = vld [vmem:[%s5299_s0 + $0x4c8] sm:$0xff]  ;;  %v173_v55 = vld [vmem:[%s5299_s0 + $0x4c0] sm:$0xff] }
 0x145   :  { %v1140_v62 = vmul.f32 0.015625, %v559_v59  ;;  %v556_v63 = vpop.xlane.xlu0 %555  ;;  %v737_v59 = vsel %vm277_vm0, %v174_v47, 0.0 }
 0x146   :  { %v2318_v5 = vsel %vm1908_vm8, %v2317_v20, %v2313_v27  ;;  %v1682_v6 = vunpack.c.l.b16 %v1348_v58  ;;  %v1683_v7 = vunpack.c.h.b16 %v1348_v58  ;;  %v1139_v8 = vmul.f32 0.015625, %v556_v63 }
 0x147   :  { %v2323_v10 = vsel %vm5308_vm11, %v2322_v57, %v2318_v5  ;;  %828 = vadd.xlane.f32.xlu1 %v827_v61  ;;  %vm5309_vm11 = vcmask 786112   ;;  %v734_v63 = vsel %vm277_vm0, %v173_v55, 0.0 }
 0x148   :  { %v2327_v11 = vrot.slane %v1682_v6, %v3819_v49  ;;  %v2332_v12 = vrot.slane %v1683_v7, %v3832_v60  ;;  %v1349_v52 = vpack.c.bf16 %v1140_v62, %v1139_v8  ;;  %825 = vadd.xlane.f32.xlu0 %v824_v1  ;;  %v565_v14 = vpop.xlane.xlu1 %564  ;;  %v188_v1 = vld [vmem:[%s5299_s0 + $0x538] sm:$0xff]  ;;  %v187_v8 = vld [vmem:[%s5299_s0 + $0x530] sm:$0xff] }
 0x149   :  { %v1142_v17 = vmul.f32 0.015625, %v565_v14  ;;  %v562_v18 = vpop.xlane.xlu0 %561 }
 0x14a   :  { %v2328_v25 = vsel %vm1922_vm10, %v2327_v11, %v2323_v10  ;;  %v1684_v26 = vunpack.c.l.b16 %v1349_v52  ;;  %v1685_v29 = vunpack.c.h.b16 %v1349_v52  ;;  %v1141_v30 = vmul.f32 0.015625, %v562_v18 }
 0x14b   :  { %v2333_v31 = vsel %vm5309_vm11, %v2332_v12, %v2328_v25  ;;  %870 = vadd.xlane.f32.xlu1 %v869_v16  ;;  %v779_v12 = vsel %vm277_vm0, %v188_v1, 0.0 }
 0x14c   :  { %v2337_v32 = vrot.slane %v1684_v26, %v3851_v22  ;;  %v2342_v33 = vrot.slane %v1685_v29, %v3854_v23  ;;  %v1350_v34 = vpack.c.bf16 %v1142_v17, %v1141_v30  ;;  %867 = vadd.xlane.f32.xlu0 %v866_v19  ;;  %v571_v35 = vpop.xlane.xlu1 %570  ;;  %v776_v19 = vsel %vm277_vm0, %v187_v8, 0.0 }
 0x14d   :  { %v1144_v38 = vmul.f32 0.015625, %v571_v35  ;;  %v568_v45 = vpop.xlane.xlu0 %567 }
 0x14e   :  { %v2338_v50 = vsel %vm1936_vm12, %v2337_v32, %v2333_v31  ;;  %v1686_v51 = vunpack.c.l.b16 %v1350_v34  ;;  %v1687_v53 = vunpack.c.h.b16 %v1350_v34  ;;  %v1143_v54 = vmul.f32 0.015625, %v568_v45  ;;  %v250_v45 = vld [vmem:[%s5299_s0 + $0x728] sm:$0xff] }
 0x14f   :  { %v2343_v56 = vsel %vm1943_vm13, %v2342_v33, %v2338_v50  ;;  %1014 = vadd.xlane.f32.xlu1 %v1013_v36  ;;  %v923_v33 = vsel %vm277_vm0, %v236_v24, 0.0 }
 0x150   :  { %v2347_v27 = vrot.slane %v1686_v51, %v3868_v42  ;;  %v2352_v20 = vrot.slane %v1687_v53, %v3871_v43  ;;  %v1351_v57 = vpack.c.bf16 %v1144_v38, %v1143_v54  ;;  %1011 = vadd.xlane.f32.xlu0 %v1010_v46  ;;  %v577_v58 = vpop.xlane.xlu1 %576  ;;  %v249_v53 = vld [vmem:[%s5299_s0 + $0x720] sm:$0xff] }
 0x151   :  { %v1146_v61 = vmul.f32 0.015625, %v577_v58  ;;  %v574_v62 = vpop.xlane.xlu0 %573 }
 0x152   :  { %v2348_v2 = vsel %vm1950_vm14, %v2347_v27, %v2343_v56  ;;  %v1688_v5 = vunpack.c.l.b16 %v1351_v57  ;;  %v1689_v6 = vunpack.c.h.b16 %v1351_v57  ;;  %v1145_v7 = vmul.f32 0.015625, %v574_v62  ;;  %v144_v62 = vld [vmem:[%s5299_s0 + $0x3d8] sm:$0xff] }
 0x153   :  { %v2353_v9 = vsel %vm1957_vm15, %v2352_v20, %v2348_v2  ;;  %738 = vadd.xlane.f32.xlu1 %v737_v59  ;;  %v965_v57 = vsel %vm277_vm0, %v250_v45, 0.0 }
 0x154   :  { %v1352_v10 = vpack.c.bf16 %v1146_v61, %v1145_v7  ;;  %735 = vadd.xlane.f32.xlu0 %v734_v63  ;;  %v583_v11 = vpop.xlane.xlu1 %582  ;;  %v4392_v52 = vsel %vm3146_vm9, %v2353_v9, %v4193_v0  ;;  %v2357_v14 = vrot.slane %v1688_v5, %v3737_v28  ;;  %v2361_v16 = vrot.slane %v1689_v6, %v3755_v41  ;;  %v235_v0 = vld [vmem:[%s5299_s0 + $0x6b0] sm:$0xff] }
 0x155   :  { %v1148_v17 = vmul.f32 0.015625, %v583_v11  ;;  %v580_v18 = vpop.xlane.xlu0 %579  ;;  %v920_v38 = vsel %vm277_vm0, %v235_v0, 0.0  ;;  %v962_v61 = vsel %vm277_vm0, %v249_v53, 0.0  ;;  %v143_v6 = vld [vmem:[%s5299_s0 + $0x3d0] sm:$0xff]  ;;  %vm5310_vm9 = vcmask 654912  }
 0x156   :  { %v1690_v25 = vunpack.c.l.b16 %v1352_v10  ;;  %v1691_v26 = vunpack.c.h.b16 %v1352_v10  ;;  %v1147_v29 = vmul.f32 0.015625, %v580_v18  ;;  %v2362_v34 = vsel %vm1859_vm1, %v2361_v16, %v2357_v14  ;;  %v158_v18 = vld [vmem:[%s5299_s0 + $0x448] sm:$0xff] }
 0x157   :  { %780 = vadd.xlane.f32.xlu1 %v779_v12  ;;  %v647_v12 = vsel %vm277_vm0, %v144_v62, 0.0 }
 0x158   :  { %v2366_v30 = vrot.slane %v1690_v25, %v3749_v39  ;;  %v2371_v15 = vrot.slane %v1691_v26, %v3752_v40  ;;  %v1353_v31 = vpack.c.bf16 %v1148_v17, %v1147_v29  ;;  %777 = vadd.xlane.f32.xlu0 %v776_v19  ;;  %v589_v32 = vpop.xlane.xlu1 %588  ;;  %v644_v17 = vsel %vm277_vm0, %v143_v6, 0.0  ;;  %v157_v29 = vld [vmem:[%s5299_s0 + $0x440] sm:$0xff] }
 0x159   :  { %v1150_v35 = vmul.f32 0.015625, %v589_v32  ;;  %v586_v36 = vpop.xlane.xlu0 %585 }
 0x15a   :  { %v2367_v46 = vsel %vm1866_vm2, %v2366_v30, %v2362_v34  ;;  %v1692_v47 = vunpack.c.l.b16 %v1353_v31  ;;  %v1693_v50 = vunpack.c.h.b16 %v1353_v31  ;;  %v1149_v51 = vmul.f32 0.015625, %v586_v36 }
 0x15b   :  { %v2372_v54 = vsel %vm1873_vm3, %v2371_v15, %v2367_v46  ;;  %924 = vadd.xlane.f32.xlu1 %v923_v33  ;;  %v689_v33 = vsel %vm277_vm0, %v158_v18, 0.0  ;;  %v686_v36 = vsel %vm277_vm0, %v157_v29, 0.0 }
 0x15c   :  { %v2376_v55 = vrot.slane %v1692_v47, %v3758_v44  ;;  %v2381_v56 = vrot.slane %v1693_v50, %v3765_v48  ;;  %v1354_v27 = vpack.c.bf16 %v1150_v35, %v1149_v51  ;;  %921 = vadd.xlane.f32.xlu0 %v920_v38  ;;  %v595_v20 = vpop.xlane.xlu1 %594  ;;  %v206_v38 = vld [vmem:[%s5299_s0 + $0x5c8] sm:$0xff]  ;;  %v205_v51 = vld [vmem:[%s5299_s0 + $0x5c0] sm:$0xff] }
 0x15d   :  { %v1152_v58 = vmul.f32 0.015625, %v595_v20  ;;  %v592_v59 = vpop.xlane.xlu0 %591 }
 0x15e   :  { %v2377_v63 = vsel %vm1880_vm4, %v2376_v55, %v2372_v54  ;;  %v1694_v1 = vunpack.c.l.b16 %v1354_v27  ;;  %v1695_v2 = vunpack.c.h.b16 %v1354_v27  ;;  %v1151_v5 = vmul.f32 0.015625, %v592_v59 }
 0x15f   :  { %v2382_v7 = vsel %vm1887_vm5, %v2381_v56, %v2377_v63  ;;  %966 = vadd.xlane.f32.xlu1 %v965_v57  ;;  %v833_v56 = vsel %vm277_vm0, %v206_v38, 0.0  ;;  %v830_v59 = vsel %vm277_vm0, %v205_v51, 0.0 }
 0x160   :  { %v2386_v8 = vrot.slane %v1694_v1, %v3779_v3  ;;  %v2391_v9 = vrot.slane %v1695_v2, %v3782_v4  ;;  %v1355_v10 = vpack.c.bf16 %v1152_v58, %v1151_v5  ;;  %963 = vadd.xlane.f32.xlu0 %v962_v61  ;;  %v619_v11 = vpop.xlane.xlu1 %618  ;;  %v220_v61 = vld [vmem:[%s5299_s0 + $0x638] sm:$0xff]  ;;  %v219_v2 = vld [vmem:[%s5299_s0 + $0x630] sm:$0xff] }
 0x161   :  { %v1160_v14 = vmul.f32 0.015625, %v619_v11  ;;  %v616_v16 = vpop.xlane.xlu0 %615 }
 0x162   :  { %v2387_v19 = vsel %vm1894_vm6, %v2386_v8, %v2382_v7  ;;  %v1696_v24 = vunpack.c.l.b16 %v1355_v10  ;;  %v1697_v25 = vunpack.c.h.b16 %v1355_v10  ;;  %v1159_v26 = vmul.f32 0.015625, %v616_v16  ;;  %v268_v16 = vld [vmem:[%s5299_s0 + $0x7b8] sm:$0xff] }
 0x163   :  { %v2392_v0 = vsel %vm1901_vm7, %v2391_v9, %v2387_v19  ;;  %648 = vadd.xlane.f32.xlu1 %v647_v12  ;;  %v875_v9 = vsel %vm277_vm0, %v220_v61, 0.0  ;;  %v267_v19 = vld [vmem:[%s5299_s0 + $0x7b0] sm:$0xff]  ;;  %v1019_v29 = vsel %vm277_vm0, %v268_v16, 0.0 }
 0x164   :  { %v2396_v30 = vrot.slane %v1696_v24, %v3797_v21  ;;  %v2401_v15 = vrot.slane %v1697_v25, %v3812_v37  ;;  %v1359_v31 = vpack.c.bf16 %v1160_v14, %v1159_v26  ;;  %645 = vadd.xlane.f32.xlu0 %v644_v17  ;;  %v625_v32 = vpop.xlane.xlu1 %624  ;;  %v872_v14 = vsel %vm277_vm0, %v219_v2, 0.0 }
 0x165   :  { %v1162_v34 = vmul.f32 0.015625, %v625_v32  ;;  %v622_v35 = vpop.xlane.xlu0 %621  ;;  %v1016_v32 = vsel %vm277_vm0, %v267_v19, 0.0 }
 0x166   :  { %v2397_v45 = vsel %vm1908_vm8, %v2396_v30, %v2392_v0  ;;  %v1704_v46 = vunpack.c.l.b16 %v1359_v31  ;;  %v1705_v47 = vunpack.c.h.b16 %v1359_v31  ;;  %v1161_v50 = vmul.f32 0.015625, %v622_v35  ;;  %v127_v35 = vld [vmem:[%s5299_s0 + $0x350] sm:$0xff] }
 0x167   :  { %v4452_v53 = vsel %vm5310_vm9, %v2401_v15, %v2397_v45  ;;  %690 = vadd.xlane.f32.xlu1 %v689_v33  ;;  %v128_v33 = vld [vmem:[%s5299_s0 + $0x358] sm:$0xff] }
 0x168   :  { %v1360_v54 = vpack.c.bf16 %v1162_v34, %v1161_v50  ;;  %687 = vadd.xlane.f32.xlu0 %v686_v36  ;;  %v715_v55 = vpop.xlane.xlu1 %714  ;;  %v2436_v27 = vrot.slane %v1704_v46, %v3737_v28  ;;  %v2440_v20 = vrot.slane %v1705_v47, %v3755_v41  ;;  %v599_v45 = vsel %vm277_vm0, %v128_v33, 0.0 }
 0x169   :  { %v1192_v57 = vmul.f32 0.015625, %v715_v55  ;;  %v712_v58 = vpop.xlane.xlu0 %711  ;;  %v176_v55 = vld [vmem:[%s5299_s0 + $0x4d8] sm:$0xff] }
 0x16a   :  { %v1706_v62 = vunpack.c.l.b16 %v1360_v54  ;;  %v1707_v63 = vunpack.c.h.b16 %v1360_v54  ;;  %v1191_v1 = vmul.f32 0.015625, %v712_v58  ;;  %v2441_v10 = vsel %vm1859_vm1, %v2440_v20, %v2436_v27 }
 0x16b   :  { %834 = vadd.xlane.f32.xlu1 %v833_v56  ;;  %v596_v54 = vsel %vm277_vm0, %v127_v35, 0.0 }
 0x16c   :  { %v2445_v5 = vrot.slane %v1706_v62, %v3749_v39  ;;  %v2450_v6 = vrot.slane %v1707_v63, %v3752_v40  ;;  %v1375_v7 = vpack.c.bf16 %v1192_v57, %v1191_v1  ;;  %831 = vadd.xlane.f32.xlu0 %v830_v59  ;;  %v667_v8 = vpop.xlane.xlu1 %666  ;;  %v175_v57 = vld [vmem:[%s5299_s0 + $0x4d0] sm:$0xff]  ;;  %v743_v63 = vsel %vm277_vm0, %v176_v55, 0.0 }
 0x16d   :  { %v1176_v11 = vmul.f32 0.015625, %v667_v8  ;;  %v664_v12 = vpop.xlane.xlu0 %663 }
 0x16e   :  { %v2446_v17 = vsel %vm1866_vm2, %v2445_v5, %v2441_v10  ;;  %v1175_v18 = vmul.f32 0.015625, %v664_v12  ;;  %v1736_v0 = vunpack.c.l.b16 %v1375_v7  ;;  %v1737_v30 = vunpack.c.h.b16 %v1375_v7  ;;  %v190_v7 = vld [vmem:[%s5299_s0 + $0x548] sm:$0xff]  ;;  %v189_v10 = vld [vmem:[%s5299_s0 + $0x540] sm:$0xff] }
 0x16f   :  { %v4477_v24 = vsel %vm1873_vm3, %v2450_v6, %v2446_v17  ;;  %876 = vadd.xlane.f32.xlu1 %v875_v9  ;;  %v740_v6 = vsel %vm277_vm0, %v175_v57, 0.0  ;;  %v785_v16 = vsel %vm277_vm0, %v190_v7, 0.0 }
 0x170   :  { %v4479_v25 = vpack.c.bf16 %v1176_v11, %v1175_v18  ;;  %873 = vadd.xlane.f32.xlu0 %v872_v14  ;;  %v721_v26 = vpop.xlane.xlu1 %720  ;;  %v2594_v46 = vrot.slane %v1736_v0, %v3737_v28  ;;  %v2598_v47 = vrot.slane %v1737_v30, %v3755_v41  ;;  %v238_v0 = vld [vmem:[%s5299_s0 + $0x6c8] sm:$0xff] }
 0x171   :  { %v1194_v15 = vmul.f32 0.015625, %v721_v26  ;;  %v718_v31 = vpop.xlane.xlu0 %717 }
 0x172   :  { %v1193_v34 = vmul.f32 0.015625, %v718_v31  ;;  %v2599_v1 = vsel %vm1859_vm1, %v2598_v47, %v2594_v46  ;;  %v1720_v17 = vunpack.c.l.b16 %v4479_v25  ;;  %v1721_v18 = vunpack.c.h.b16 %v4479_v25 }
 0x173   :  { %1020 = vadd.xlane.f32.xlu1 %v1019_v29  ;;  %v782_v29 = vsel %vm277_vm0, %v189_v10, 0.0 }
 0x174   :  { %v1376_v36 = vpack.c.bf16 %v1194_v15, %v1193_v34  ;;  %1017 = vadd.xlane.f32.xlu0 %v1016_v32  ;;  %v811_v38 = vpop.xlane.xlu1 %810  ;;  %v237_v32 = vld [vmem:[%s5299_s0 + $0x6c0] sm:$0xff]  ;;  %v2519_v46 = vrot.slane %v1721_v18, %v3755_v41 }
 0x175   :  { %v1224_v50 = vmul.f32 0.015625, %v811_v38  ;;  %v808_v51 = vpop.xlane.xlu0 %807  ;;  %v252_v38 = vld [vmem:[%s5299_s0 + $0x738] sm:$0xff] }
 0x176   :  { %v1738_v56 = vunpack.c.l.b16 %v1376_v36  ;;  %v1739_v27 = vunpack.c.h.b16 %v1376_v36  ;;  %v1223_v20 = vmul.f32 0.015625, %v808_v51  ;;  %v929_v36 = vsel %vm277_vm0, %v238_v0, 0.0 }
 0x177   :  { %600 = vadd.xlane.f32.xlu1 %v599_v45  ;;  %v2515_v45 = vrot.slane %v1720_v17, %v3737_v28  ;;  %v926_v51 = vsel %vm277_vm0, %v237_v32, 0.0 }
 0x178   :  { %v2603_v58 = vrot.slane %v1738_v56, %v3749_v39  ;;  %v2608_v59 = vrot.slane %v1739_v27, %v3752_v40  ;;  %v4501_v61 = vpack.c.bf16 %v1224_v50, %v1223_v20  ;;  %597 = vadd.xlane.f32.xlu0 %v596_v54  ;;  %v631_v62 = vpop.xlane.xlu1 %630  ;;  %v251_v54 = vld [vmem:[%s5299_s0 + $0x730] sm:$0xff] }
 0x179   :  { %v1164_v2 = vmul.f32 0.015625, %v631_v62  ;;  %v628_v5 = vpop.xlane.xlu0 %627 }
 0x17a   :  { %v2604_v8 = vsel %vm1866_vm2, %v2603_v58, %v2599_v1  ;;  %v1163_v9 = vmul.f32 0.015625, %v628_v5  ;;  %v971_v58 = vsel %vm277_vm0, %v252_v38, 0.0  ;;  %v1768_v5 = vunpack.c.l.b16 %v4501_v61 }
 0x17b   :  { %v4514_v11 = vsel %vm1873_vm3, %v2608_v59, %v2604_v8  ;;  %744 = vadd.xlane.f32.xlu1 %v743_v63 }
 0x17c   :  { %v1361_v12 = vpack.c.bf16 %v1164_v2, %v1163_v9  ;;  %741 = vadd.xlane.f32.xlu0 %v740_v6  ;;  %v673_v14 = vpop.xlane.xlu1 %672  ;;  %v968_v2 = vsel %vm277_vm0, %v251_v54, 0.0  ;;  %v1769_v6 = vunpack.c.h.b16 %v4501_v61  ;;  %v146_v9 = vld [vmem:[%s5299_s0 + $0x3e8] sm:$0xff]  ;;  %v208_v54 = vld [vmem:[%s5299_s0 + $0x5d8] sm:$0xff] }
 0x17d   :  { %v1178_v19 = vmul.f32 0.015625, %v673_v14  ;;  %v670_v26 = vpop.xlane.xlu0 %669  ;;  %v145_v14 = vld [vmem:[%s5299_s0 + $0x3e0] sm:$0xff]  ;;  %v653_v18 = vsel %vm277_vm0, %v146_v9, 0.0 }
 0x17e   :  { %v1708_v30 = vunpack.c.l.b16 %v1361_v12  ;;  %v1709_v15 = vunpack.c.h.b16 %v1361_v12  ;;  %v1177_v31 = vmul.f32 0.015625, %v670_v26  ;;  %v2756_v26 = vrot.slane %v1769_v6, %v3755_v41 }
 0x17f   :  { %786 = vadd.xlane.f32.xlu1 %v785_v16 }
 0x180   :  { %v2455_v33 = vrot.slane %v1708_v30, %v3758_v44  ;;  %v2460_v25 = vrot.slane %v1709_v15, %v3765_v48  ;;  %v1368_v34 = vpack.c.bf16 %v1178_v19, %v1177_v31  ;;  %783 = vadd.xlane.f32.xlu0 %v782_v29  ;;  %v763_v35 = vpop.xlane.xlu1 %762  ;;  %v2752_v19 = vrot.slane %v1768_v5, %v3737_v28  ;;  %v160_v15 = vld [vmem:[%s5299_s0 + $0x458] sm:$0xff] }
 0x181   :  { %v1208_v47 = vmul.f32 0.015625, %v763_v35  ;;  %v760_v50 = vpop.xlane.xlu0 %759  ;;  %v650_v30 = vsel %vm277_vm0, %v145_v14, 0.0 }
 0x182   :  { %v2456_v55 = vsel %vm1880_vm4, %v2455_v33, %v4477_v24  ;;  %v1722_v56 = vunpack.c.l.b16 %v1368_v34  ;;  %v1723_v27 = vunpack.c.h.b16 %v1368_v34  ;;  %v1207_v20 = vmul.f32 0.015625, %v760_v50 }
 0x183   :  { %v4541_v57 = vsel %vm1887_vm5, %v2460_v25, %v2456_v55  ;;  %930 = vadd.xlane.f32.xlu1 %v929_v36  ;;  %v2520_v24 = vsel %vm1859_vm1, %v2519_v46, %v2515_v45  ;;  %v159_v25 = vld [vmem:[%s5299_s0 + $0x450] sm:$0xff]  ;;  %v695_v45 = vsel %vm277_vm0, %v160_v15, 0.0  ;;  %v2757_v46 = vsel %vm1859_vm1, %v2756_v26, %v2752_v19  ;;  %v270_v19 = vld [vmem:[%s5299_s0 + $0x7c8] sm:$0xff] }
 0x184   :  { %v2524_v59 = vrot.slane %v1722_v56, %v3749_v39  ;;  %v2529_v62 = vrot.slane %v1723_v27, %v3752_v40  ;;  %v4546_v63 = vpack.c.bf16 %v1208_v47, %v1207_v20  ;;  %927 = vadd.xlane.f32.xlu0 %v926_v51  ;;  %v817_v1 = vpop.xlane.xlu1 %816  ;;  %v692_v51 = vsel %vm277_vm0, %v159_v25, 0.0  ;;  %v207_v27 = vld [vmem:[%s5299_s0 + $0x5d0] sm:$0xff] }
 0x185   :  { %v1226_v7 = vmul.f32 0.015625, %v817_v1  ;;  %v814_v8 = vpop.xlane.xlu0 %813  ;;  %v836_v6 = vsel %vm277_vm0, %v207_v27, 0.0 }
 0x186   :  { %v2525_v10 = vsel %vm1866_vm2, %v2524_v59, %v2520_v24  ;;  %v1225_v12 = vmul.f32 0.015625, %v814_v8  ;;  %v1752_v1 = vunpack.c.l.b16 %v4546_v63 }
 0x187   :  { %v4560_v16 = vsel %vm1873_vm3, %v2529_v62, %v2525_v10  ;;  %972 = vadd.xlane.f32.xlu1 %v971_v58  ;;  %v839_v62 = vsel %vm277_vm0, %v208_v54, 0.0 }
 0x188   :  { %v1392_v17 = vpack.c.bf16 %v1226_v7, %v1225_v12  ;;  %969 = vadd.xlane.f32.xlu0 %v968_v2  ;;  %v907_v61 = vpop.xlane.xlu1 %906  ;;  %v1753_v2 = vunpack.c.h.b16 %v4546_v63  ;;  %v222_v7 = vld [vmem:[%s5299_s0 + $0x648] sm:$0xff]  ;;  %v221_v12 = vld [vmem:[%s5299_s0 + $0x640] sm:$0xff]  ;;  %v2673_v26 = vrot.slane %v1752_v1, %v3737_v28 }
 0x189   :  { %v1256_v29 = vmul.f32 0.015625, %v907_v61  ;;  %v904_v0 = vpop.xlane.xlu0 %903  ;;  %v878_v15 = vsel %vm277_vm0, %v221_v12, 0.0  ;;  %v129_v1 = vld [vmem:[%s5299_s0 + $0x360] sm:$0xff]  ;;  %v178_v12 = vld [vmem:[%s5299_s0 + $0x4e8] sm:$0xff] }
 0x18a   :  { %v1770_v31 = vunpack.c.l.b16 %v1392_v17  ;;  %v1771_v32 = vunpack.c.h.b16 %v1392_v17  ;;  %v1255_v33 = vmul.f32 0.015625, %v904_v0 }
 0x18b   :  { %654 = vadd.xlane.f32.xlu1 %v653_v18  ;;  %v881_v18 = vsel %vm277_vm0, %v222_v7, 0.0 }
 0x18c   :  { %v2761_v34 = vrot.slane %v1770_v31, %v3749_v39  ;;  %v2766_v35 = vrot.slane %v1771_v32, %v3752_v40  ;;  %v4574_v36 = vpack.c.bf16 %v1256_v29, %v1255_v33  ;;  %651 = vadd.xlane.f32.xlu0 %v650_v30  ;;  %v727_v38 = vpop.xlane.xlu1 %726  ;;  %v2677_v29 = vrot.slane %v1753_v2, %v3755_v41  ;;  %v269_v31 = vld [vmem:[%s5299_s0 + $0x7c0] sm:$0xff] }
 0x18d   :  { %v1196_v47 = vmul.f32 0.015625, %v727_v38  ;;  %v724_v50 = vpop.xlane.xlu0 %723  ;;  %v1025_v38 = vsel %vm277_vm0, %v270_v19, 0.0 }
 0x18e   :  { %v2762_v55 = vsel %vm1866_vm2, %v2761_v34, %v2757_v46  ;;  %v1195_v56 = vmul.f32 0.015625, %v724_v50  ;;  %v1800_v54 = vunpack.c.l.b16 %v4574_v36 }
 0x18f   :  { %v4587_v20 = vsel %vm1873_vm3, %v2766_v35, %v2762_v55  ;;  %696 = vadd.xlane.f32.xlu1 %v695_v45  ;;  %v1801_v55 = vunpack.c.h.b16 %v4574_v36 }
 0x190   :  { %v1377_v58 = vpack.c.bf16 %v1196_v47, %v1195_v56  ;;  %693 = vadd.xlane.f32.xlu0 %v692_v51  ;;  %v769_v59 = vpop.xlane.xlu1 %768  ;;  %v1022_v51 = vsel %vm277_vm0, %v269_v31, 0.0 }
 0x191   :  { %v1210_v24 = vmul.f32 0.015625, %v769_v59  ;;  %v766_v5 = vpop.xlane.xlu0 %765  ;;  %v2914_v7 = vrot.slane %v1801_v55, %v3755_v41 }
 0x192   :  { %v1740_v8 = vunpack.c.l.b16 %v1377_v58  ;;  %v1741_v9 = vunpack.c.h.b16 %v1377_v58  ;;  %v1209_v10 = vmul.f32 0.015625, %v766_v5  ;;  %v130_v58 = vld [vmem:[%s5299_s0 + $0x368] sm:$0xff] }
 0x193   :  { %840 = vadd.xlane.f32.xlu1 %v839_v62  ;;  %v605_v5 = vsel %vm277_vm0, %v130_v58, 0.0 }
 0x194   :  { %v2613_v14 = vrot.slane %v1740_v8, %v3758_v44  ;;  %v2618_v63 = vrot.slane %v1741_v9, %v3765_v48  ;;  %v1384_v17 = vpack.c.bf16 %v1210_v24, %v1209_v10  ;;  %837 = vadd.xlane.f32.xlu0 %v836_v6  ;;  %v859_v61 = vpop.xlane.xlu1 %858  ;;  %v2910_v6 = vrot.slane %v1800_v54, %v3737_v28 }
 0x195   :  { %v1240_v0 = vmul.f32 0.015625, %v859_v61  ;;  %v856_v30 = vpop.xlane.xlu0 %855  ;;  %v602_v10 = vsel %vm277_vm0, %v129_v1, 0.0  ;;  %v177_v61 = vld [vmem:[%s5299_s0 + $0x4e0] sm:$0xff] }
 0x196   :  { %v2614_v32 = vsel %vm1880_vm4, %v2613_v14, %v4514_v11  ;;  %v1754_v33 = vunpack.c.l.b16 %v1384_v17  ;;  %v1755_v25 = vunpack.c.h.b16 %v1384_v17  ;;  %v1239_v34 = vmul.f32 0.015625, %v856_v30 }
 0x197   :  { %v4614_v35 = vsel %vm1887_vm5, %v2618_v63, %v2614_v32  ;;  %882 = vadd.xlane.f32.xlu1 %v881_v18  ;;  %v2678_v11 = vsel %vm1859_vm1, %v2677_v29, %v2673_v26  ;;  %v2915_v30 = vsel %vm1859_vm1, %v2914_v7, %v2910_v6  ;;  %v746_v32 = vsel %vm277_vm0, %v177_v61, 0.0  ;;  %v253_v61 = vld [vmem:[%s5299_s0 + $0x740] sm:$0xff] }
 0x198   :  { %v2682_v45 = vrot.slane %v1754_v33, %v3749_v39  ;;  %v2687_v46 = vrot.slane %v1755_v25, %v3752_v40  ;;  %v4619_v47 = vpack.c.bf16 %v1240_v0, %v1239_v34  ;;  %879 = vadd.xlane.f32.xlu0 %v878_v15  ;;  %v913_v50 = vpop.xlane.xlu1 %912  ;;  %v749_v0 = vsel %vm277_vm0, %v178_v12, 0.0  ;;  %v192_v33 = vld [vmem:[%s5299_s0 + $0x558] sm:$0xff] }
 0x199   :  { %v1258_v56 = vmul.f32 0.015625, %v913_v50  ;;  %v910_v27 = vpop.xlane.xlu0 %909 }
 0x19a   :  { %v2683_v59 = vsel %vm1866_vm2, %v2682_v45, %v2678_v11  ;;  %v1257_v62 = vmul.f32 0.015625, %v910_v27 }
 0x19b   :  { %v4633_v2 = vsel %vm1873_vm3, %v2687_v46, %v2683_v59  ;;  %1026 = vadd.xlane.f32.xlu1 %v1025_v38  ;;  %v191_v38 = vld [vmem:[%s5299_s0 + $0x550] sm:$0xff] }
 0x19c   :  { %v1408_v24 = vpack.c.bf16 %v1258_v56, %v1257_v62  ;;  %1023 = vadd.xlane.f32.xlu0 %v1022_v51  ;;  %v1003_v36 = vpop.xlane.xlu1 %1002  ;;  %v791_v51 = vsel %vm277_vm0, %v192_v33, 0.0  ;;  %v788_v55 = vsel %vm277_vm0, %v191_v38, 0.0  ;;  %v240_v56 = vld [vmem:[%s5299_s0 + $0x6d8] sm:$0xff]  ;;  %v239_v62 = vld [vmem:[%s5299_s0 + $0x6d0] sm:$0xff] }
 0x19d   :  { %v1288_v8 = vmul.f32 0.015625, %v1003_v36  ;;  %v1000_v9 = vpop.xlane.xlu0 %999  ;;  %v935_v6 = vsel %vm277_vm0, %v240_v56, 0.0 }
 0x19e   :  { %v1802_v14 = vunpack.c.l.b16 %v1408_v24  ;;  %v1803_v63 = vunpack.c.h.b16 %v1408_v24  ;;  %v1287_v17 = vmul.f32 0.015625, %v1000_v9  ;;  %v932_v9 = vsel %vm277_vm0, %v239_v62, 0.0 }
 0x19f   :  { %606 = vadd.xlane.f32.xlu1 %v605_v5 }
 0x1a0   :  { %v2919_v18 = vrot.slane %v1802_v14, %v3749_v39  ;;  %v2924_v19 = vrot.slane %v1803_v63, %v3752_v40  ;;  %v4647_v26 = vpack.c.bf16 %v1288_v8, %v1287_v17  ;;  %603 = vadd.xlane.f32.xlu0 %v602_v10  ;;  %v637_v29 = vpop.xlane.xlu1 %636  ;;  %v254_v10 = vld [vmem:[%s5299_s0 + $0x748] sm:$0xff] }
 0x1a1   :  { %v1166_v15 = vmul.f32 0.015625, %v637_v29  ;;  %v634_v31 = vpop.xlane.xlu0 %633 }
 0x1a2   :  { %v2920_v25 = vsel %vm1866_vm2, %v2919_v18, %v2915_v30  ;;  %v1165_v34 = vmul.f32 0.015625, %v634_v31  ;;  %v1785_v31 = vunpack.c.h.b16 %v4619_v47 }
 0x1a3   :  { %v4660_v45 = vsel %vm1873_vm3, %v2924_v19, %v2920_v25  ;;  %750 = vadd.xlane.f32.xlu1 %v749_v0  ;;  %v974_v25 = vsel %vm277_vm0, %v253_v61, 0.0 }
 0x1a4   :  { %v1362_v46 = vpack.c.bf16 %v1166_v15, %v1165_v34  ;;  %747 = vadd.xlane.f32.xlu0 %v746_v32  ;;  %v679_v50 = vpop.xlane.xlu1 %678  ;;  %v1784_v15 = vunpack.c.l.b16 %v4619_v47  ;;  %v148_v34 = vld [vmem:[%s5299_s0 + $0x3f8] sm:$0xff]  ;;  %v2835_v62 = vrot.slane %v1785_v31, %v3755_v41 }
 0x1a5   :  { %v1180_v11 = vmul.f32 0.015625, %v679_v50  ;;  %v676_v54 = vpop.xlane.xlu0 %675 }
 0x1a6   :  { %v1710_v27 = vunpack.c.l.b16 %v1362_v46  ;;  %v1711_v58 = vunpack.c.h.b16 %v1362_v46  ;;  %v1179_v59 = vmul.f32 0.015625, %v676_v54 }
 0x1a7   :  { %792 = vadd.xlane.f32.xlu1 %v791_v51 }
 0x1a8   :  { %v2465_v1 = vrot.slane %v1710_v27, %v3779_v3  ;;  %v2470_v24 = vrot.slane %v1711_v58, %v3782_v4  ;;  %v1369_v36 = vpack.c.bf16 %v1180_v11, %v1179_v59  ;;  %789 = vadd.xlane.f32.xlu0 %v788_v55  ;;  %v823_v5 = vpop.xlane.xlu1 %822  ;;  %v147_v11 = vld [vmem:[%s5299_s0 + $0x3f0] sm:$0xff]  ;;  %v162_v58 = vld [vmem:[%s5299_s0 + $0x468] sm:$0xff]  ;;  %v2831_v59 = vrot.slane %v1784_v15, %v3737_v28 }
 0x1a9   :  { %v1228_v7 = vmul.f32 0.015625, %v823_v5  ;;  %v820_v8 = vpop.xlane.xlu0 %819  ;;  %v161_v5 = vld [vmem:[%s5299_s0 + $0x460] sm:$0xff]  ;;  %v210_v15 = vld [vmem:[%s5299_s0 + $0x5e8] sm:$0xff] }
 0x1aa   :  { %v2466_v12 = vsel %vm1894_vm6, %v2465_v1, %v4541_v57  ;;  %v1724_v14 = vunpack.c.l.b16 %v1369_v36  ;;  %v1725_v63 = vunpack.c.h.b16 %v1369_v36  ;;  %v1227_v17 = vmul.f32 0.015625, %v820_v8 }
 0x1ab   :  { %v4683_v18 = vsel %vm1901_vm7, %v2470_v24, %v2466_v12  ;;  %936 = vadd.xlane.f32.xlu1 %v935_v6  ;;  %v977_v57 = vsel %vm277_vm0, %v254_v10, 0.0  ;;  %v656_v36 = vsel %vm277_vm0, %v147_v11, 0.0  ;;  %v701_v12 = vsel %vm277_vm0, %v162_v58, 0.0  ;;  %v223_v58 = vld [vmem:[%s5299_s0 + $0x650] sm:$0xff] }
 0x1ac   :  { %v2534_v19 = vrot.slane %v1724_v14, %v3758_v44  ;;  %v2539_v29 = vrot.slane %v1725_v63, %v3765_v48  ;;  %v1393_v0 = vpack.c.bf16 %v1228_v7, %v1227_v17  ;;  %933 = vadd.xlane.f32.xlu0 %v932_v9  ;;  %v865_v30 = vpop.xlane.xlu1 %864 }
 0x1ad   :  { %v1242_v32 = vmul.f32 0.015625, %v865_v30  ;;  %v862_v33 = vpop.xlane.xlu0 %861 }
 0x1ae   :  { %v2535_v38 = vsel %vm1880_vm4, %v2534_v19, %v4560_v16  ;;  %v1772_v46 = vunpack.c.l.b16 %v1393_v0  ;;  %v1773_v50 = vunpack.c.h.b16 %v1393_v0  ;;  %v1241_v51 = vmul.f32 0.015625, %v862_v33  ;;  %v209_v33 = vld [vmem:[%s5299_s0 + $0x5e0] sm:$0xff] }
 0x1af   :  { %v4700_v47 = vsel %vm1887_vm5, %v2539_v29, %v2535_v38  ;;  %978 = vadd.xlane.f32.xlu1 %v977_v57  ;;  %v659_v16 = vsel %vm277_vm0, %v148_v34, 0.0  ;;  %v698_v19 = vsel %vm277_vm0, %v161_v5, 0.0  ;;  %v1832_v29 = vunpack.c.l.b16 %v4647_v26 }
 0x1b0   :  { %v2771_v54 = vrot.slane %v1772_v46, %v3758_v44  ;;  %v2776_v55 = vrot.slane %v1773_v50, %v3765_v48  ;;  %v1400_v56 = vpack.c.bf16 %v1242_v32, %v1241_v51  ;;  %975 = vadd.xlane.f32.xlu0 %v974_v25  ;;  %v955_v27 = vpop.xlane.xlu1 %954  ;;  %v1833_v0 = vunpack.c.h.b16 %v4647_v26 }
 0x1b1   :  { %v1272_v1 = vmul.f32 0.015625, %v955_v27  ;;  %v952_v24 = vpop.xlane.xlu0 %951  ;;  %v845_v38 = vsel %vm277_vm0, %v210_v15, 0.0  ;;  %v3068_v46 = vrot.slane %v1832_v29, %v3737_v28 }
 0x1b2   :  { %v2772_v6 = vsel %vm1880_vm4, %v2771_v54, %v4587_v20  ;;  %v1786_v7 = vunpack.c.l.b16 %v1400_v56  ;;  %v1787_v8 = vunpack.c.h.b16 %v1400_v56  ;;  %v1271_v9 = vmul.f32 0.015625, %v952_v24 }
 0x1b3   :  { %v4717_v10 = vsel %vm1887_vm5, %v2776_v55, %v2772_v6  ;;  %660 = vadd.xlane.f32.xlu1 %v659_v16  ;;  %v2836_v20 = vsel %vm1859_vm1, %v2835_v62, %v2831_v59  ;;  %v3072_v50 = vrot.slane %v1833_v0, %v3755_v41  ;;  %v842_v54 = vsel %vm277_vm0, %v209_v33, 0.0  ;;  %v224_v55 = vld [vmem:[%s5299_s0 + $0x658] sm:$0xff] }
 0x1b4   :  { %v2840_v14 = vrot.slane %v1786_v7, %v3749_v39  ;;  %v2845_v63 = vrot.slane %v1787_v8, %v3752_v40  ;;  %v4722_v17 = vpack.c.bf16 %v1272_v1, %v1271_v9  ;;  %657 = vadd.xlane.f32.xlu0 %v656_v36  ;;  %v1009_v61 = vpop.xlane.xlu1 %1008  ;;  %v887_v36 = vsel %vm277_vm0, %v224_v55, 0.0  ;;  %v272_v9 = vld [vmem:[%s5299_s0 + $0x7d8] sm:$0xff] }
 0x1b5   :  { %v1290_v30 = vmul.f32 0.015625, %v1009_v61  ;;  %v1006_v57 = vpop.xlane.xlu0 %1005  ;;  %v3073_v5 = vsel %vm1859_vm1, %v3072_v50, %v3068_v46  ;;  %v884_v8 = vsel %vm277_vm0, %v223_v58, 0.0  ;;  %v1031_v15 = vsel %vm277_vm0, %v272_v9, 0.0 }
 0x1b6   :  { %v2841_v31 = vsel %vm1866_vm2, %v2840_v14, %v2836_v20  ;;  %v1289_v32 = vmul.f32 0.015625, %v1006_v57  ;;  %v1817_v58 = vunpack.c.h.b16 %v4722_v17 }
 0x1b7   :  { %v4736_v25 = vsel %vm1873_vm3, %v2845_v63, %v2841_v31  ;;  %702 = vadd.xlane.f32.xlu1 %v701_v12 }
 0x1b8   :  { %v1424_v34 = vpack.c.bf16 %v1290_v30, %v1289_v32  ;;  %699 = vadd.xlane.f32.xlu0 %v698_v19  ;;  %v733_v26 = vpop.xlane.xlu1 %732  ;;  %v271_v19 = vld [vmem:[%s5299_s0 + $0x7d0] sm:$0xff] }
 0x1b9   :  { %v1198_v51 = vmul.f32 0.015625, %v733_v26  ;;  %v730_v11 = vpop.xlane.xlu0 %729  ;;  %v1028_v33 = vsel %vm277_vm0, %v271_v19, 0.0  ;;  %v2993_v19 = vrot.slane %v1817_v58, %v3755_v41 }
 0x1ba   :  { %v1834_v56 = vunpack.c.l.b16 %v1424_v34  ;;  %v1835_v27 = vunpack.c.h.b16 %v1424_v34  ;;  %v1197_v16 = vmul.f32 0.015625, %v730_v11  ;;  %v132_v34 = vld [vmem:[%s5299_s0 + $0x378] sm:$0xff] }
 0x1bb   :  { %846 = vadd.xlane.f32.xlu1 %v845_v38 }
 0x1bc   :  { %v3077_v59 = vrot.slane %v1834_v56, %v3749_v39  ;;  %v3082_v62 = vrot.slane %v1835_v27, %v3752_v40  ;;  %v1378_v1 = vpack.c.bf16 %v1198_v51, %v1197_v16  ;;  %843 = vadd.xlane.f32.xlu0 %v842_v54  ;;  %v775_v24 = vpop.xlane.xlu1 %774  ;;  %v131_v51 = vld [vmem:[%s5299_s0 + $0x370] sm:$0xff]  ;;  %v1816_v16 = vunpack.c.l.b16 %v4722_v17 }
 0x1bd   :  { %v1212_v6 = vmul.f32 0.015625, %v775_v24  ;;  %v772_v7 = vpop.xlane.xlu0 %771  ;;  %v180_v24 = vld [vmem:[%s5299_s0 + $0x4f8] sm:$0xff] }
 0x1be   :  { %v3078_v12 = vsel %vm1866_vm2, %v3077_v59, %v3073_v5  ;;  %v1742_v14 = vunpack.c.l.b16 %v1378_v1  ;;  %v1743_v63 = vunpack.c.h.b16 %v1378_v1  ;;  %v1211_v61 = vmul.f32 0.015625, %v772_v7 }
 0x1bf   :  { %v4761_v20 = vsel %vm1873_vm3, %v3082_v62, %v3078_v12  ;;  %888 = vadd.xlane.f32.xlu1 %v887_v36  ;;  %v608_v1 = vsel %vm277_vm0, %v131_v51, 0.0 }
 0x1c0   :  { %v2623_v29 = vrot.slane %v1742_v14, %v3779_v3  ;;  %v2628_v0 = vrot.slane %v1743_v63, %v3782_v4  ;;  %v1385_v30 = vpack.c.bf16 %v1212_v6, %v1211_v61  ;;  %885 = vadd.xlane.f32.xlu0 %v884_v8  ;;  %v919_v57 = vpop.xlane.xlu1 %918  ;;  %v179_v8 = vld [vmem:[%s5299_s0 + $0x4f0] sm:$0xff]  ;;  %v2989_v61 = vrot.slane %v1816_v16, %v3737_v28  ;;  %v193_v28 = vld [vmem:[%s5299_s0 + $0x560] sm:$0xff] }
 0x1c1   :  { %v1260_v31 = vmul.f32 0.015625, %v919_v57  ;;  %v916_v32 = vpop.xlane.xlu0 %915  ;;  %v194_v57 = vld [vmem:[%s5299_s0 + $0x568] sm:$0xff]  ;;  %v241_v16 = vld [vmem:[%s5299_s0 + $0x6e0] sm:$0xff] }
 0x1c2   :  { %v2624_v26 = vsel %vm1894_vm6, %v2623_v29, %v4614_v35  ;;  %v1756_v38 = vunpack.c.l.b16 %v1385_v30  ;;  %v1757_v46 = vunpack.c.h.b16 %v1385_v30  ;;  %v1259_v50 = vmul.f32 0.015625, %v916_v32 }
 0x1c3   :  { %v4776_v11 = vsel %vm1901_vm7, %v2628_v0, %v2624_v26  ;;  %1032 = vadd.xlane.f32.xlu1 %v1031_v15  ;;  %v611_v35 = vsel %vm277_vm0, %v132_v34, 0.0  ;;  %v752_v30 = vsel %vm277_vm0, %v179_v8, 0.0  ;;  %v256_v8 = vld [vmem:[%s5299_s0 + $0x758] sm:$0xff] }
 0x1c4   :  { %v2692_v54 = vrot.slane %v1756_v38, %v3758_v44  ;;  %v2697_v55 = vrot.slane %v1757_v46, %v3765_v48  ;;  %v1409_v56 = vpack.c.bf16 %v1260_v31, %v1259_v50  ;;  %1029 = vadd.xlane.f32.xlu0 %v1028_v33  ;;  %v961_v27 = vpop.xlane.xlu1 %960  ;;  %v2994_v50 = vsel %vm1859_vm1, %v2993_v19, %v2989_v61  ;;  %vm5311_vm1 = vmmov %vm5310_vm9 }
 0x1c5   :  { %v1274_v59 = vmul.f32 0.015625, %v961_v27  ;;  %v958_v62 = vpop.xlane.xlu0 %957  ;;  %vm5318_vm9 = vmmov %vm5311_vm1 }
 0x1c6   :  { %v2693_v36 = vsel %vm1880_vm4, %v2692_v54, %v4633_v2  ;;  %v1804_v5 = vunpack.c.l.b16 %v1409_v56  ;;  %v1805_v6 = vunpack.c.h.b16 %v1409_v56  ;;  %v1273_v7 = vmul.f32 0.015625, %v958_v62  ;;  %v242_v56 = vld [vmem:[%s5299_s0 + $0x6e8] sm:$0xff] }
 0x1c7   :  { %v4793_v17 = vsel %vm1887_vm5, %v2697_v55, %v2693_v36  ;;  %612 = vadd.xlane.f32.xlu1 %v611_v35  ;;  %v755_v2 = vsel %vm277_vm0, %v180_v24, 0.0  ;;  %v794_v55 = vsel %vm277_vm0, %v193_v28, 0.0  ;;  %v941_v36 = vsel %vm277_vm0, %v242_v56, 0.0 }
 0x1c8   :  { %v2929_v9 = vrot.slane %v1804_v5, %v3758_v44  ;;  %v2934_v12 = vrot.slane %v1805_v6, %v3765_v48  ;;  %v1416_v14 = vpack.c.bf16 %v1274_v59, %v1273_v7  ;;  %609 = vadd.xlane.f32.xlu0 %v608_v1  ;;  %v643_v63 = vpop.xlane.xlu1 %642  ;;  %v938_v7 = vsel %vm277_vm0, %v241_v16, 0.0 }
 0x1c9   :  { %v1168_v29 = vmul.f32 0.015625, %v643_v63  ;;  %v640_v0 = vpop.xlane.xlu0 %639 }
 0x1ca   :  { %v2930_v15 = vsel %vm1880_vm4, %v2929_v9, %v4660_v45  ;;  %v1818_v31 = vunpack.c.l.b16 %v1416_v14  ;;  %v1819_v32 = vunpack.c.h.b16 %v1416_v14  ;;  %v1167_v33 = vmul.f32 0.015625, %v640_v0 }
 0x1cb   :  { %v4810_v41 = vsel %vm1887_vm5, %v2934_v12, %v2930_v15  ;;  %756 = vadd.xlane.f32.xlu1 %v755_v2  ;;  %v797_v45 = vsel %vm277_vm0, %v194_v57, 0.0  ;;  %v255_v2 = vld [vmem:[%s5299_s0 + $0x750] sm:$0xff] }
 0x1cc   :  { %v2998_v34 = vrot.slane %v1818_v31, %v3749_v39  ;;  %v3003_v26 = vrot.slane %v1819_v32, %v3752_v40  ;;  %v1363_v38 = vpack.c.bf16 %v1168_v29, %v1167_v33  ;;  %753 = vadd.xlane.f32.xlu0 %v752_v30  ;;  %v685_v46 = vpop.xlane.xlu1 %684  ;;  %v980_v31 = vsel %vm277_vm0, %v255_v2, 0.0  ;;  %v164_v32 = vld [vmem:[%s5299_s0 + $0x478] sm:$0xff] }
 0x1cd   :  { %v1182_v51 = vmul.f32 0.015625, %v685_v46  ;;  %v682_v54 = vpop.xlane.xlu0 %681 }
 0x1ce   :  { %v2999_v27 = vsel %vm1866_vm2, %v2998_v34, %v2994_v50  ;;  %v1712_v39 = vunpack.c.l.b16 %v1363_v38  ;;  %v1713_v35 = vunpack.c.h.b16 %v1363_v38  ;;  %v1181_v40 = vmul.f32 0.015625, %v682_v54  ;;  %v163_v38 = vld [vmem:[%s5299_s0 + $0x470] sm:$0xff]  ;;  %vm5312_vm2 = vmmov %vm5311_vm1 }
 0x1cf   :  { %v4825_v58 = vsel %vm1873_vm3, %v3003_v26, %v2999_v27  ;;  %798 = vadd.xlane.f32.xlu1 %v797_v45  ;;  %v704_v27 = vsel %vm277_vm0, %v163_v38, 0.0  ;;  %vm5313_vm3 = vmmov %vm5309_vm11 }
 0x1d0   :  { %v2475_v59 = vrot.slane %v1712_v39, %v3797_v21  ;;  %v2480_v62 = vrot.slane %v1713_v35, %v3812_v37  ;;  %v1370_v1 = vpack.c.bf16 %v1182_v51, %v1181_v40  ;;  %795 = vadd.xlane.f32.xlu0 %v794_v55  ;;  %v829_v24 = vpop.xlane.xlu1 %828  ;;  %v212_v39 = vld [vmem:[%s5299_s0 + $0x5f8] sm:$0xff] }
 0x1d1   :  { %v1230_v5 = vmul.f32 0.015625, %v829_v24  ;;  %v826_v6 = vpop.xlane.xlu0 %825 }
 0x1d2   :  { %v2476_v9 = vsel %vm1908_vm8, %v2475_v59, %v4683_v18  ;;  %v1726_v12 = vunpack.c.l.b16 %v1370_v1  ;;  %v1727_v14 = vunpack.c.h.b16 %v1370_v1  ;;  %v1229_v63 = vmul.f32 0.015625, %v826_v6 }
 0x1d3   :  { %v4840_v61 = vsel %vm5311_vm1, %v2480_v62, %v2476_v9  ;;  %942 = vadd.xlane.f32.xlu1 %v941_v36  ;;  %v983_v18 = vsel %vm277_vm0, %v256_v8, 0.0  ;;  %v211_v62 = vld [vmem:[%s5299_s0 + $0x5f0] sm:$0xff] }
 0x1d4   :  { %v2544_v19 = vrot.slane %v1726_v12, %v3779_v3  ;;  %v2549_v29 = vrot.slane %v1727_v14, %v3782_v4  ;;  %v1394_v0 = vpack.c.bf16 %v1230_v5, %v1229_v63  ;;  %939 = vadd.xlane.f32.xlu0 %v938_v7  ;;  %v871_v30 = vpop.xlane.xlu1 %870  ;;  %v848_v9 = vsel %vm277_vm0, %v211_v62, 0.0  ;;  %v226_v12 = vld [vmem:[%s5299_s0 + $0x668] sm:$0xff] }
 0x1d5   :  { %v1244_v57 = vmul.f32 0.015625, %v871_v30  ;;  %v868_v15 = vpop.xlane.xlu0 %867 }
 0x1d6   :  { %v2545_v33 = vsel %vm1894_vm6, %v2544_v19, %v4700_v47  ;;  %v1774_v28 = vunpack.c.l.b16 %v1394_v0  ;;  %v1775_v34 = vunpack.c.h.b16 %v1394_v0  ;;  %v1243_v26 = vmul.f32 0.015625, %v868_v15 }
 0x1d7   :  { %v4855_v46 = vsel %vm1901_vm7, %v2549_v29, %v2545_v33  ;;  %984 = vadd.xlane.f32.xlu1 %v983_v18  ;;  %v707_v47 = vsel %vm277_vm0, %v164_v32, 0.0  ;;  %v225_v29 = vld [vmem:[%s5299_s0 + $0x660] sm:$0xff] }
 0x1d8   :  { %v2781_v45 = vrot.slane %v1774_v28, %v3779_v3  ;;  %v2786_v50 = vrot.slane %v1775_v34, %v3782_v4  ;;  %v1401_v51 = vpack.c.bf16 %v1244_v57, %v1243_v26  ;;  %981 = vadd.xlane.f32.xlu0 %v980_v31  ;;  %v1015_v54 = vpop.xlane.xlu1 %1014  ;;  %v890_v33 = vsel %vm277_vm0, %v225_v29, 0.0  ;;  %v274_v28 = vld [vmem:[%s5299_s0 + $0x7e8] sm:$0xff] }
 0x1d9   :  { %v1292_v55 = vmul.f32 0.015625, %v1015_v54  ;;  %v1012_v56 = vpop.xlane.xlu0 %1011 }
 0x1da   :  { %v2782_v35 = vsel %vm1894_vm6, %v2781_v45, %v4717_v10  ;;  %v1788_v40 = vunpack.c.l.b16 %v1401_v51  ;;  %v1789_v16 = vunpack.c.h.b16 %v1401_v51  ;;  %v1291_v59 = vmul.f32 0.015625, %v1012_v56 }
 0x1db   :  { %v4870_v1 = vsel %vm1901_vm7, %v2786_v50, %v2782_v35  ;;  %708 = vadd.xlane.f32.xlu1 %v707_v47  ;;  %v851_v10 = vsel %vm277_vm0, %v212_v39, 0.0  ;;  %v273_v50 = vld [vmem:[%s5299_s0 + $0x7e0] sm:$0xff] }
 0x1dc   :  { %v2850_v24 = vrot.slane %v1788_v40, %v3758_v44  ;;  %v2855_v36 = vrot.slane %v1789_v16, %v3765_v48  ;;  %v1425_v5 = vpack.c.bf16 %v1292_v55, %v1291_v59  ;;  %705 = vadd.xlane.f32.xlu0 %v704_v27  ;;  %v739_v6 = vpop.xlane.xlu1 %738  ;;  %v1034_v35 = vsel %vm277_vm0, %v273_v50, 0.0  ;;  %v196_v40 = vld [vmem:[%s5299_s0 + $0x578] sm:$0xff] }
 0x1dd   :  { %v1200_v7 = vmul.f32 0.015625, %v739_v6  ;;  %v736_v8 = vpop.xlane.xlu0 %735 }
 0x1de   :  { %v2851_v14 = vsel %vm1880_vm4, %v2850_v24, %v4736_v25  ;;  %v1836_v63 = vunpack.c.l.b16 %v1425_v5  ;;  %v1837_v2 = vunpack.c.h.b16 %v1425_v5  ;;  %v1199_v19 = vmul.f32 0.015625, %v736_v8 }
 0x1df   :  { %v4885_v0 = vsel %vm1887_vm5, %v2855_v36, %v2851_v14  ;;  %852 = vadd.xlane.f32.xlu1 %v851_v10  ;;  %v893_v25 = vsel %vm277_vm0, %v226_v12, 0.0  ;;  %v195_v36 = vld [vmem:[%s5299_s0 + $0x570] sm:$0xff] }
 0x1e0   :  { %v3087_v30 = vrot.slane %v1836_v63, %v3758_v44  ;;  %v3092_v18 = vrot.slane %v1837_v2, %v3765_v48  ;;  %v1379_v57 = vpack.c.bf16 %v1200_v7, %v1199_v19  ;;  %849 = vadd.xlane.f32.xlu0 %v848_v9  ;;  %v781_v15 = vpop.xlane.xlu1 %780  ;;  %v800_v14 = vsel %vm277_vm0, %v195_v36, 0.0  ;;  %v244_v63 = vld [vmem:[%s5299_s0 + $0x6f8] sm:$0xff] }
 0x1e1   :  { %v1214_v31 = vmul.f32 0.015625, %v781_v15  ;;  %v778_v32 = vpop.xlane.xlu0 %777 }
 0x1e2   :  { %v3088_v34 = vsel %vm1880_vm4, %v3087_v30, %v4761_v20  ;;  %v1744_v26 = vunpack.c.l.b16 %v1379_v57  ;;  %v1745_v38 = vunpack.c.h.b16 %v1379_v57  ;;  %v1213_v45 = vmul.f32 0.015625, %v778_v32 }
 0x1e3   :  { %v4900_v51 = vsel %vm1887_vm5, %v3092_v18, %v3088_v34  ;;  %894 = vadd.xlane.f32.xlu1 %v893_v25  ;;  %v1037_v20 = vsel %vm277_vm0, %v274_v28, 0.0  ;;  %v243_v18 = vld [vmem:[%s5299_s0 + $0x6f0] sm:$0xff] }
 0x1e4   :  { %v2633_v54 = vrot.slane %v1744_v26, %v3797_v21  ;;  %v2638_v47 = vrot.slane %v1745_v38, %v3812_v37  ;;  %v1386_v55 = vpack.c.bf16 %v1214_v31, %v1213_v45  ;;  %891 = vadd.xlane.f32.xlu0 %v890_v33  ;;  %v925_v56 = vpop.xlane.xlu1 %924  ;;  %v944_v34 = vsel %vm277_vm0, %v243_v18, 0.0  ;;  %v258_v26 = vld [vmem:[%s5299_s0 + $0x768] sm:$0xff] }
 0x1e5   :  { %v1262_v27 = vmul.f32 0.015625, %v925_v56  ;;  %v922_v39 = vpop.xlane.xlu0 %921 }
 0x1e6   :  { %v2634_v16 = vsel %vm1908_vm8, %v2633_v54, %v4776_v11  ;;  %v1758_v59 = vunpack.c.l.b16 %v1386_v55  ;;  %v1759_v62 = vunpack.c.h.b16 %v1386_v55  ;;  %v1261_v24 = vmul.f32 0.015625, %v922_v39 }
 0x1e7   :  { %v4915_v5 = vsel %vm5312_vm2, %v2638_v47, %v2634_v16  ;;  %1038 = vadd.xlane.f32.xlu1 %v1037_v20  ;;  %v803_v11 = vsel %vm277_vm0, %v196_v40, 0.0  ;;  %v257_v47 = vld [vmem:[%s5299_s0 + $0x760] sm:$0xff]  ;;  %vm5321_vm2 = vmmov %vm5311_vm1 }
 0x1e8   :  { %v2702_v6 = vrot.slane %v1758_v59, %v3779_v3  ;;  %v2707_v10 = vrot.slane %v1759_v62, %v3782_v4  ;;  %v1410_v7 = vpack.c.bf16 %v1262_v27, %v1261_v24  ;;  %1035 = vadd.xlane.f32.xlu0 %v1034_v35  ;;  %v967_v8 = vpop.xlane.xlu1 %966  ;;  %v986_v16 = vsel %vm277_vm0, %v257_v47, 0.0  ;;  %v228_v59 = vld [vmem:[%s5299_s0 + $0x678] sm:$0xff] }
 0x1e9   :  { %v1276_v9 = vmul.f32 0.015625, %v967_v8  ;;  %v964_v12 = vpop.xlane.xlu0 %963 }
 0x1ea   :  { %v2703_v2 = vsel %vm1894_vm6, %v2702_v6, %v4793_v17  ;;  %v1806_v19 = vunpack.c.l.b16 %v1410_v7  ;;  %v1807_v29 = vunpack.c.h.b16 %v1410_v7  ;;  %v1275_v30 = vmul.f32 0.015625, %v964_v12 }
 0x1eb   :  { %v4930_v57 = vsel %vm1901_vm7, %v2707_v10, %v2703_v2  ;;  %804 = vadd.xlane.f32.xlu1 %v803_v11  ;;  %v947_v17 = vsel %vm277_vm0, %v244_v63, 0.0  ;;  %v276_v63 = vld [vmem:[%s5299_s0 + $0x7f8] sm:$0xff] }
 0x1ec   :  { %v2939_v15 = vrot.slane %v1806_v19, %v3779_v3  ;;  %v2944_v25 = vrot.slane %v1807_v29, %v3782_v4  ;;  %v1417_v31 = vpack.c.bf16 %v1276_v9, %v1275_v30  ;;  %801 = vadd.xlane.f32.xlu0 %v800_v14  ;;  %v649_v32 = vpop.xlane.xlu1 %648  ;;  %v3374_v2 = vld [vmem:[%s5300_s1 + $0x78] sm:$0xff]  }
 0x1ed   :  { %v1170_v33 = vmul.f32 0.015625, %v649_v32  ;;  %v646_v28 = vpop.xlane.xlu0 %645  ;;  %3351 = vmatprep.subr.bf16.mxu0 %v3374_v2 }
 0x1ee   :  { %v2940_v38 = vsel %vm1894_vm6, %v2939_v15, %v4810_v41  ;;  %v1820_v45 = vunpack.c.l.b16 %v1417_v31  ;;  %v1821_v50 = vunpack.c.h.b16 %v1417_v31  ;;  %v1169_v54 = vmul.f32 0.015625, %v646_v28  ;;  %v275_v15 = vld [vmem:[%s5299_s0 + $0x7f0] sm:$0xff] }
 0x1ef   :  { %v4945_v55 = vsel %vm1901_vm7, %v2944_v25, %v2940_v38  ;;  %948 = vadd.xlane.f32.xlu1 %v947_v17  ;;  %v989_v41 = vsel %vm277_vm0, %v258_v26, 0.0  ;;  %v3375_v25 = vld [vmem:[%s5300_s1 + $0x38] sm:$0xff]   ;;  %v1043_v28 = vsel %vm277_vm0, %v276_v63, 0.0  ;;  %v1040_v38 = vsel %vm277_vm0, %v275_v15, 0.0 }
 0x1f0   :  { %v3008_v56 = vrot.slane %v1820_v45, %v3758_v44  ;;  %v3013_v20 = vrot.slane %v1821_v50, %v3765_v48  ;;  %v1364_v27 = vpack.c.bf16 %v1170_v33, %v1169_v54  ;;  %945 = vadd.xlane.f32.xlu0 %v944_v34  ;;  %v691_v39 = vpop.xlane.xlu1 %690  ;;  %v227_v48 = vld [vmem:[%s5299_s0 + $0x670] sm:$0xff]  ;;  %3352 = vmatpush3.bf16.msra.mxu0 %v3375_v25  ;;  %v260_v45 = vld [vmem:[%s5299_s0 + $0x778] sm:$0xff]  ;;  %v3381_v25 = vld [vmem:[%s5300_s1 + $0x20] sm:$0xff]  }
 0x1f1   :  { %v1184_v35 = vmul.f32 0.015625, %v691_v39  ;;  %v688_v40 = vpop.xlane.xlu0 %687  ;;  %v896_v14 = vsel %vm277_vm0, %v227_v48, 0.0  ;;  %v3376_v50 = vld [vmem:[%s5300_s1 + $0x70] sm:$0xff]  }
 0x1f2   :  { %v3009_v62 = vsel %vm1880_vm4, %v3008_v56, %v4825_v58  ;;  %v1714_v24 = vunpack.c.l.b16 %v1364_v27  ;;  %v1715_v44 = vunpack.c.h.b16 %v1364_v27  ;;  %v1183_v36 = vmul.f32 0.015625, %v688_v40  ;;  %v259_v27 = vld [vmem:[%s5299_s0 + $0x770] sm:$0xff]  ;;  %vm5314_vm4 = vmmov %vm5311_vm1  ;;  %3353 = vmatprep.subr.bf16.mxu0 %v3376_v50 }
 0x1f3   :  { %v4960_v6 = vsel %vm1887_vm5, %v3013_v20, %v3009_v62  ;;  %990 = vadd.xlane.f32.xlu1 %v989_v41  ;;  %v899_v58 = vsel %vm277_vm0, %v228_v59, 0.0  ;;  %v3377_v39 = vld [vmem:[%s5300_s1 + $0x30] sm:$0xff]   ;;  %v995_v59 = vsel %vm277_vm0, %v260_v45, 0.0  ;;  %vm5315_vm5 = vmmov %vm5311_vm1 }
 0x1f4   :  { %v2485_v10 = vrot.slane %v1714_v24, %v3819_v49  ;;  %v2490_v7 = vrot.slane %v1715_v44, %v3832_v60  ;;  %v1371_v8 = vpack.c.bf16 %v1184_v35, %v1183_v36  ;;  %987 = vadd.xlane.f32.xlu0 %v986_v16  ;;  %v835_v11 = vpop.xlane.xlu1 %834  ;;  %3354 = vmatpush3.bf16.msra.mxu0 %v3377_v39  ;;  %v992_v44 = vsel %vm277_vm0, %v259_v27, 0.0  ;;  %v3378_v36 = vld [vmem:[%s5300_s1 + $0x68] sm:$0xff]   ;;  %vm5316_vm0 = vmmov %vm5313_vm3 }
 0x1f5   :  { %v1232_v9 = vmul.f32 0.015625, %v835_v11  ;;  %v832_v12 = vpop.xlane.xlu0 %831  ;;  %v3379_v11 = vld [vmem:[%s5300_s1 + $0x28] sm:$0xff]   ;;  %3355 = vmatprep.subr.bf16.mxu0 %v3378_v36  ;;  %vm5317_vm11 = vmmov %vm5316_vm0 }
 0x1f6   :  { %v2486_v19 = vsel %vm1922_vm10, %v2485_v10, %v4840_v61  ;;  %v1728_v29 = vunpack.c.l.b16 %v1371_v8  ;;  %v1729_v30 = vunpack.c.h.b16 %v1371_v8  ;;  %v1231_v18 = vmul.f32 0.015625, %v832_v12 }
 0x1f7   :  { %v4981_v31 = vsel %vm5313_vm3, %v2490_v7, %v2486_v19  ;;  %900 = vadd.xlane.f32.xlu1 %v899_v58  ;;  %v3380_v19 = vld [vmem:[%s5300_s1 + $0x60] sm:$0xff]   ;;  %vm5322_vm3 = vmmov %vm5311_vm1 }
 0x1f8   :  { %v2554_v32 = vrot.slane %v1728_v29, %v3797_v21  ;;  %v2559_v61 = vrot.slane %v1729_v30, %v3812_v37  ;;  %v1395_v17 = vpack.c.bf16 %v1232_v9, %v1231_v18  ;;  %897 = vadd.xlane.f32.xlu0 %v896_v14  ;;  %v877_v33 = vpop.xlane.xlu1 %876  ;;  %3356 = vmatpush3.bf16.msra.mxu0 %v3379_v11 }
 0x1f9   :  { %v1246_v34 = vmul.f32 0.015625, %v877_v33  ;;  %v874_v26 = vpop.xlane.xlu0 %873  ;;  %3357 = vmatprep.subr.bf16.mxu0 %v3380_v19 }
 0x1fa   :  { %v2555_v54 = vsel %vm1908_vm8, %v2554_v32, %v4855_v46  ;;  %v1776_v47 = vunpack.c.l.b16 %v1395_v17  ;;  %v1777_v56 = vunpack.c.h.b16 %v1395_v17  ;;  %v1245_v20 = vmul.f32 0.015625, %v874_v26  ;;  %v3382_v26 = vld [vmem:[%s5300_s1 + $0x58] sm:$0xff]  }
 0x1fb   :  { %v5002_v41 = vsel %vm5314_vm4, %v2559_v61, %v2555_v54  ;;  %1044 = vadd.xlane.f32.xlu1 %v1043_v28  ;;  %vm5323_vm4 = vmmov %vm5316_vm0 }
 0x1fc   :  { %v2791_v35 = vrot.slane %v1776_v47, %v3797_v21  ;;  %v2796_v46 = vrot.slane %v1777_v56, %v3812_v37  ;;  %v1402_v40 = vpack.c.bf16 %v1246_v34, %v1245_v20  ;;  %1041 = vadd.xlane.f32.xlu0 %v1040_v38  ;;  %v1021_v16 = vpop.xlane.xlu1 %1020  ;;  %3358 = vmatpush3.bf16.msra.mxu0 %v3381_v25  ;;  %v3383_v47 = vld [vmem:[%s5300_s1 + $0x18] sm:$0xff]  }
 0x1fd   :  { %v1294_v62 = vmul.f32 0.015625, %v1021_v16  ;;  %v1018_v24 = vpop.xlane.xlu0 %1017  ;;  %3359 = vmatprep.subr.bf16.mxu0 %v3382_v26 }
 0x1fe   :  { %v2792_v48 = vsel %vm1908_vm8, %v2791_v35, %v4870_v1  ;;  %v1790_v10 = vunpack.c.l.b16 %v1402_v40  ;;  %v1791_v7 = vunpack.c.h.b16 %v1402_v40  ;;  %v1293_v8 = vmul.f32 0.015625, %v1018_v24  ;;  %v3384_v40 = vld [vmem:[%s5300_s1 + $0x50] sm:$0xff]  }
 0x1ff   :  { %v5017_v58 = vsel %vm5315_vm5, %v2796_v46, %v2792_v48  ;;  %996 = vadd.xlane.f32.xlu1 %v995_v59  ;;  %vm5324_vm5 = vmmov %vm5316_vm0 }
 0x200   :  { %v2860_v9 = vrot.slane %v1790_v10, %v3779_v3  ;;  %v2865_v12 = vrot.slane %v1791_v7, %v3782_v4  ;;  %v1426_v14 = vpack.c.bf16 %v1294_v62, %v1293_v8  ;;  %993 = vadd.xlane.f32.xlu0 %v992_v44  ;;  %v601_v63 = vpop.xlane.xlu1 %600  ;;  %3360 = vmatpush3.bf16.msra.mxu0 %v3383_v47  ;;  %v3385_v44 = vld [vmem:[%s5300_s1 + $0x10] sm:$0xff]  }
 0x201   :  { %v1154_v1 = vmul.f32 0.015625, %v601_v63  ;;  %v598_v2 = vpop.xlane.xlu0 %597  ;;  %3361 = vmatprep.subr.bf16.mxu0 %v3384_v40 }
 0x202   :  { %v2861_v29 = vsel %vm1894_vm6, %v2860_v9, %v4885_v0  ;;  %v1838_v30 = vunpack.c.l.b16 %v1426_v14  ;;  %v1839_v18 = vunpack.c.h.b16 %v1426_v14  ;;  %v1153_v15 = vmul.f32 0.015625, %v598_v2  ;;  %v3386_v9 = vld [vmem:[%s5300_s1 + $0x48] sm:$0xff]  }
 0x203   :  { %v5030_v32 = vsel %vm1901_vm7, %v2865_v12, %v2861_v29  ;;  %v3387_v2 = vld [vmem:[%s5300_s1 + $0x8] sm:$0xff]  }
 0x204   :  { %v3097_v61 = vrot.slane %v1838_v30, %v3779_v3  ;;  %v3102_v17 = vrot.slane %v1839_v18, %v3782_v4  ;;  %v1356_v33 = vpack.c.bf16 %v1154_v1, %v1153_v15  ;;  %v745_v28 = vpop.xlane.xlu1 %744  ;;  %3362 = vmatpush3.bf16.msra.mxu0 %v3385_v44 }
 0x205   :  { %v1202_v34 = vmul.f32 0.015625, %v745_v28  ;;  %v742_v0 = vpop.xlane.xlu0 %741  ;;  %3363 = vmatprep.subr.bf16.mxu0 %v3386_v9 }
 0x206   :  { %v3098_v38 = vsel %vm1894_vm6, %v3097_v61, %v4900_v51  ;;  %v1698_v45 = vunpack.c.l.b16 %v1356_v33  ;;  %v1699_v50 = vunpack.c.h.b16 %v1356_v33  ;;  %v1201_v54 = vmul.f32 0.015625, %v742_v0  ;;  %v3389_v0 = vld [vmem:[%s5300_s1] sm:$0xff]  }
 0x207   :  { %v5043_v56 = vsel %vm1901_vm7, %v3102_v17, %v3098_v38 }
 0x208   :  { %v2406_v20 = vrot.slane %v1698_v45, %v3819_v49  ;;  %v2411_v27 = vrot.slane %v1699_v50, %v3832_v60  ;;  %v1380_v39 = vpack.c.bf16 %v1202_v34, %v1201_v54  ;;  %v787_v35 = vpop.xlane.xlu1 %786  ;;  %3364 = vmatpush3.bf16.msra.mxu0 %v3387_v2 }
 0x209   :  { %v1216_v46 = vmul.f32 0.015625, %v787_v35  ;;  %v784_v51 = vpop.xlane.xlu0 %783 }
 0x20a   :  { %v2407_v16 = vsel %vm1922_vm10, %v2406_v20, %v4452_v53  ;;  %v1746_v59 = vunpack.c.l.b16 %v1380_v39  ;;  %v1747_v62 = vunpack.c.h.b16 %v1380_v39  ;;  %v1215_v24 = vmul.f32 0.015625, %v784_v51 }
 0x20b   :  { %v5056_v36 = vsel %vm5316_vm0, %v2411_v27, %v2407_v16 }
 0x20c   :  { %v2643_v48 = vrot.slane %v1746_v59, %v3819_v49  ;;  %v2648_v10 = vrot.slane %v1747_v62, %v3832_v60  ;;  %v1387_v7 = vpack.c.bf16 %v1216_v46, %v1215_v24  ;;  %v931_v8 = vpop.xlane.xlu1 %930 }
 0x20d   :  { %v1264_v11 = vmul.f32 0.015625, %v931_v8  ;;  %v928_v53 = vpop.xlane.xlu0 %927 }
 0x20e   :  { %v2644_v12 = vsel %vm1922_vm10, %v2643_v48, %v4915_v5  ;;  %v1760_v14 = vunpack.c.l.b16 %v1387_v7  ;;  %v1761_v63 = vunpack.c.h.b16 %v1387_v7  ;;  %v1263_v1 = vmul.f32 0.015625, %v928_v53  ;;  %v3388_v5 = vld [vmem:[%s5300_s1 + $0x40] sm:$0xff]  }
 0x20f   :  { %v5069_v19 = vsel %vm5317_vm11, %v2648_v10, %v2644_v12  ;;  %3365 = vmatprep.subr.bf16.mxu0 %v3388_v5  ;;  %vm3148_vm11 = vcmask 1043459  }
 0x210   :  { %v2712_v29 = vrot.slane %v1760_v14, %v3797_v21  ;;  %v2717_v30 = vrot.slane %v1761_v63, %v3812_v37  ;;  %v1411_v18 = vpack.c.bf16 %v1264_v11, %v1263_v1  ;;  %v973_v15 = vpop.xlane.xlu1 %972  ;;  %3366 = vmatpush3.bf16.msra.mxu0 %v3389_v0 }
 0x211   :  { %v1278_v25 = vmul.f32 0.015625, %v973_v15  ;;  %v970_v61 = vpop.xlane.xlu0 %969 }
 0x212   :  { %v2713_v17 = vsel %vm1908_vm8, %v2712_v29, %v4930_v57  ;;  %v1808_v33 = vunpack.c.l.b16 %v1411_v18  ;;  %v1809_v28 = vunpack.c.h.b16 %v1411_v18  ;;  %v1277_v34 = vmul.f32 0.015625, %v970_v61 }
 0x213   :  { %v5082_v26 = vsel %vm5318_vm9, %v2717_v30, %v2713_v17  ;;  %vm3152_vm9 = vcmask 1045509  }
 0x214   :  { %v2949_v38 = vrot.slane %v1808_v33, %v3797_v21  ;;  %v2954_v45 = vrot.slane %v1809_v28, %v3812_v37  ;;  %v1418_v50 = vpack.c.bf16 %v1278_v25, %v1277_v34  ;;  %v655_v54 = vpop.xlane.xlu1 %654 }
 0x215   :  { %v1172_v47 = vmul.f32 0.015625, %v655_v54  ;;  %v652_v57 = vpop.xlane.xlu0 %651 }
 0x216   :  { %v2950_v20 = vsel %vm1908_vm8, %v2949_v38, %v4945_v55  ;;  %v1822_v27 = vunpack.c.l.b16 %v1418_v50  ;;  %v1823_v39 = vunpack.c.h.b16 %v1418_v50  ;;  %v1171_v35 = vmul.f32 0.015625, %v652_v57 }
 0x217   :  { %v5089_v46 = vsel %vm5311_vm1, %v2954_v45, %v2950_v20 }
 0x218   :  { %v3018_v51 = vrot.slane %v1822_v27, %v3779_v3  ;;  %v3023_v40 = vrot.slane %v1823_v39, %v3782_v4  ;;  %v1365_v16 = vpack.c.bf16 %v1172_v47, %v1171_v35  ;;  %v697_v59 = vpop.xlane.xlu1 %696 }
 0x219   :  { %v1186_v62 = vmul.f32 0.015625, %v697_v59  ;;  %v694_v24 = vpop.xlane.xlu0 %693 }
 0x21a   :  { %v3019_v44 = vsel %vm1894_vm6, %v3018_v51, %v4960_v6  ;;  %v1716_v48 = vunpack.c.l.b16 %v1365_v16  ;;  %v1717_v10 = vunpack.c.h.b16 %v1365_v16  ;;  %v1185_v55 = vmul.f32 0.015625, %v694_v24  ;;  %vm5319_vm6 = vmmov %vm5316_vm0 }
 0x21b   :  { %v5096_v7 = vsel %vm1901_vm7, %v3023_v40, %v3019_v44  ;;  %vm5320_vm7 = vmmov %vm5316_vm0 }
 0x21c   :  { %v2495_v8 = vrot.slane %v1716_v48, %v3851_v22  ;;  %v2500_v11 = vrot.slane %v1717_v10, %v3854_v23  ;;  %v1372_v3 = vpack.c.bf16 %v1186_v62, %v1185_v55  ;;  %v841_v53 = vpop.xlane.xlu1 %840  ;;  %vm5325_vm0 = vmmov %vm5311_vm1  ;;  %vm3154_vm1 = vcmask 1046534  }
 0x21d   :  { %v1234_v4 = vmul.f32 0.015625, %v841_v53  ;;  %v838_v9 = vpop.xlane.xlu0 %837 }
 0x21e   :  { %v2496_v12 = vsel %vm1936_vm12, %v2495_v8, %v4981_v31  ;;  %v1730_v14 = vunpack.c.l.b16 %v1372_v3  ;;  %v1731_v63 = vunpack.c.h.b16 %v1372_v3  ;;  %v1233_v6 = vmul.f32 0.015625, %v838_v9 }
 0x21f   :  { %v5103_v1 = vsel %vm1943_vm13, %v2500_v11, %v2496_v12 }
 0x220   :  { %v2564_v2 = vrot.slane %v1730_v14, %v3819_v49  ;;  %v2569_v29 = vrot.slane %v1731_v63, %v3832_v60  ;;  %v1396_v30 = vpack.c.bf16 %v1234_v4, %v1233_v6  ;;  %v883_v18 = vpop.xlane.xlu1 %882 }
 0x221   :  { %v1248_v15 = vmul.f32 0.015625, %v883_v18  ;;  %v880_v5 = vpop.xlane.xlu0 %879 }
 0x222   :  { %v2565_v25 = vsel %vm1922_vm10, %v2564_v2, %v5002_v41  ;;  %v1778_v61 = vunpack.c.l.b16 %v1396_v30  ;;  %v1779_v17 = vunpack.c.h.b16 %v1396_v30  ;;  %v1247_v31 = vmul.f32 0.015625, %v880_v5 }
 0x223   :  { %v5110_v33 = vsel %vm5319_vm6, %v2569_v29, %v2565_v25  ;;  %vm5326_vm6 = vmmov %vm5323_vm4 }
 0x224   :  { %v2801_v28 = vrot.slane %v1778_v61, %v3819_v49  ;;  %v2806_v34 = vrot.slane %v1779_v17, %v3832_v60  ;;  %v1403_v0 = vpack.c.bf16 %v1248_v15, %v1247_v31  ;;  %v1027_v38 = vpop.xlane.xlu1 %1026 }
 0x225   :  { %v1296_v45 = vmul.f32 0.015625, %v1027_v38  ;;  %v1024_v50 = vpop.xlane.xlu0 %1023 }
 0x226   :  { %v2802_v54 = vsel %vm1922_vm10, %v2801_v28, %v5017_v58  ;;  %v1792_v47 = vunpack.c.l.b16 %v1403_v0  ;;  %v1793_v57 = vunpack.c.h.b16 %v1403_v0  ;;  %v1295_v41 = vmul.f32 0.015625, %v1024_v50 }
 0x227   :  { %v5117_v20 = vsel %vm5320_vm7, %v2806_v34, %v2802_v54  ;;  %vm5327_vm7 = vmmov %vm5323_vm4 }
 0x228   :  { %v2870_v27 = vrot.slane %v1792_v47, %v3797_v21  ;;  %v2875_v39 = vrot.slane %v1793_v57, %v3812_v37  ;;  %v1427_v35 = vpack.c.bf16 %v1296_v45, %v1295_v41  ;;  %v607_v51 = vpop.xlane.xlu1 %606 }
 0x229   :  { %v1156_v40 = vmul.f32 0.015625, %v607_v51  ;;  %v604_v16 = vpop.xlane.xlu0 %603 }
 0x22a   :  { %v2871_v59 = vsel %vm1908_vm8, %v2870_v27, %v5030_v32  ;;  %v1840_v62 = vunpack.c.l.b16 %v1427_v35  ;;  %v1841_v24 = vunpack.c.h.b16 %v1427_v35  ;;  %v1155_v58 = vmul.f32 0.015625, %v604_v16 }
 0x22b   :  { %v5124_v44 = vsel %vm5321_vm2, %v2875_v39, %v2871_v59  ;;  %vm3156_vm2 = vcmask 1047559  }
 0x22c   :  { %v3107_v48 = vrot.slane %v1840_v62, %v3797_v21  ;;  %v3112_v10 = vrot.slane %v1841_v24, %v3812_v37  ;;  %v1357_v55 = vpack.c.bf16 %v1156_v40, %v1155_v58  ;;  %v751_v8 = vpop.xlane.xlu1 %750 }
 0x22d   :  { %v1204_v11 = vmul.f32 0.015625, %v751_v8  ;;  %v748_v3 = vpop.xlane.xlu0 %747 }
 0x22e   :  { %v3108_v53 = vsel %vm1908_vm8, %v3107_v48, %v5043_v56  ;;  %v1700_v4 = vunpack.c.l.b16 %v1357_v55  ;;  %v1701_v9 = vunpack.c.h.b16 %v1357_v55  ;;  %v1203_v32 = vmul.f32 0.015625, %v748_v3 }
 0x22f   :  { %v5131_v12 = vsel %vm5322_vm3, %v3112_v10, %v3108_v53 }
 0x230   :  { %v2416_v14 = vrot.slane %v1700_v4, %v3851_v22  ;;  %v2421_v63 = vrot.slane %v1701_v9, %v3854_v23  ;;  %v1381_v6 = vpack.c.bf16 %v1204_v11, %v1203_v32  ;;  %v793_v2 = vpop.xlane.xlu1 %792 }
 0x231   :  { %v1218_v29 = vmul.f32 0.015625, %v793_v2  ;;  %v790_v30 = vpop.xlane.xlu0 %789 }
 0x232   :  { %v2417_v18 = vsel %vm1936_vm12, %v2416_v14, %v5056_v36  ;;  %v1748_v15 = vunpack.c.l.b16 %v1381_v6  ;;  %v1749_v5 = vunpack.c.h.b16 %v1381_v6  ;;  %v1217_v56 = vmul.f32 0.015625, %v790_v30 }
 0x233   :  { %v5138_v25 = vsel %vm1943_vm13, %v2421_v63, %v2417_v18 }
 0x234   :  { %v2653_v61 = vrot.slane %v1748_v15, %v3851_v22  ;;  %v2658_v17 = vrot.slane %v1749_v5, %v3854_v23  ;;  %v1388_v31 = vpack.c.bf16 %v1218_v29, %v1217_v56  ;;  %v937_v28 = vpop.xlane.xlu1 %936 }
 0x235   :  { %v1266_v34 = vmul.f32 0.015625, %v937_v28  ;;  %v934_v0 = vpop.xlane.xlu0 %933 }
 0x236   :  { %v2654_v38 = vsel %vm1936_vm12, %v2653_v61, %v5069_v19  ;;  %v1762_v45 = vunpack.c.l.b16 %v1388_v31  ;;  %v1763_v50 = vunpack.c.h.b16 %v1388_v31  ;;  %v1265_v36 = vmul.f32 0.015625, %v934_v0 }
 0x237   :  { %v5145_v54 = vsel %vm1943_vm13, %v2658_v17, %v2654_v38 }
 0x238   :  { %v2722_v47 = vrot.slane %v1762_v45, %v3819_v49  ;;  %v2727_v57 = vrot.slane %v1763_v50, %v3832_v60  ;;  %v1412_v41 = vpack.c.bf16 %v1266_v34, %v1265_v36  ;;  %v979_v27 = vpop.xlane.xlu1 %978 }
 0x239   :  { %v1280_v39 = vmul.f32 0.015625, %v979_v27  ;;  %v976_v35 = vpop.xlane.xlu0 %975 }
 0x23a   :  { %v2723_v51 = vsel %vm1922_vm10, %v2722_v47, %v5082_v26  ;;  %v1810_v40 = vunpack.c.l.b16 %v1412_v41  ;;  %v1811_v16 = vunpack.c.h.b16 %v1412_v41  ;;  %v1279_v19 = vmul.f32 0.015625, %v976_v35 }
 0x23b   :  { %v5152_v59 = vsel %vm5323_vm4, %v2727_v57, %v2723_v51 }
 0x23c   :  { %v2959_v62 = vrot.slane %v1810_v40, %v3819_v49  ;;  %v2964_v24 = vrot.slane %v1811_v16, %v3832_v60  ;;  %v1419_v58 = vpack.c.bf16 %v1280_v39, %v1279_v19  ;;  %v661_v48 = vpop.xlane.xlu1 %660 }
 0x23d   :  { %v1174_v10 = vmul.f32 0.015625, %v661_v48  ;;  %v658_v55 = vpop.xlane.xlu0 %657 }
 0x23e   :  { %v2960_v8 = vsel %vm1922_vm10, %v2959_v62, %v5089_v46  ;;  %v1824_v11 = vunpack.c.l.b16 %v1419_v58  ;;  %v1825_v3 = vunpack.c.h.b16 %v1419_v58  ;;  %v1173_v26 = vmul.f32 0.015625, %v658_v55 }
 0x23f   :  { %v5159_v53 = vsel %vm5324_vm5, %v2964_v24, %v2960_v8 }
 0x240   :  { %v3028_v4 = vrot.slane %v1824_v11, %v3797_v21  ;;  %v3033_v9 = vrot.slane %v1825_v3, %v3812_v37  ;;  %v1366_v32 = vpack.c.bf16 %v1174_v10, %v1173_v26  ;;  %v703_v14 = vpop.xlane.xlu1 %702 }
 0x241   :  { %v1188_v63 = vmul.f32 0.015625, %v703_v14  ;;  %v700_v6 = vpop.xlane.xlu0 %699 }
 0x242   :  { %v3029_v2 = vsel %vm1908_vm8, %v3028_v4, %v5096_v7  ;;  %v1718_v29 = vunpack.c.l.b16 %v1366_v32  ;;  %v1719_v30 = vunpack.c.h.b16 %v1366_v32  ;;  %v1187_v46 = vmul.f32 0.015625, %v700_v6 }
 0x243   :  { %v5166_v18 = vsel %vm5325_vm0, %v3033_v9, %v3029_v2  ;;  %vm3150_vm8 = vcmask 1044484  }
 0x244   :  { %v2505_v15 = vrot.slane %v1718_v29, %v3868_v42  ;;  %v2510_v5 = vrot.slane %v1719_v30, %v3871_v43  ;;  %v1373_v21 = vpack.c.bf16 %v1188_v63, %v1187_v46  ;;  %v847_v56 = vpop.xlane.xlu1 %846 }
 0x245   :  { %v844_v37 = vpop.xlane.xlu0 %843  ;;  %v1236_v63 = vmul.f32 0.015625, %v847_v56 }
 0x246   :  { %v2506_v61 = vsel %vm1950_vm14, %v2505_v15, %v5103_v1  ;;  %v1732_v17 = vunpack.c.l.b16 %v1373_v21  ;;  %v1733_v31 = vunpack.c.h.b16 %v1373_v21  ;;  %v1235_v6 = vmul.f32 0.015625, %v844_v37 }
 0x247   :  { %v2511_v7 = vsel %vm1957_vm15, %v2510_v5, %v2506_v61 }
 0x248   :  { %v2574_v28 = vrot.slane %v1732_v17, %v3851_v22  ;;  %v2579_v34 = vrot.slane %v1733_v31, %v3854_v23  ;;  %v889_v0 = vpop.xlane.xlu1 %888  ;;  %v3160_v38 = vsel %vm3148_vm11, %v2511_v7, %v4392_v52  ;;  %v1397_v15 = vpack.c.bf16 %v1236_v63, %v1235_v6 }
 0x249   :  { %v886_v45 = vpop.xlane.xlu0 %885 }
 0x24a   :  { %v2575_v50 = vsel %vm1936_vm12, %v2574_v28, %v5110_v33  ;;  %v1781_v28 = vunpack.c.h.b16 %v1397_v15 }
 0x24b   :  { %v5180_v36 = vsel %vm1943_vm13, %v2579_v34, %v2575_v50  ;;  %v1249_v34 = vmul.f32 0.015625, %v886_v45 }
 0x24c   :  { %v5182_v1 = vpop.xlane.xlu1 %1032 }
 0x24d   :  { %v5184_v47 = vpop.xlane.xlu0 %1029 }
 0x250   :  { %v613_v57 = vpop.xlane.xlu1 %612 }
 0x251   :  { %v1158_v41 = vmul.f32 0.015625, %v613_v57  ;;  %v610_v27 = vpop.xlane.xlu0 %609 }
 0x252   :  { %v1157_v39 = vmul.f32 0.015625, %v610_v27 }
 0x254   :  { %v1358_v35 = vpack.c.bf16 %v1158_v41, %v1157_v39  ;;  %v757_v51 = vpop.xlane.xlu1 %756 }
 0x255   :  { %v1206_v40 = vmul.f32 0.015625, %v757_v51  ;;  %v754_v16 = vpop.xlane.xlu0 %753 }
 0x256   :  { %v1702_v52 = vunpack.c.l.b16 %v1358_v35  ;;  %v1703_v19 = vunpack.c.h.b16 %v1358_v35  ;;  %v1205_v62 = vmul.f32 0.015625, %v754_v16 }
 0x258   :  { %v2426_v33 = vrot.slane %v1702_v52, %v3868_v42  ;;  %v2431_v24 = vrot.slane %v1703_v19, %v3871_v43  ;;  %v1382_v58 = vpack.c.bf16 %v1206_v40, %v1205_v62  ;;  %v799_v48 = vpop.xlane.xlu1 %798  ;;  %v2816_v19 = vrot.slane %v1781_v28, %v3854_v23 }
 0x259   :  { %v796_v10 = vpop.xlane.xlu0 %795  ;;  %v1220_v31 = vmul.f32 0.015625, %v799_v48 }
 0x25a   :  { %v2427_v55 = vsel %vm1950_vm14, %v2426_v33, %v5138_v25  ;;  %v1750_v8 = vunpack.c.l.b16 %v1382_v58  ;;  %v1751_v11 = vunpack.c.h.b16 %v1382_v58  ;;  %v1219_v56 = vmul.f32 0.015625, %v796_v10 }
 0x25b   :  { %v2432_v3 = vsel %vm1957_vm15, %v2431_v24, %v2427_v55  ;;  %v1298_v55 = vmul.f32 0.015625, %v5182_v1 }
 0x25c   :  { %v2663_v26 = vrot.slane %v1750_v8, %v3868_v42  ;;  %v2668_v4 = vrot.slane %v1751_v11, %v3871_v43  ;;  %v943_v9 = vpop.xlane.xlu1 %942  ;;  %v3149_v32 = vsel %vm3148_vm11, %v2432_v3, %v4293_v13  ;;  %v1780_v13 = vunpack.c.l.b16 %v1397_v15 }
 0x25d   :  { %v940_v14 = vpop.xlane.xlu0 %939  ;;  %v1389_v35 = vpack.c.bf16 %v1220_v31, %v1219_v56  ;;  %v1268_v33 = vmul.f32 0.015625, %v943_v9  ;;  %v1297_v8 = vmul.f32 0.015625, %v5184_v47 }
 0x25e   :  { %v2664_v2 = vsel %vm1950_vm14, %v2663_v26, %v5145_v54  ;;  %v1250_v54 = vmul.f32 0.015625, %v889_v0  ;;  %v2811_v41 = vrot.slane %v1780_v13, %v3851_v22  ;;  %v1267_v0 = vmul.f32 0.015625, %v940_v14 }
 0x25f   :  { %v2669_v25 = vsel %vm1957_vm15, %v2668_v4, %v2664_v2  ;;  %v1764_v3 = vunpack.c.l.b16 %v1389_v35  ;;  %v5221_v2 = vpack.c.bf16 %v1298_v55, %v1297_v8 }
 0x260   :  { %v5198_v29 = vpop.xlane.xlu1 %984  ;;  %v3161_v30 = vsel %vm3150_vm8, %v2669_v25, %v3160_v38  ;;  %v1404_v62 = vpack.c.bf16 %v1250_v54, %v1249_v34  ;;  %v2812_v24 = vsel %vm1936_vm12, %v2811_v41, %v5117_v20  ;;  %v1765_v25 = vunpack.c.h.b16 %v1389_v35 }
 0x261   :  { %v5201_v46 = vpop.xlane.xlu0 %981  ;;  %v2817_v20 = vsel %vm1943_vm13, %v2816_v19, %v2812_v24  ;;  %v1842_v54 = vunpack.c.l.b16 %v5221_v2 }
 0x262   :  { %v1794_v6 = vunpack.c.l.b16 %v1404_v62  ;;  %v1795_v1 = vunpack.c.h.b16 %v1404_v62  ;;  %v2737_v34 = vrot.slane %v1765_v25, %v3854_v23 }
 0x264   :  { %v709_v5 = vpop.xlane.xlu1 %708 }
 0x265   :  { %v1190_v21 = vmul.f32 0.015625, %v709_v5  ;;  %v706_v61 = vpop.xlane.xlu0 %705  ;;  %v2732_v5 = vrot.slane %v1764_v3, %v3851_v22 }
 0x266   :  { %v1189_v17 = vmul.f32 0.015625, %v706_v61 }
 0x268   :  { %v1374_v37 = vpack.c.bf16 %v1190_v21, %v1189_v17  ;;  %v853_v7 = vpop.xlane.xlu1 %852 }
 0x269   :  { %v1238_v50 = vmul.f32 0.015625, %v853_v7  ;;  %v850_v57 = vpop.xlane.xlu0 %849  ;;  %v2885_v7 = vrot.slane %v1795_v1, %v3832_v60 }
 0x26a   :  { %v1734_v38 = vunpack.c.l.b16 %v1374_v37  ;;  %v1735_v27 = vunpack.c.h.b16 %v1374_v37  ;;  %v1237_v39 = vmul.f32 0.015625, %v850_v57  ;;  %v2880_v37 = vrot.slane %v1794_v6, %v3819_v49 }
 0x26b   :  { %v1281_v57 = vmul.f32 0.015625, %v5201_v46 }
 0x26c   :  { %v2584_v51 = vrot.slane %v1734_v38, %v3868_v42  ;;  %v2589_v40 = vrot.slane %v1735_v27, %v3871_v43  ;;  %v1398_v16 = vpack.c.bf16 %v1238_v50, %v1237_v39  ;;  %v895_v52 = vpop.xlane.xlu1 %894  ;;  %v1282_v50 = vmul.f32 0.015625, %v5198_v29 }
 0x26d   :  { %v892_v45 = vpop.xlane.xlu0 %891  ;;  %v1252_v21 = vmul.f32 0.015625, %v895_v52  ;;  %v2881_v19 = vsel %vm1922_vm10, %v2880_v37, %v5124_v44 }
 0x26e   :  { %v2585_v58 = vsel %vm1950_vm14, %v2584_v51, %v5180_v36  ;;  %v1782_v48 = vunpack.c.l.b16 %v1398_v16  ;;  %v1783_v10 = vunpack.c.h.b16 %v1398_v16  ;;  %v1413_v36 = vpack.c.bf16 %v1268_v33, %v1267_v0 }
 0x26f   :  { %v2590_v11 = vsel %vm1957_vm15, %v2589_v40, %v2585_v58  ;;  %v1251_v61 = vmul.f32 0.015625, %v892_v45  ;;  %v1843_v33 = vunpack.c.h.b16 %v5221_v2  ;;  %v1420_v45 = vpack.c.bf16 %v1282_v50, %v1281_v57 }
 0x270   :  { %v2821_v26 = vrot.slane %v1782_v48, %v3868_v42  ;;  %v2826_v4 = vrot.slane %v1783_v10, %v3871_v43  ;;  %v1039_v9 = vpop.xlane.xlu1 %1038  ;;  %v5217_v14 = vsel %vm3150_vm8, %v2590_v11, %v3149_v32  ;;  %v1812_v17 = vunpack.c.l.b16 %v1413_v36 }
 0x271   :  { %v1036_v63 = vpop.xlane.xlu0 %1035  ;;  %v1813_v41 = vunpack.c.h.b16 %v1413_v36  ;;  %v1405_v38 = vpack.c.bf16 %v1252_v21, %v1251_v61  ;;  %v1300_v51 = vmul.f32 0.015625, %v1039_v9  ;;  %v1826_v6 = vunpack.c.l.b16 %v1420_v45 }
 0x272   :  { %v2822_v47 = vsel %vm1950_vm14, %v2821_v26, %v2817_v20  ;;  %v2969_v35 = vrot.slane %v1812_v17, %v3851_v22  ;;  %v1299_v40 = vmul.f32 0.015625, %v1036_v63  ;;  %v2886_v63 = vsel %vm5326_vm6, %v2885_v7, %v2881_v19 }
 0x273   :  { %v2827_v15 = vsel %vm1957_vm15, %v2826_v4, %v2822_v47  ;;  %v1796_v24 = vunpack.c.l.b16 %v1405_v38  ;;  %v2974_v8 = vrot.slane %v1813_v41, %v3854_v23  ;;  %v1797_v1 = vunpack.c.h.b16 %v1405_v38 }
 0x274   :  { %v805_v32 = vpop.xlane.xlu1 %804  ;;  %v5226_v13 = vsel %vm3152_vm9, %v2827_v15, %v3161_v30  ;;  %v2733_v30 = vsel %vm1936_vm12, %v2732_v5, %v5152_v59  ;;  %v3117_v59 = vrot.slane %v1842_v54, %v3819_v49  ;;  %v2970_v44 = vsel %vm1936_vm12, %v2969_v35, %v5159_v53 }
 0x275   :  { %v1222_v31 = vmul.f32 0.015625, %v805_v32  ;;  %v802_v56 = vpop.xlane.xlu0 %801  ;;  %v2738_v0 = vsel %vm1943_vm13, %v2737_v34, %v2733_v30  ;;  %v1429_v11 = vpack.c.bf16 %v1300_v51, %v1299_v40  ;;  %v2890_v2 = vrot.slane %v1796_v24, %v3851_v22 }
 0x276   :  { %v1221_v28 = vmul.f32 0.015625, %v802_v56  ;;  %v3118_v56 = vsel %vm1922_vm10, %v3117_v59, %v5131_v12  ;;  %v3122_v37 = vrot.slane %v1843_v33, %v3832_v60  ;;  %v1827_v54 = vunpack.c.h.b16 %v1420_v45 }
 0x277   :  { %v1844_v21 = vunpack.c.l.b16 %v1429_v11  ;;  %v3038_v34 = vrot.slane %v1826_v6, %v3819_v49  ;;  %v2895_v50 = vrot.slane %v1797_v1, %v3854_v23  ;;  %v2891_v57 = vsel %vm1936_vm12, %v2890_v2, %v2886_v63 }
 0x278   :  { %v1390_v27 = vpack.c.bf16 %v1222_v31, %v1221_v28  ;;  %v949_v39 = vpop.xlane.xlu1 %948  ;;  %v2975_v31 = vsel %vm1943_vm13, %v2974_v8, %v2970_v44  ;;  %v1845_v30 = vunpack.c.h.b16 %v1429_v11 }
 0x279   :  { %v1270_v16 = vmul.f32 0.015625, %v949_v39  ;;  %v946_v52 = vpop.xlane.xlu0 %945  ;;  %v3039_v19 = vsel %vm1922_vm10, %v3038_v34, %v5166_v18  ;;  %vm5328_vm10 = vmmov %vm5323_vm4 }
 0x27a   :  { %v1766_v29 = vunpack.c.l.b16 %v1390_v27  ;;  %v1767_v62 = vunpack.c.h.b16 %v1390_v27  ;;  %v1269_v46 = vmul.f32 0.015625, %v946_v52  ;;  %v3127_v27 = vrot.slane %v1844_v21, %v3851_v22 }
 0x27b   :  { %v3123_v52 = vsel %vm5327_vm7, %v3122_v37, %v3118_v56 }
 0x27c   :  { %v2742_v58 = vrot.slane %v1766_v29, %v3868_v42  ;;  %v2747_v48 = vrot.slane %v1767_v62, %v3871_v43  ;;  %v1414_v10 = vpack.c.bf16 %v1270_v16, %v1269_v46  ;;  %v991_v55 = vpop.xlane.xlu1 %990  ;;  %v3043_v29 = vrot.slane %v1827_v54, %v3832_v60 }
 0x27d   :  { %v1284_v3 = vmul.f32 0.015625, %v991_v55  ;;  %v988_v26 = vpop.xlane.xlu0 %987  ;;  %v2896_v62 = vsel %vm1943_vm13, %v2895_v50, %v2891_v57  ;;  %v3132_v46 = vrot.slane %v1845_v30, %v3854_v23 }
 0x27e   :  { %v2743_v4 = vsel %vm1950_vm14, %v2742_v58, %v2738_v0  ;;  %v1814_v9 = vunpack.c.l.b16 %v1414_v10  ;;  %v1815_v20 = vunpack.c.h.b16 %v1414_v10  ;;  %v1283_v36 = vmul.f32 0.015625, %v988_v26 }
 0x27f   :  { %v2748_v47 = vsel %vm1957_vm15, %v2747_v48, %v2743_v4  ;;  %v3128_v10 = vsel %vm1936_vm12, %v3127_v27, %v3123_v52 }
 0x280   :  { %v2979_v53 = vrot.slane %v1814_v9, %v3868_v42  ;;  %v2984_v25 = vrot.slane %v1815_v20, %v3871_v43  ;;  %v901_v15 = vpop.xlane.xlu1 %900  ;;  %v3153_v5 = vsel %vm3152_vm9, %v2748_v47, %v5217_v14  ;;  %v1421_v61 = vpack.c.bf16 %v1284_v3, %v1283_v36 }
 0x281   :  { %v1254_v32 = vmul.f32 0.015625, %v901_v15  ;;  %v898_v17 = vpop.xlane.xlu0 %897  ;;  %v3133_v20 = vsel %vm1943_vm13, %v3132_v46, %v3128_v10 }
 0x282   :  { %v1253_v7 = vmul.f32 0.015625, %v898_v17  ;;  %v2980_v28 = vsel %vm1950_vm14, %v2979_v53, %v2975_v31  ;;  %v1828_v39 = vunpack.c.l.b16 %v1421_v61  ;;  %v1829_v45 = vunpack.c.h.b16 %v1421_v61 }
 0x283   :  { %v2985_v14 = vsel %vm1957_vm15, %v2984_v25, %v2980_v28 }
 0x284   :  { %v1406_v41 = vpack.c.bf16 %v1254_v32, %v1253_v7  ;;  %v1045_v38 = vpop.xlane.xlu1 %1044  ;;  %v3163_v12 = vsel %vm3154_vm1, %v2985_v14, %v5226_v13  ;;  %v3048_v24 = vrot.slane %v1828_v39, %v3851_v22  ;;  %v3044_v22 = vsel %vm5328_vm10, %v3043_v29, %v3039_v19 }
 0x285   :  { %v1302_v35 = vmul.f32 0.015625, %v1045_v38  ;;  %v1042_v51 = vpop.xlane.xlu0 %1041  ;;  %v3053_v9 = vrot.slane %v1829_v45, %v3854_v23 }
 0x286   :  { %v1798_v40 = vunpack.c.l.b16 %v1406_v41  ;;  %v1799_v16 = vunpack.c.h.b16 %v1406_v41  ;;  %v1301_v49 = vmul.f32 0.015625, %v1042_v51  ;;  %v3049_v36 = vsel %vm1936_vm12, %v3048_v24, %v3044_v22 }
 0x288   :  { %v2900_v13 = vrot.slane %v1798_v40, %v3868_v42  ;;  %v2905_v33 = vrot.slane %v1799_v16, %v3871_v43  ;;  %v1430_v59 = vpack.c.bf16 %v1302_v35, %v1301_v49  ;;  %v997_v0 = vpop.xlane.xlu1 %996 }
 0x289   :  { %v1286_v58 = vmul.f32 0.015625, %v997_v0  ;;  %v994_v48 = vpop.xlane.xlu0 %993 }
 0x28a   :  { %v1846_v18 = vunpack.c.l.b16 %v1430_v59  ;;  %v1847_v55 = vunpack.c.h.b16 %v1430_v59  ;;  %v1285_v60 = vmul.f32 0.015625, %v994_v48  ;;  %v2901_v44 = vsel %vm1950_vm14, %v2900_v13, %v2896_v62 }
 0x28b   :  { %v2906_v8 = vsel %vm1957_vm15, %v2905_v33, %v2901_v44 }
 0x28c   :  { %v3137_v11 = vrot.slane %v1846_v18, %v3868_v42  ;;  %v3142_v3 = vrot.slane %v1847_v55, %v3871_v43  ;;  %v1422_v26 = vpack.c.bf16 %v1286_v58, %v1285_v60  ;;  %v3155_v4 = vsel %vm3154_vm1, %v2906_v8, %v3153_v5 }
 0x28d   :  { %v3054_v5 = vsel %vm1943_vm13, %v3053_v9, %v3049_v36 }
 0x28e   :  { %v1830_v63 = vunpack.c.l.b16 %v1422_v26  ;;  %v1831_v6 = vunpack.c.h.b16 %v1422_v26  ;;  %v3138_v1 = vsel %vm1950_vm14, %v3137_v11, %v3133_v20 }
 0x28f   :  { %v3143_v47 = vsel %vm1957_vm15, %v3142_v3, %v3138_v1 }
 0x290   :  { %v3058_v2 = vrot.slane %v1830_v63, %v3868_v42  ;;  %v3063_v53 = vrot.slane %v1831_v6, %v3871_v43  ;;  %v3164_v25 = vsel %vm3156_vm2, %v3143_v47, %v3163_v12  ;;  %v3350_v42 = vld [vmem:[%s5301_s2] ss:$0 sm:$0xff] }
 0x291   :  { %v3166_v15 = vpack.c.b16 %v3164_v25, %v3164_v25 }
 0x292   :  { %v3059_v23 = vsel %vm1950_vm14, %v3058_v2, %v3054_v5 }
 0x293   :  { %3297 = vmatprep.mubr.bf16.mxu0 %v3166_v15  ;;  %v3064_v21 = vsel %vm1957_vm15, %v3063_v53, %v3059_v23 }
 0x294   :  { %v3157_v61 = vsel %vm3156_vm2, %v3064_v21, %v3155_v4 }
 0x295   :  { %v3165_v32 = vpack.c.b16 %v3157_v61, %v3157_v61 }
 0x297   :  { %3298 = vmatmul.mubr.bf16.vlgmr.msra.gmra.mxu0 %v3165_v32 }
 0x357   :  { %v3367_v17 = vpop.f32.mrf.mxu0 }
 0x359   :  { %v3368_v31 = vpop.f32.mrf.mxu0 }
 0x35a   :  { %v3369_v43 = vadd.f32 %v3368_v31, %v3367_v17 }
 0x35b   :  { %v3370_v56 = vpop.f32.mrf.mxu0 }
 0x35c   :  { %v3318_v37 = vadd.f32 %v3369_v43, %v3350_v42 }
 0x35d   :  { %v3371_v7 = vpop.f32.mrf.mxu0 }
 0x35e   :  { %3319 = vst [vmem:[#allocation3] sm:$0xff] %v3318_v37 }
 0x35f   :  { %3401 = shalt.err (!%p3398_p4)
}
 0x360   :  { %3329 = dma.vmem_to_hbm [thread:$0]  %s3327_s17, 128, %s5302_s3, [#allocation4]  }
 0x361   :  { %3410 = dma.done.wait [#allocation4], 128  }
 0x362   :  { %3411 = vsyncadd [#allocation4], 4294967168 }
 0x363   :  { %3333 = vsyncpa [#allocation4], 1 }

</bundles_post_ra>
